<compile_context>
chip_gen: v7x
topology: tpu7x:2x2x1
jax: 0.10.0
libtpu: 0.0.40
codegen_flags: <defaults>
</compile_context>

<pallas_src>
import numpy as np

import jax
import jax.numpy as jnp
from jax import lax
from jax.experimental import pallas as pl
from jax.experimental.pallas import tpu as pltpu  # noqa: F401  (TPU backend)

_NEG_SLOPE = 0.01  # nn.LeakyReLU default negative slope


# ----------------------------- fused Pallas kernel ------------------------- #
def _fused_discriminator_kernel(*refs):
    """refs = (x_ref, w0, b0, w1, b1, ..., w6, b6, o_ref).

    Entire Discriminator forward: 7 dense matmuls (one per conv layer, conv
    pre-lowered to a block-Toeplitz matrix) + bias + LeakyReLU / Sigmoid.
    Everything stays in VMEM / vregs; only the final result is stored.
    """
    x_ref, *wb_refs, o_ref = refs
    n_layers = len(wb_refs) // 2

    h = x_ref[...]                                       # (N, H*W*Cin) f32
    for li in range(n_layers):
        w = wb_refs[2 * li][...]                         # (K, P*Cout)
        b = wb_refs[2 * li + 1][...]                     # (1, P*Cout)
        h = jnp.dot(h, w, preferred_element_type=jnp.float32) + b
        if li < n_layers - 1:
            h = jnp.where(h >= 0.0, h, _NEG_SLOPE * h)   # LeakyReLU
        else:
            h = 1.0 / (1.0 + jnp.exp(-h))                # Sigmoid (last layer)
    o_ref[...] = h.astype(o_ref.dtype)


def fused_forward(x_flat, dense_wb):
    """Single pallas_call running the whole network on VMEM-resident weights."""
    flat_args = []
    for w, b in dense_wb:
        flat_args.extend((w, b))

    n_rows = x_flat.shape[0]
    out_dim = dense_wb[-1][0].shape[1]
    flops = 2 * n_rows * sum(int(w.shape[0]) * int(w.shape[1]) for w, _ in dense_wb)
    bytes_accessed = 4 * (int(x_flat.size)
                          + sum(int(w.size) + int(b.size) for w, b in dense_wb)
                          + n_rows * out_dim)

    return pl.pallas_call(
        _fused_discriminator_kernel,
        out_shape=jax.ShapeDtypeStruct((n_rows, out_dim), jnp.float32),
        # Grid-less call: the whole problem is VMEM-resident, so there is
        # nothing to pipeline; every operand maps whole-array into VMEM.
        cost_estimate=pl.CostEstimate(
            flops=int(flops),
            transcendentals=int(n_rows * out_dim),   # sigmoid exps
            bytes_accessed=int(bytes_accessed)),
    )(x_flat, *flat_args)


# ----------------------------- weight preprocessing ------------------------ #
def _spectral_normalize(w_oihw, n_iter=50, eps=1e-12):
    """Eval-time spectral norm: divide by the leading singular value of the
    (Cout, Cin*KH*KW) weight matrix, estimated by power iteration."""
    cout = w_oihw.shape[0]
    wm = w_oihw.reshape(cout, -1).astype(np.float64)
    rng = np.random.RandomState(0)
    u = rng.normal(size=(cout,))
    u /= np.linalg.norm(u) + eps
    v = None
    for _ in range(n_iter):
        v = wm.T @ u
        v /= np.linalg.norm(v) + eps
        u = wm @ v
        u /= np.linalg.norm(u) + eps
    sigma = float(u @ (wm @ v))
    return (w_oihw / sigma).astype(np.float32)


def _conv_as_dense(w_oihw, bias, H, W, stride, pad):
    """Lower Conv2d(w, b, stride, pad) on an (H, W) input to a dense matmul
    over the flattened NHWC activation (spatial-major, channel-minor).

    Returns big (H*W*Cin, Ho*Wo*Cout), b_flat (1, Ho*Wo*Cout), Ho, Wo such that
        out_flat = x_flat @ big + b_flat
    reproduces the conv exactly (including zero padding and stride).
    """
    Cout, Cin, KH, KW = w_oihw.shape
    Ho = (H + 2 * pad - KH) // stride + 1
    Wo = (W + 2 * pad - KW) // stride + 1
    w_hwio = np.transpose(w_oihw, (2, 3, 1, 0))          # (KH, KW, Cin, Cout)

    big = np.zeros((H * W * Cin, Ho * Wo * Cout), np.float32)
    for ho in range(Ho):
        for wo in range(Wo):
            p0 = (ho * Wo + wo) * Cout
            for i in range(KH):
                y = ho * stride + i - pad
                if not 0 <= y < H:
                    continue                              # zero padding
                for j in range(KW):
                    x = wo * stride + j - pad
                    if not 0 <= x < W:
                        continue                          # zero padding
                    q0 = (y * W + x) * Cin
                    big[q0:q0 + Cin, p0:p0 + Cout] = w_hwio[i, j]
    b_flat = np.tile(bias.astype(np.float32), Ho * Wo).reshape(1, Ho * Wo * Cout)
    return big, b_flat, Ho, Wo


def discriminator_conv_configs(in_channel, channel):
    # (cin, cout, kernel, stride, pad) for the 7 convs of the Discriminator.
    return (
        (in_channel,  channel,      3, 2, 1),   # ConvSN1 conv1 (stride 2)
        (channel,     channel,      3, 1, 1),   # ConvSN1 conv2 ('same')
        (channel,     channel * 2,  3, 2, 1),   # ConvSN2 conv1
        (channel * 2, channel * 2,  3, 1, 1),   # ConvSN2 conv2
        (channel * 2, channel * 4,  3, 2, 1),   # ConvSN3 conv1
        (channel * 4, channel * 4,  3, 1, 1),   # ConvSN3 conv2
        (channel * 4, 1,            1, 1, 0),   # LastConv (1x1) + Sigmoid
    )


def init_discriminator(key, in_channel, channel, H, W):
    """Deterministic synthetic parameters.

    Returns
      conv_wb  : [(w_oihw, b)]            -- for the pure-JAX conv reference
      dense_wb : [(big, b_flat)]          -- for the fused Pallas kernel
      cfgs     : static conv configs
    """
    cfgs = discriminator_conv_configs(in_channel, channel)
    keys = jax.random.split(key, len(cfgs))
    conv_wb, dense_wb = [], []
    h, w = H, W
    for (cin, cout, k, stride, pad), kk in zip(cfgs, keys):
        k_w, k_b = jax.random.split(kk)
        wgt = np.asarray(jax.random.normal(k_w, (cout, cin, k, k), jnp.float32)) * 0.1
        bias = np.asarray(jax.random.normal(k_b, (cout,), jnp.float32)) * 0.01
        wgt = _spectral_normalize(wgt)
        conv_wb.append((jnp.asarray(wgt), jnp.asarray(bias)))
        big, b_flat, h, w = _conv_as_dense(wgt, bias, h, w, stride, pad)
        dense_wb.append((jnp.asarray(big), jnp.asarray(b_flat)))
    return conv_wb, dense_wb, cfgs


# ----------------------------- public forward ------------------------------ #
@jax.jit
def discriminator_forward(dense_wb, x_nchw):
    N, C, H, W = x_nchw.shape
    # Single layout change for the whole network: NCHW -> flattened NHWC rows.
    x_flat = jnp.transpose(x_nchw, (0, 2, 3, 1)).reshape(N, H * W * C)
    out_flat = fused_forward(x_flat, dense_wb)           # (N, (H//8)*(W//8)*1)
    out = out_flat.reshape(N, H // 8, W // 8, 1)
    return jnp.transpose(out, (0, 3, 1, 2))              # NCHW like PyTorch


# ----------------------------- pure-JAX reference -------------------------- #
def make_reference(cfgs):
    acts = ("leaky_relu",) * (len(cfgs) - 1) + ("sigmoid",)

    @jax.jit
    def reference(conv_wb, x):
        for (w, b), (_, _, _, stride, pad), act in zip(conv_wb, cfgs, acts):
            x = lax.conv_general_dilated(
                x, w, (stride, stride), [(pad, pad), (pad, pad)],
                dimension_numbers=("NCHW", "OIHW", "NCHW"),
                precision=lax.Precision.HIGHEST)
            x = x + b.reshape(1, -1, 1, 1)
            if act == "leaky_relu":
                x = jnp.where(x >= 0.0, x, _NEG_SLOPE * x)
            else:
                x = 1.0 / (1.0 + jnp.exp(-x))
        return x

    return reference


# ----------------------------------- main ----------------------------------- #
if __name__ == "__main__":
    key = jax.random.PRNGKey(0)
    k_x, k_p = jax.random.split(key)

    batch, in_channel, H, W = 2, 3, 16, 16
    channel = 8                      # small for the test (PyTorch default is 32)

    x = jax.random.normal(k_x, (batch, in_channel, H, W), jnp.float32)
    conv_wb, dense_wb, cfgs = init_discriminator(k_p, in_channel, channel, H, W)

    out = jax.block_until_ready(discriminator_forward(dense_wb, x))
    assert out.shape == (batch, 1, H // 8, W // 8), out.shape

    ref = jax.block_until_ready(make_reference(cfgs)(conv_wb, x))
    np.testing.assert_allclose(np.asarray(out), np.asarray(ref),
                               rtol=2e-4, atol=2e-4)

    print("KERNEL_OK")
</pallas_src>

<mosaic_0001>
module attributes {stable_mosaic.version = 11 : i64} {
  func.func @_fused_discriminator_kernel(%arg0: memref<2x768xf32, #tpu.memory_space<vmem>>, %arg1: memref<768x512xf32, #tpu.memory_space<vmem>>, %arg2: memref<1x512xf32, #tpu.memory_space<vmem>>, %arg3: memref<512x512xf32, #tpu.memory_space<vmem>>, %arg4: memref<1x512xf32, #tpu.memory_space<vmem>>, %arg5: memref<512x256xf32, #tpu.memory_space<vmem>>, %arg6: memref<1x256xf32, #tpu.memory_space<vmem>>, %arg7: memref<256x256xf32, #tpu.memory_space<vmem>>, %arg8: memref<1x256xf32, #tpu.memory_space<vmem>>, %arg9: memref<256x128xf32, #tpu.memory_space<vmem>>, %arg10: memref<1x128xf32, #tpu.memory_space<vmem>>, %arg11: memref<128x128xf32, #tpu.memory_space<vmem>>, %arg12: memref<1x128xf32, #tpu.memory_space<vmem>>, %arg13: memref<128x4xf32, #tpu.memory_space<vmem>>, %arg14: memref<1x4xf32, #tpu.memory_space<vmem>>, %arg15: memref<2x4xf32, #tpu.memory_space<vmem>>) attributes {dimension_semantics = [], scalar_prefetch = 0 : i64, scratch_operands = 0 : i64, tpu.core_type = #tpu.core_type<tc>} {
    %c0 = arith.constant 0 : index
    %c0_0 = arith.constant 0 : index
    %0 = vector.load %arg0[%c0, %c0_0] : memref<2x768xf32, #tpu.memory_space<vmem>>, vector<2x768xf32>
    %c0_1 = arith.constant 0 : index
    %c0_2 = arith.constant 0 : index
    %1 = vector.load %arg1[%c0_1, %c0_2] : memref<768x512xf32, #tpu.memory_space<vmem>>, vector<768x512xf32>
    %c0_3 = arith.constant 0 : index
    %c0_4 = arith.constant 0 : index
    %2 = vector.load %arg2[%c0_3, %c0_4] : memref<1x512xf32, #tpu.memory_space<vmem>>, vector<1x512xf32>
    %cst = arith.constant dense<0.000000e+00> : vector<2x512xf32>
    %3 = tpu.matmul %0, %1, %cst {dimension_numbers = #tpu.dot_dimension_numbers<[1], [0], [0], [1], [0, 0, 1, 1], [], []>} : vector<2x768xf32>, vector<768x512xf32>, vector<2x512xf32> -> vector<2x512xf32>
    %4 = vector.broadcast %2 : vector<1x512xf32> to vector<2x512xf32>
    %5 = arith.addf %3, %4 : vector<2x512xf32>
    %cst_5 = arith.constant 0.000000e+00 : f32
    %6 = vector.broadcast %cst_5 : f32 to vector<2x512xf32>
    %7 = arith.cmpf oge, %5, %6 : vector<2x512xf32>
    %cst_6 = arith.constant 0.00999999977 : f32
    %8 = vector.broadcast %cst_6 : f32 to vector<2x512xf32>
    %9 = arith.mulf %8, %5 : vector<2x512xf32>
    %10 = arith.select %7, %5, %9 : vector<2x512xi1>, vector<2x512xf32>
    %c0_7 = arith.constant 0 : index
    %c0_8 = arith.constant 0 : index
    %11 = vector.load %arg3[%c0_7, %c0_8] : memref<512x512xf32, #tpu.memory_space<vmem>>, vector<512x512xf32>
    %c0_9 = arith.constant 0 : index
    %c0_10 = arith.constant 0 : index
    %12 = vector.load %arg4[%c0_9, %c0_10] : memref<1x512xf32, #tpu.memory_space<vmem>>, vector<1x512xf32>
    %cst_11 = arith.constant dense<0.000000e+00> : vector<2x512xf32>
    %13 = tpu.matmul %10, %11, %cst_11 {dimension_numbers = #tpu.dot_dimension_numbers<[1], [0], [0], [1], [0, 0, 1, 1], [], []>} : vector<2x512xf32>, vector<512x512xf32>, vector<2x512xf32> -> vector<2x512xf32>
    %14 = vector.broadcast %12 : vector<1x512xf32> to vector<2x512xf32>
    %15 = arith.addf %13, %14 : vector<2x512xf32>
    %cst_12 = arith.constant 0.000000e+00 : f32
    %16 = vector.broadcast %cst_12 : f32 to vector<2x512xf32>
    %17 = arith.cmpf oge, %15, %16 : vector<2x512xf32>
    %cst_13 = arith.constant 0.00999999977 : f32
    %18 = vector.broadcast %cst_13 : f32 to vector<2x512xf32>
    %19 = arith.mulf %18, %15 : vector<2x512xf32>
    %20 = arith.select %17, %15, %19 : vector<2x512xi1>, vector<2x512xf32>
    %c0_14 = arith.constant 0 : index
    %c0_15 = arith.constant 0 : index
    %21 = vector.load %arg5[%c0_14, %c0_15] : memref<512x256xf32, #tpu.memory_space<vmem>>, vector<512x256xf32>
    %c0_16 = arith.constant 0 : index
    %c0_17 = arith.constant 0 : index
    %22 = vector.load %arg6[%c0_16, %c0_17] : memref<1x256xf32, #tpu.memory_space<vmem>>, vector<1x256xf32>
    %cst_18 = arith.constant dense<0.000000e+00> : vector<2x256xf32>
    %23 = tpu.matmul %20, %21, %cst_18 {dimension_numbers = #tpu.dot_dimension_numbers<[1], [0], [0], [1], [0, 0, 1, 1], [], []>} : vector<2x512xf32>, vector<512x256xf32>, vector<2x256xf32> -> vector<2x256xf32>
    %24 = vector.broadcast %22 : vector<1x256xf32> to vector<2x256xf32>
    %25 = arith.addf %23, %24 : vector<2x256xf32>
    %cst_19 = arith.constant 0.000000e+00 : f32
    %26 = vector.broadcast %cst_19 : f32 to vector<2x256xf32>
    %27 = arith.cmpf oge, %25, %26 : vector<2x256xf32>
    %cst_20 = arith.constant 0.00999999977 : f32
    %28 = vector.broadcast %cst_20 : f32 to vector<2x256xf32>
    %29 = arith.mulf %28, %25 : vector<2x256xf32>
    %30 = arith.select %27, %25, %29 : vector<2x256xi1>, vector<2x256xf32>
    %c0_21 = arith.constant 0 : index
    %c0_22 = arith.constant 0 : index
    %31 = vector.load %arg7[%c0_21, %c0_22] : memref<256x256xf32, #tpu.memory_space<vmem>>, vector<256x256xf32>
    %c0_23 = arith.constant 0 : index
    %c0_24 = arith.constant 0 : index
    %32 = vector.load %arg8[%c0_23, %c0_24] : memref<1x256xf32, #tpu.memory_space<vmem>>, vector<1x256xf32>
    %cst_25 = arith.constant dense<0.000000e+00> : vector<2x256xf32>
    %33 = tpu.matmul %30, %31, %cst_25 {dimension_numbers = #tpu.dot_dimension_numbers<[1], [0], [0], [1], [0, 0, 1, 1], [], []>} : vector<2x256xf32>, vector<256x256xf32>, vector<2x256xf32> -> vector<2x256xf32>
    %34 = vector.broadcast %32 : vector<1x256xf32> to vector<2x256xf32>
    %35 = arith.addf %33, %34 : vector<2x256xf32>
    %cst_26 = arith.constant 0.000000e+00 : f32
    %36 = vector.broadcast %cst_26 : f32 to vector<2x256xf32>
    %37 = arith.cmpf oge, %35, %36 : vector<2x256xf32>
    %cst_27 = arith.constant 0.00999999977 : f32
    %38 = vector.broadcast %cst_27 : f32 to vector<2x256xf32>
    %39 = arith.mulf %38, %35 : vector<2x256xf32>
    %40 = arith.select %37, %35, %39 : vector<2x256xi1>, vector<2x256xf32>
    %c0_28 = arith.constant 0 : index
    %c0_29 = arith.constant 0 : index
    %41 = vector.load %arg9[%c0_28, %c0_29] : memref<256x128xf32, #tpu.memory_space<vmem>>, vector<256x128xf32>
    %c0_30 = arith.constant 0 : index
    %c0_31 = arith.constant 0 : index
    %42 = vector.load %arg10[%c0_30, %c0_31] : memref<1x128xf32, #tpu.memory_space<vmem>>, vector<1x128xf32>
    %cst_32 = arith.constant dense<0.000000e+00> : vector<2x128xf32>
    %43 = tpu.matmul %40, %41, %cst_32 {dimension_numbers = #tpu.dot_dimension_numbers<[1], [0], [0], [1], [0, 0, 1, 1], [], []>} : vector<2x256xf32>, vector<256x128xf32>, vector<2x128xf32> -> vector<2x128xf32>
    %44 = vector.broadcast %42 : vector<1x128xf32> to vector<2x128xf32>
    %45 = arith.addf %43, %44 : vector<2x128xf32>
    %cst_33 = arith.constant 0.000000e+00 : f32
    %46 = vector.broadcast %cst_33 : f32 to vector<2x128xf32>
    %47 = arith.cmpf oge, %45, %46 : vector<2x128xf32>
    %cst_34 = arith.constant 0.00999999977 : f32
    %48 = vector.broadcast %cst_34 : f32 to vector<2x128xf32>
    %49 = arith.mulf %48, %45 : vector<2x128xf32>
    %50 = arith.select %47, %45, %49 : vector<2x128xi1>, vector<2x128xf32>
    %c0_35 = arith.constant 0 : index
    %c0_36 = arith.constant 0 : index
    %51 = vector.load %arg11[%c0_35, %c0_36] : memref<128x128xf32, #tpu.memory_space<vmem>>, vector<128x128xf32>
    %c0_37 = arith.constant 0 : index
    %c0_38 = arith.constant 0 : index
    %52 = vector.load %arg12[%c0_37, %c0_38] : memref<1x128xf32, #tpu.memory_space<vmem>>, vector<1x128xf32>
    %cst_39 = arith.constant dense<0.000000e+00> : vector<2x128xf32>
    %53 = tpu.matmul %50, %51, %cst_39 {dimension_numbers = #tpu.dot_dimension_numbers<[1], [0], [0], [1], [0, 0, 1, 1], [], []>} : vector<2x128xf32>, vector<128x128xf32>, vector<2x128xf32> -> vector<2x128xf32>
    %54 = vector.broadcast %52 : vector<1x128xf32> to vector<2x128xf32>
    %55 = arith.addf %53, %54 : vector<2x128xf32>
    %cst_40 = arith.constant 0.000000e+00 : f32
    %56 = vector.broadcast %cst_40 : f32 to vector<2x128xf32>
    %57 = arith.cmpf oge, %55, %56 : vector<2x128xf32>
    %cst_41 = arith.constant 0.00999999977 : f32
    %58 = vector.broadcast %cst_41 : f32 to vector<2x128xf32>
    %59 = arith.mulf %58, %55 : vector<2x128xf32>
    %60 = arith.select %57, %55, %59 : vector<2x128xi1>, vector<2x128xf32>
    %c0_42 = arith.constant 0 : index
    %c0_43 = arith.constant 0 : index
    %61 = vector.load %arg13[%c0_42, %c0_43] : memref<128x4xf32, #tpu.memory_space<vmem>>, vector<128x4xf32>
    %c0_44 = arith.constant 0 : index
    %c0_45 = arith.constant 0 : index
    %62 = vector.load %arg14[%c0_44, %c0_45] : memref<1x4xf32, #tpu.memory_space<vmem>>, vector<1x4xf32>
    %cst_46 = arith.constant dense<0.000000e+00> : vector<2x4xf32>
    %63 = tpu.matmul %60, %61, %cst_46 {dimension_numbers = #tpu.dot_dimension_numbers<[1], [0], [0], [1], [0, 0, 1, 1], [], []>} : vector<2x128xf32>, vector<128x4xf32>, vector<2x4xf32> -> vector<2x4xf32>
    %64 = vector.broadcast %62 : vector<1x4xf32> to vector<2x4xf32>
    %65 = arith.addf %63, %64 : vector<2x4xf32>
    %cst_47 = arith.constant 0.000000e+00 : f32
    %66 = vector.broadcast %cst_47 : f32 to vector<2x4xf32>
    %67 = arith.subf %66, %65 : vector<2x4xf32>
    %68 = math.exp %67 : vector<2x4xf32>
    %cst_48 = arith.constant 1.000000e+00 : f32
    %69 = vector.broadcast %cst_48 : f32 to vector<2x4xf32>
    %70 = arith.addf %69, %68 : vector<2x4xf32>
    %cst_49 = arith.constant 1.000000e+00 : f32
    %71 = vector.broadcast %cst_49 : f32 to vector<2x4xf32>
    %72 = arith.divf %71, %70 : vector<2x4xf32>
    %c0_50 = arith.constant 0 : index
    %c0_51 = arith.constant 0 : index
    %73 = vector.load %arg15[%c0_50, %c0_51] : memref<2x4xf32, #tpu.memory_space<vmem>>, vector<2x4xf32>
    tpu.vector_store %arg15[%c0_50, %c0_51], %72 {strides = array<i32>} : memref<2x4xf32, #tpu.memory_space<vmem>>, vector<2x4xf32>,
    return
  }
}

</mosaic_0001>

<bundles_post_ra>
// kernel: discriminator_forward.1
= control target key start
LH: loop header
LB: loop body
LE: loop exit
PB: predicated region body
PF: predicated region fallthrough
CT: control target
= control target key end

     0   :  { %20 = vsyncpa [#allocation3], 0  ;;  %s4239_s0 = inlined_call_operand.vmem [shape: f32[2,768], index: 0, kind: input, shape index: {}]   ;;  %s4240_s1 = inlined_call_operand.hbm [shape: f32[768,512], index: 1, kind: input, shape index: {}]   ;;  %s4241_s2 = inlined_call_operand.hbm [shape: f32[1,512], index: 2, kind: input, shape index: {}]   ;;  %s4242_s3 = inlined_call_operand.hbm [shape: f32[512,512], index: 3, kind: input, shape index: {}]   ;;  %s4243_s4 = inlined_call_operand.hbm [shape: f32[1,512], index: 4, kind: input, shape index: {}]   ;;  %s4244_s5 = inlined_call_operand.hbm [shape: f32[512,256], index: 5, kind: input, shape index: {}]   ;;  %s4245_s6 = inlined_call_operand.hbm [shape: f32[1,256], index: 6, kind: input, shape index: {}]   ;;  %s4246_s7 = inlined_call_operand.hbm [shape: f32[256,256], index: 7, kind: input, shape index: {}]   ;;  %s4247_s8 = inlined_call_operand.hbm [shape: f32[1,256], index: 8, kind: input, shape index: {}]   ;;  %s4248_s9 = inlined_call_operand.hbm [shape: f32[256,128], index: 9, kind: input, shape index: {}]   ;;  %s4249_s10 = inlined_call_operand.hbm [shape: f32[1,128], index: 10, kind: input, shape index: {}]   ;;  %s4250_s11 = inlined_call_operand.hbm [shape: f32[128,128], index: 11, kind: input, shape index: {}]   ;;  %s4251_s12 = inlined_call_operand.hbm [shape: f32[1,128], index: 12, kind: input, shape index: {}]   ;;  %s4252_s13 = inlined_call_operand.vmem [shape: f32[128,4], index: 13, kind: input, shape index: {}]   ;;  %s4253_s14 = inlined_call_operand.hbm [shape: f32[1,4], index: 14, kind: input, shape index: {}]   ;;  %s4254_s15 = inlined_call_operand.vmem [shape: f32[2,4], index: 15, kind: output, shape index: {}]  }
   0x1   :  { %21 = vsyncpa [#allocation5], 0 }
   0x2   :  { %22 = vsyncpa [#allocation8], 0 }
   0x3   :  { %23 = vsyncpa [#allocation11], 0 }
   0x4   :  { %24 = vsyncpa [#allocation14], 0 }
   0x5   :  { %25 = vsyncpa [#allocation17], 0 }
   0x6   :  { %26 = vsyncpa [#allocation20], 0  ;;  %s3833_s18 = smov [#allocation4]   ;;  %s3834_s20 = smov [#allocation7]  }
   0x7   :  { %s47_s19 = sshll.u32 %s3833_s18, 4  ;;  %s69_s21 = sshll.u32 %s3834_s20, 4  ;;  %s48_s19 = int_to_ptr.vmem [resolvable:$true] %s47_s19  ;;  %s70_s21 = int_to_ptr.vmem [resolvable:$true] %s69_s21 }
   0x8   :  { %s3533_s24 = scalar_lea.hbm %s4241_s2, 64 }
   0x9   :  { %p3534_p0 = scmp.ne.s32.totalorder %s4241_s2, %s3533_s24  ;;  %p3537_p1 = scmp.lt.u32.totalorder %s3533_s24, %s4241_s2 }
   0xb   :  { %p3539_p2 = pnand %p3537_p1, %p3534_p0 }
   0xd   :  { %3542 = shalt.err (!%p3539_p2)
}
   0xe   :  { %s3543_s29 = scalar_lea.vmem %s48_s19, 64  ;;  %p3548_p4 = scmp.lt.s32.totalorder %s48_s19, %s48_s19 }
   0xf   :  { %p3544_p3 = scmp.ne.s32.totalorder %s48_s19, %s3543_s29  ;;  %p3549_p5 = scmp.lt.s32.totalorder %s3543_s29, %s3543_s29 }
  0x11   :  { %p3550_p6 = por %p3549_p5, %p3548_p4 }
  0x13   :  { %p3551_p7 = pnand %p3550_p6, %p3544_p3 }
  0x15   :  { %3554 = shalt.err (!%p3551_p7)
}
  0x16   :  { %50 = dma.hbm_to_vmem [thread:$0]  %s4241_s2, 64, %s48_s19, [#allocation5]  }
  0x17   :  { %s3555_s20 = scalar_lea.hbm %s4243_s4, 64 }
  0x18   :  { %p3556_p8 = scmp.ne.s32.totalorder %s4243_s4, %s3555_s20  ;;  %p3559_p9 = scmp.lt.u32.totalorder %s3555_s20, %s4243_s4 }
  0x1a   :  { %p3561_p10 = pnand %p3559_p9, %p3556_p8 }
  0x1c   :  { %3564 = shalt.err (!%p3561_p10)
}
  0x1d   :  { %s3565_s26 = scalar_lea.vmem %s70_s21, 64  ;;  %p3570_p12 = scmp.lt.s32.totalorder %s70_s21, %s70_s21 }
  0x1e   :  { %p3566_p11 = scmp.ne.s32.totalorder %s70_s21, %s3565_s26  ;;  %p3571_p13 = scmp.lt.s32.totalorder %s3565_s26, %s3565_s26 }
  0x20   :  { %p3572_p0 = por %p3571_p13, %p3570_p12 }
  0x22   :  { %p3573_p1 = pnand %p3572_p0, %p3566_p11 }
  0x24   :  { %3576 = shalt.err (!%p3573_p1)
}
  0x25   :  { %72 = dma.hbm_to_vmem [thread:$0]  %s4243_s4, 64, %s70_s21, [#allocation8]  }
  0x26   :  { %s3835_s27 = smov [#allocation10]   ;;  %s3836_s29 = smov [#allocation13]  }
  0x27   :  { %s91_s28 = sshll.u32 %s3835_s27, 4  ;;  %s113_s30 = sshll.u32 %s3836_s29, 4  ;;  %s92_s28 = int_to_ptr.vmem [resolvable:$true] %s91_s28  ;;  %s114_s30 = int_to_ptr.vmem [resolvable:$true] %s113_s30 }
  0x28   :  { %s3577_s18 = scalar_lea.hbm %s4245_s6, 32 }
  0x29   :  { %p3578_p2 = scmp.ne.s32.totalorder %s4245_s6, %s3577_s18  ;;  %p3581_p3 = scmp.lt.u32.totalorder %s3577_s18, %s4245_s6 }
  0x2b   :  { %p3583_p4 = pnand %p3581_p3, %p3578_p2 }
  0x2d   :  { %3586 = shalt.err (!%p3583_p4)
}
  0x2e   :  { %s3587_s4 = scalar_lea.vmem %s92_s28, 32  ;;  %p3592_p6 = scmp.lt.s32.totalorder %s92_s28, %s92_s28 }
  0x2f   :  { %p3588_p5 = scmp.ne.s32.totalorder %s92_s28, %s3587_s4  ;;  %p3593_p7 = scmp.lt.s32.totalorder %s3587_s4, %s3587_s4 }
  0x31   :  { %p3594_p8 = por %p3593_p7, %p3592_p6 }
  0x33   :  { %p3595_p9 = pnand %p3594_p8, %p3588_p5 }
  0x35   :  { %3598 = shalt.err (!%p3595_p9)
}
  0x36   :  { %94 = dma.hbm_to_vmem [thread:$0]  %s4245_s6, 32, %s92_s28, [#allocation11]  }
  0x37   :  { %s3599_s19 = scalar_lea.hbm %s4247_s8, 32 }
  0x38   :  { %p3600_p10 = scmp.ne.s32.totalorder %s4247_s8, %s3599_s19  ;;  %p3603_p11 = scmp.lt.u32.totalorder %s3599_s19, %s4247_s8 }
  0x3a   :  { %p3605_p12 = pnand %p3603_p11, %p3600_p10 }
  0x3c   :  { %3608 = shalt.err (!%p3605_p12)
}
  0x3d   :  { %s3609_s18 = scalar_lea.vmem %s114_s30, 32  ;;  %p3614_p0 = scmp.lt.s32.totalorder %s114_s30, %s114_s30 }
  0x3e   :  { %p3610_p13 = scmp.ne.s32.totalorder %s114_s30, %s3609_s18  ;;  %p3615_p1 = scmp.lt.s32.totalorder %s3609_s18, %s3609_s18 }
  0x40   :  { %p3616_p2 = por %p3615_p1, %p3614_p0 }
  0x42   :  { %p3617_p3 = pnand %p3616_p2, %p3610_p13 }
  0x44   :  { %3620 = shalt.err (!%p3617_p3)
}
  0x45   :  { %116 = dma.hbm_to_vmem [thread:$0]  %s4247_s8, 32, %s114_s30, [#allocation14]  }
  0x46   :  { %s3837_s20 = smov [#allocation16]   ;;  %s3838_s23 = smov [#allocation19]  }
  0x47   :  { %s135_s22 = sshll.u32 %s3837_s20, 4  ;;  %s157_s24 = sshll.u32 %s3838_s23, 4  ;;  %s136_s22 = int_to_ptr.vmem [resolvable:$true] %s135_s22  ;;  %s158_s24 = int_to_ptr.vmem [resolvable:$true] %s157_s24 }
  0x48   :  { %s3621_s25 = scalar_lea.hbm %s4249_s10, 16 }
  0x49   :  { %p3622_p4 = scmp.ne.s32.totalorder %s4249_s10, %s3621_s25  ;;  %p3625_p5 = scmp.lt.u32.totalorder %s3621_s25, %s4249_s10 }
  0x4b   :  { %p3627_p6 = pnand %p3625_p5, %p3622_p4 }
  0x4d   :  { %3630 = shalt.err (!%p3627_p6)
}
  0x4e   :  { %s3631_s8 = scalar_lea.vmem %s136_s22, 16  ;;  %s3635_s30 = scalar_lea.vmem %s136_s22, 32 }
  0x4f   :  { %p3632_p7 = scmp.ne.s32.totalorder %s136_s22, %s3631_s8  ;;  %p3636_p8 = scmp.lt.s32.totalorder %s136_s22, %s136_s22 }
  0x50   :  { %p3637_p9 = scmp.lt.s32.totalorder %s3635_s30, %s3631_s8 }
  0x52   :  { %p3638_p10 = por %p3637_p9, %p3636_p8 }
  0x54   :  { %p3639_p11 = pnand %p3638_p10, %p3632_p7 }
  0x56   :  { %3642 = shalt.err (!%p3639_p11)
}
  0x57   :  { %138 = dma.hbm_to_vmem [thread:$0]  %s4249_s10, 16, %s136_s22, [#allocation17]  }
  0x58   :  { %s3643_s6 = scalar_lea.hbm %s4251_s12, 16 }
  0x59   :  { %p3644_p12 = scmp.ne.s32.totalorder %s4251_s12, %s3643_s6  ;;  %p3647_p13 = scmp.lt.u32.totalorder %s3643_s6, %s4251_s12 }
  0x5b   :  { %p3649_p0 = pnand %p3647_p13, %p3644_p12 }
  0x5d   :  { %3652 = shalt.err (!%p3649_p0)
}
  0x5e   :  { %s3653_s21 = scalar_lea.vmem %s158_s24, 16  ;;  %s3657_s25 = scalar_lea.vmem %s158_s24, 32 }
  0x5f   :  { %p3654_p1 = scmp.ne.s32.totalorder %s158_s24, %s3653_s21  ;;  %p3658_p2 = scmp.lt.s32.totalorder %s158_s24, %s158_s24 }
  0x60   :  { %p3659_p3 = scmp.lt.s32.totalorder %s3657_s25, %s3653_s21 }
  0x62   :  { %p3660_p4 = por %p3659_p3, %p3658_p2 }
  0x64   :  { %p3661_p5 = pnand %p3660_p4, %p3654_p1 }
  0x66   :  { %3664 = shalt.err (!%p3661_p5)
}
  0x67   :  { %160 = dma.hbm_to_vmem [thread:$0]  %s4251_s12, 16, %s158_s24, [#allocation20]  }
  0x68   :  { %s3839_s26 = smov [#allocation2]   ;;  %s3665_s8 = scalar_lea.hbm %s4240_s1, 49152 }
  0x69   :  { %s34_s2 = sshll.u32 %s3839_s26, 4  ;;  %p3666_p6 = scmp.ne.s32.totalorder %s4240_s1, %s3665_s8  ;;  %s35_s2 = int_to_ptr.vmem [resolvable:$true] %s34_s2 }
  0x6a   :  { %p3669_p7 = scmp.lt.u32.totalorder %s3665_s8, %s4240_s1 }
  0x6c   :  { %p3671_p8 = pnand %p3669_p7, %p3666_p6 }
  0x6e   :  { %3674 = shalt.err (!%p3671_p8)
}
  0x6f   :  { %s3675_s18 = scalar_lea.vmem %s35_s2, 49152  ;;  %p3680_p10 = scmp.lt.s32.totalorder %s35_s2, %s35_s2 }
  0x70   :  { %p3676_p9 = scmp.ne.s32.totalorder %s35_s2, %s3675_s18  ;;  %p3681_p11 = scmp.lt.s32.totalorder %s3675_s18, %s3675_s18 }
  0x72   :  { %p3682_p12 = por %p3681_p11, %p3680_p10 }
  0x74   :  { %p3683_p13 = pnand %p3682_p12, %p3676_p9 }
  0x76   :  { %3686 = shalt.err (!%p3683_p13)
}
  0x77   :  { %s3840_s12 = smov 512   ;;  %s3841_s24 = smov 32  }
  0x78   :  { %40 = dma.hbm_to_vmem [thread:$0]  %s4240_s1, 49152, %s35_s2, [#allocation3], %s3840_s12, %s3840_s12, %s3841_s24  }
  0x79   :  { %s3842_s20 = smov [#allocation6]   ;;  %s3843_s4 = smov [#allocation9]  }
  0x7a   :  { %s56_s23 = sshll.u32 %s3842_s20, 4  ;;  %s78_s21 = sshll.u32 %s3843_s4, 4  ;;  %s57_s23 = int_to_ptr.vmem [resolvable:$true] %s56_s23  ;;  %s79_s21 = int_to_ptr.vmem [resolvable:$true] %s78_s21 }
  0x7b   :  { %s3687_s22 = scalar_lea.hbm %s4242_s3, 32768 }
  0x7c   :  { %p3688_p0 = scmp.ne.s32.totalorder %s4242_s3, %s3687_s22  ;;  %p3691_p1 = scmp.lt.u32.totalorder %s3687_s22, %s4242_s3 }
  0x7e   :  { %p3693_p2 = pnand %p3691_p1, %p3688_p0 }
  0x80   :  { %3696 = shalt.err (!%p3693_p2)
}
  0x81   :  { %s3697_s1 = scalar_lea.vmem %s57_s23, 32768  ;;  %p3702_p4 = scmp.lt.s32.totalorder %s57_s23, %s57_s23 }
  0x82   :  { %p3698_p3 = scmp.ne.s32.totalorder %s57_s23, %s3697_s1  ;;  %p3703_p5 = scmp.lt.s32.totalorder %s3697_s1, %s3697_s1 }
  0x84   :  { %p3704_p6 = por %p3703_p5, %p3702_p4 }
  0x86   :  { %p3705_p7 = pnand %p3704_p6, %p3698_p3 }
  0x88   :  { %3708 = shalt.err (!%p3705_p7)
}
  0x89   :  { %62 = dma.hbm_to_vmem [thread:$0]  %s4242_s3, 32768, %s57_s23, [#allocation5], %s3840_s12, %s3840_s12, %s3841_s24  }
  0x8a   :  { %s3709_s17 = scalar_lea.hbm %s4244_s5, 16384 }
  0x8b   :  { %p3710_p8 = scmp.ne.s32.totalorder %s4244_s5, %s3709_s17  ;;  %p3713_p9 = scmp.lt.u32.totalorder %s3709_s17, %s4244_s5 }
  0x8d   :  { %p3715_p10 = pnand %p3713_p9, %p3710_p8 }
  0x8f   :  { %3718 = shalt.err (!%p3715_p10)
}
  0x90   :  { %s3719_s4 = scalar_lea.vmem %s79_s21, 16384  ;;  %p3724_p12 = scmp.lt.s32.totalorder %s79_s21, %s79_s21 }
  0x91   :  { %p3720_p11 = scmp.ne.s32.totalorder %s79_s21, %s3719_s4  ;;  %p3725_p13 = scmp.lt.s32.totalorder %s3719_s4, %s3719_s4 }
  0x93   :  { %p3726_p0 = por %p3725_p13, %p3724_p12 }
  0x95   :  { %p3727_p1 = pnand %p3726_p0, %p3720_p11 }
  0x97   :  { %3730 = shalt.err (!%p3727_p1)
}
  0x98   :  { %s3844_s3 = smov 256   ;;  %s3845_s12 = smov 16  }
  0x99   :  { %84 = dma.hbm_to_vmem [thread:$0]  %s4244_s5, 16384, %s79_s21, [#allocation8], %s3844_s3, %s3844_s3, %s3845_s12  }
  0x9a   :  { %s3846_s25 = smov [#allocation12]   ;;  %s3847_s22 = smov [#allocation15]  }
  0x9b   :  { %s100_s10 = sshll.u32 %s3846_s25, 4  ;;  %s122_s26 = sshll.u32 %s3847_s22, 4  ;;  %s101_s10 = int_to_ptr.vmem [resolvable:$true] %s100_s10  ;;  %s123_s26 = int_to_ptr.vmem [resolvable:$true] %s122_s26 }
  0x9c   :  { %s3731_s8 = scalar_lea.hbm %s4246_s7, 8192 }
  0x9d   :  { %p3732_p2 = scmp.ne.s32.totalorder %s4246_s7, %s3731_s8  ;;  %p3735_p3 = scmp.lt.u32.totalorder %s3731_s8, %s4246_s7 }
  0x9f   :  { %p3737_p4 = pnand %p3735_p3, %p3732_p2 }
  0xa1   :  { %3740 = shalt.err (!%p3737_p4)
}
  0xa2   :  { %s3741_s5 = scalar_lea.vmem %s101_s10, 8192  ;;  %p3746_p6 = scmp.lt.s32.totalorder %s101_s10, %s101_s10 }
  0xa3   :  { %p3742_p5 = scmp.ne.s32.totalorder %s101_s10, %s3741_s5  ;;  %p3747_p7 = scmp.lt.s32.totalorder %s3741_s5, %s3741_s5 }
  0xa5   :  { %p3748_p8 = por %p3747_p7, %p3746_p6 }
  0xa7   :  { %p3749_p9 = pnand %p3748_p8, %p3742_p5 }
  0xa9   :  { %3752 = shalt.err (!%p3749_p9)
}
  0xaa   :  { %106 = dma.hbm_to_vmem [thread:$0]  %s4246_s7, 8192, %s101_s10, [#allocation11], %s3844_s3, %s3844_s3, %s3845_s12  }
  0xab   :  { %s3753_s6 = scalar_lea.hbm %s4248_s9, 4096 }
  0xac   :  { %p3754_p10 = scmp.ne.s32.totalorder %s4248_s9, %s3753_s6  ;;  %p3757_p11 = scmp.lt.u32.totalorder %s3753_s6, %s4248_s9 }
  0xae   :  { %p3759_p12 = pnand %p3757_p11, %p3754_p10 }
  0xb0   :  { %3762 = shalt.err (!%p3759_p12)
}
  0xb1   :  { %s3763_s23 = scalar_lea.vmem %s123_s26, 4096  ;;  %p3768_p0 = scmp.lt.s32.totalorder %s123_s26, %s123_s26 }
  0xb2   :  { %p3764_p13 = scmp.ne.s32.totalorder %s123_s26, %s3763_s23  ;;  %p3769_p1 = scmp.lt.s32.totalorder %s3763_s23, %s3763_s23 }
  0xb4   :  { %p3770_p2 = por %p3769_p1, %p3768_p0 }
  0xb6   :  { %p3771_p3 = pnand %p3770_p2, %p3764_p13 }
  0xb8   :  { %3774 = shalt.err (!%p3771_p3)
}
  0xb9   :  { %s3848_s7 = smov 128   ;;  %s3849_s3 = smov 8  }
  0xba   :  { %128 = dma.hbm_to_vmem [thread:$0]  %s4248_s9, 4096, %s123_s26, [#allocation14], %s3848_s7, %s3848_s7, %s3849_s3  }
  0xbb   :  { %s3850_s10 = smov [#allocation18]   ;;  %s3851_s19 = smov [#allocation21]  }
  0xbc   :  { %s144_s22 = sshll.u32 %s3850_s10, 4  ;;  %s169_s27 = sshll.u32 %s3851_s19, 4  ;;  %s145_s22 = int_to_ptr.vmem [resolvable:$true] %s144_s22  ;;  %s170_s27 = int_to_ptr.vmem [resolvable:$true] %s169_s27 }
  0xbd   :  { %s3775_s2 = scalar_lea.hbm %s4250_s11, 2048 }
  0xbe   :  { %p3776_p4 = scmp.ne.s32.totalorder %s4250_s11, %s3775_s2  ;;  %p3779_p5 = scmp.lt.u32.totalorder %s3775_s2, %s4250_s11 }
  0xc0   :  { %p3781_p6 = pnand %p3779_p5, %p3776_p4 }
  0xc2   :  { %3784 = shalt.err (!%p3781_p6)
}
  0xc3   :  { %s3785_s9 = scalar_lea.vmem %s145_s22, 2048  ;;  %p3790_p8 = scmp.lt.s32.totalorder %s145_s22, %s145_s22 }
  0xc4   :  { %p3786_p7 = scmp.ne.s32.totalorder %s145_s22, %s3785_s9  ;;  %p3791_p9 = scmp.lt.s32.totalorder %s3785_s9, %s3785_s9 }
  0xc6   :  { %p3792_p10 = por %p3791_p9, %p3790_p8 }
  0xc8   :  { %p3793_p11 = pnand %p3792_p10, %p3786_p7 }
  0xca   :  { %3796 = shalt.err (!%p3793_p11)
}
  0xcb   :  { %150 = dma.hbm_to_vmem [thread:$0]  %s4250_s11, 2048, %s145_s22, [#allocation17], %s3848_s7, %s3848_s7, %s3849_s3  }
  0xcc   :  { %s3797_s6 = scalar_lea.hbm %s4253_s14, 16 }
  0xcd   :  { %p3798_p12 = scmp.ne.s32.totalorder %s4253_s14, %s3797_s6  ;;  %p3801_p13 = scmp.lt.u32.totalorder %s3797_s6, %s4253_s14 }
  0xcf   :  { %p3803_p0 = pnand %p3801_p13, %p3798_p12 }
  0xd1   :  { %3806 = shalt.err (!%p3803_p0)
}
  0xd2   :  { %s3807_s23 = scalar_lea.vmem %s170_s27, 16  ;;  %s3811_s12 = scalar_lea.vmem %s170_s27, 32 }
  0xd3   :  { %p3808_p1 = scmp.ne.s32.totalorder %s170_s27, %s3807_s23  ;;  %p3812_p2 = scmp.lt.s32.totalorder %s170_s27, %s170_s27 }
  0xd4   :  { %p3813_p3 = scmp.lt.s32.totalorder %s3811_s12, %s3807_s23 }
  0xd6   :  { %p3814_p4 = por %p3813_p3, %p3812_p2 }
  0xd8   :  { %p3815_p5 = pnand %p3814_p4, %p3808_p1 }
  0xda   :  { %3818 = shalt.err (!%p3815_p5)
}
  0xdb   :  { %172 = dma.hbm_to_vmem [thread:$0]  %s4253_s14, 16, %s170_s27, [#allocation20]  }
  0xdc   :  { %3819 = dma.done.wait [#allocation3], 49152  }
  0xdd   :  { %3820 = vsyncadd [#allocation3], 4294918144 }
  0xde   :  { %3821 = dma.done.wait [#allocation5], 32832  }
  0xdf   :  { %3822 = vsyncadd [#allocation5], 4294934464 }
  0xe0   :  { %3823 = dma.done.wait [#allocation8], 16448  }
  0xe1   :  { %3824 = vsyncadd [#allocation8], 4294950848 }
  0xe2   :  { %3825 = dma.done.wait [#allocation11], 8224  }
  0xe3   :  { %3826 = vsyncadd [#allocation11], 4294959072 }
  0xe4   :  { %3827 = dma.done.wait [#allocation14], 4128  }
  0xe5   :  { %3828 = vsyncadd [#allocation14], 4294963168 }
  0xe6   :  { %3829 = dma.done.wait [#allocation17], 2064  }
  0xe7   :  { %3830 = vsyncadd [#allocation17], 4294965232 }
  0xe8   :  { %3831 = dma.done.wait [#allocation20], 32  }
  0xe9   :  { %3832 = vsyncadd [#allocation20], 4294967264  ;;  %v215_v0 = vld [vmem:[#allocation2 + $0x8] sm:$0xff]  ;;  %v217_v2 = vld [vmem:[#allocation2 + $0x18] sm:$0xff]  ;;  %vm3854_vm12 = vmmov 0   ;;  %vm2413_vm15 = vcmask 25600  }
  0xea   :  { %v219_v1 = vld [vmem:[#allocation2 + $0x28] sm:$0xff]  ;;  %v221_v4 = vld [vmem:[#allocation2 + $0x38] sm:$0xff]  ;;  %v214_v5 = vld [vmem:[#allocation2] sm:$0xff] }
  0xeb   :  { %v2569_v3 = vpack.c.bf16 %v219_v1, %v215_v0  ;;  %v218_v6 = vld [vmem:[#allocation2 + $0x20] sm:$0xff]  ;;  %v2761_v7 = vpack.c.bf16 %v221_v4, %v217_v2  ;;  %v216_v9 = vld [vmem:[#allocation2 + $0x10] sm:$0xff]  ;;  %v223_v11 = vld [vmem:[#allocation2 + $0x48] sm:$0xff] }
  0xec   :  { %v2571_v8 = vpack.c.bf16 %v218_v6, %v214_v5  ;;  %v220_v10 = vld [vmem:[#allocation2 + $0x30] sm:$0xff]  ;;  %v227_v13 = vld [vmem:[#allocation2 + $0x68] sm:$0xff]  ;;  %v225_v14 = vld [vmem:[#allocation2 + $0x58] sm:$0xff] }
  0xed   :  { %2570 = vmatprep.subr.bf16.mxu0 %v2569_v3  ;;  %v2763_v12 = vpack.c.bf16 %v220_v10, %v216_v9  ;;  %v229_v15 = vld [vmem:[#allocation2 + $0x78] sm:$0xff]  ;;  %2762 = vmatprep.subr.bf16.mxu1 %v2761_v7  ;;  %v2573_v16 = vpack.c.bf16 %v227_v13, %v223_v11  ;;  %v222_v18 = vld [vmem:[#allocation2 + $0x40] sm:$0xff]  ;;  %v224_v20 = vld [vmem:[#allocation2 + $0x50] sm:$0xff] }
  0xee   :  { %2572 = vmatpush1.bf16.msra.mxu0 %v2571_v8  ;;  %v2765_v17 = vpack.c.bf16 %v229_v15, %v225_v14  ;;  %v226_v19 = vld [vmem:[#allocation2 + $0x60] sm:$0xff]  ;;  %v228_v22 = vld [vmem:[#allocation2 + $0x70] sm:$0xff]  ;;  %v231_v23 = vld [vmem:[#allocation2 + $0x88] sm:$0xff] }
  0xef   :  { %2764 = vmatpush1.bf16.msra.mxu1 %v2763_v12  ;;  %v2575_v21 = vpack.c.bf16 %v226_v19, %v222_v18  ;;  %v235_v24 = vld [vmem:[#allocation2 + $0xa8] sm:$0xff]  ;;  %2574 = vmatprep.subr.bf16.mxu0 %v2573_v16  ;;  %v2767_v25 = vpack.c.bf16 %v228_v22, %v224_v20  ;;  %v233_v27 = vld [vmem:[#allocation2 + $0x98] sm:$0xff]  ;;  %v230_v29 = vld [vmem:[#allocation2 + $0x80] sm:$0xff] }
  0xf0   :  { %2766 = vmatprep.subr.bf16.mxu1 %v2765_v17  ;;  %v2577_v26 = vpack.c.bf16 %v235_v24, %v231_v23  ;;  %v237_v28 = vld [vmem:[#allocation2 + $0xb8] sm:$0xff]  ;;  %v234_v31 = vld [vmem:[#allocation2 + $0xa0] sm:$0xff]  ;;  %v232_v32 = vld [vmem:[#allocation2 + $0x90] sm:$0xff] }
  0xf1   :  { %v2769_v30 = vpack.c.bf16 %v237_v28, %v233_v27  ;;  %v236_v33 = vld [vmem:[#allocation2 + $0xb0] sm:$0xff]  ;;  %v2579_v34 = vpack.c.bf16 %v234_v31, %v230_v29  ;;  %v239_v35 = vld [vmem:[#allocation2 + $0xc8] sm:$0xff]  ;;  %v241_v37 = vld [vmem:[#allocation2 + $0xd8] sm:$0xff] }
  0xf2   :  { %2576 = vmatpush1.bf16.msra.mxu0 %v2575_v21  ;;  %v243_v36 = vld [vmem:[#allocation2 + $0xe8] sm:$0xff]  ;;  %v2771_v38 = vpack.c.bf16 %v236_v33, %v232_v32  ;;  %v245_v40 = vld [vmem:[#allocation2 + $0xf8] sm:$0xff]  ;;  %v238_v41 = vld [vmem:[#allocation2 + $0xc0] sm:$0xff] }
  0xf3   :  { %2768 = vmatpush1.bf16.msra.mxu1 %v2767_v25  ;;  %2578 = vmatprep.subr.bf16.mxu0 %v2577_v26  ;;  %v2581_v39 = vpack.c.bf16 %v243_v36, %v239_v35  ;;  %v242_v42 = vld [vmem:[#allocation2 + $0xe0] sm:$0xff]  ;;  %v2773_v43 = vpack.c.bf16 %v245_v40, %v241_v37  ;;  %v240_v44 = vld [vmem:[#allocation2 + $0xd0] sm:$0xff]  ;;  %v247_v46 = vld [vmem:[#allocation2 + $0x108] sm:$0xff] }
  0xf4   :  { %2770 = vmatprep.subr.bf16.mxu1 %v2769_v30  ;;  %v244_v45 = vld [vmem:[#allocation2 + $0xf0] sm:$0xff]  ;;  %v251_v47 = vld [vmem:[#allocation2 + $0x128] sm:$0xff]  ;;  %v249_v48 = vld [vmem:[#allocation2 + $0x118] sm:$0xff]  ;;  %v2583_v50 = vpack.c.bf16 %v242_v42, %v238_v41 }
  0xf5   :  { %v253_v49 = vld [vmem:[#allocation2 + $0x138] sm:$0xff]  ;;  %v2775_v51 = vpack.c.bf16 %v244_v45, %v240_v44  ;;  %v2585_v52 = vpack.c.bf16 %v251_v47, %v247_v46  ;;  %v246_v53 = vld [vmem:[#allocation2 + $0x100] sm:$0xff]  ;;  %v248_v55 = vld [vmem:[#allocation2 + $0x110] sm:$0xff]  ;;  %v600_v46 = vlaneseq  ;;  %v3852_v47 = vmov 1983009808  }
  0xf6   :  { %2580 = vmatpush1.bf16.msra.mxu0 %v2579_v34  ;;  %v250_v54 = vld [vmem:[#allocation2 + $0x120] sm:$0xff]  ;;  %v2777_v56 = vpack.c.bf16 %v253_v49, %v249_v48  ;;  %v252_v57 = vld [vmem:[#allocation2 + $0x130] sm:$0xff]  ;;  %v255_v58 = vld [vmem:[#allocation2 + $0x148] sm:$0xff]  ;;  %v624_v48 = vunpack.c.l.s4 %v3852_v47 }
  0xf7   :  { %2772 = vmatpush1.bf16.msra.mxu1 %v2771_v38  ;;  %2582 = vmatprep.subr.bf16.mxu0 %v2581_v39  ;;  %v259_v59 = vld [vmem:[#allocation2 + $0x168] sm:$0xff]  ;;  %v257_v60 = vld [vmem:[#allocation2 + $0x158] sm:$0xff]  ;;  %v2587_v62 = vpack.c.bf16 %v250_v54, %v246_v53  ;;  %v2779_v63 = vpack.c.bf16 %v252_v57, %v248_v55  ;;  %v254_v1 = vld [vmem:[#allocation2 + $0x140] sm:$0xff] }
  0xf8   :  { %2774 = vmatprep.subr.bf16.mxu1 %v2773_v43  ;;  %v261_v61 = vld [vmem:[#allocation2 + $0x178] sm:$0xff]  ;;  %v2589_v0 = vpack.c.bf16 %v259_v59, %v255_v58  ;;  %v258_v2 = vld [vmem:[#allocation2 + $0x160] sm:$0xff]  ;;  %v256_v3 = vld [vmem:[#allocation2 + $0x150] sm:$0xff] }
  0xf9   :  { %v2781_v4 = vpack.c.bf16 %v261_v61, %v257_v60  ;;  %v260_v5 = vld [vmem:[#allocation2 + $0x170] sm:$0xff]  ;;  %v263_v6 = vld [vmem:[#allocation2 + $0x188] sm:$0xff]  ;;  %v265_v8 = vld [vmem:[#allocation2 + $0x198] sm:$0xff]  ;;  %v2591_v10 = vpack.c.bf16 %v258_v2, %v254_v1  ;;  %v4092_v61 = vshrl.u32 %v600_v46, 7 }
  0xfa   :  { %2584 = vmatpush1.bf16.msra.mxu0 %v2583_v50  ;;  %v267_v7 = vld [vmem:[#allocation2 + $0x1a8] sm:$0xff]  ;;  %v269_v9 = vld [vmem:[#allocation2 + $0x1b8] sm:$0xff]  ;;  %v2783_v11 = vpack.c.bf16 %v260_v5, %v256_v3  ;;  %v262_v13 = vld [vmem:[#allocation2 + $0x180] sm:$0xff] }
  0xfb   :  { %2776 = vmatpush1.bf16.msra.mxu1 %v2775_v51  ;;  %2586 = vmatprep.subr.bf16.mxu0 %v2585_v52  ;;  %v2593_v12 = vpack.c.bf16 %v267_v7, %v263_v6  ;;  %v266_v14 = vld [vmem:[#allocation2 + $0x1a0] sm:$0xff]  ;;  %v264_v15 = vld [vmem:[#allocation2 + $0x190] sm:$0xff]  ;;  %v2785_v16 = vpack.c.bf16 %v269_v9, %v265_v8  ;;  %v271_v18 = vld [vmem:[#allocation2 + $0x1c8] sm:$0xff] }
  0xfc   :  { %2778 = vmatprep.subr.bf16.mxu1 %v2777_v56  ;;  %v268_v17 = vld [vmem:[#allocation2 + $0x1b0] sm:$0xff]  ;;  %v275_v19 = vld [vmem:[#allocation2 + $0x1e8] sm:$0xff]  ;;  %v273_v20 = vld [vmem:[#allocation2 + $0x1d8] sm:$0xff]  ;;  %v2595_v22 = vpack.c.bf16 %v266_v14, %v262_v13 }
  0xfd   :  { %v277_v21 = vld [vmem:[#allocation2 + $0x1f8] sm:$0xff]  ;;  %v2787_v23 = vpack.c.bf16 %v268_v17, %v264_v15  ;;  %v2597_v24 = vpack.c.bf16 %v275_v19, %v271_v18  ;;  %v270_v25 = vld [vmem:[#allocation2 + $0x1c0] sm:$0xff]  ;;  %v272_v27 = vld [vmem:[#allocation2 + $0x1d0] sm:$0xff] }
  0xfe   :  { %2588 = vmatpush1.bf16.msra.mxu0 %v2587_v62  ;;  %v274_v26 = vld [vmem:[#allocation2 + $0x1e0] sm:$0xff]  ;;  %v2789_v28 = vpack.c.bf16 %v277_v21, %v273_v20  ;;  %v276_v29 = vld [vmem:[#allocation2 + $0x1f0] sm:$0xff]  ;;  %v279_v30 = vld [vmem:[#allocation2 + $0x208] sm:$0xff]  ;;  %v625_v62 = vunpack.c.0.s8 %v624_v48 }
  0xff   :  { %2780 = vmatpush1.bf16.msra.mxu1 %v2779_v63  ;;  %2590 = vmatprep.subr.bf16.mxu0 %v2589_v0  ;;  %v283_v31 = vld [vmem:[#allocation2 + $0x228] sm:$0xff]  ;;  %v281_v32 = vld [vmem:[#allocation2 + $0x218] sm:$0xff]  ;;  %v2599_v34 = vpack.c.bf16 %v274_v26, %v270_v25  ;;  %v2791_v35 = vpack.c.bf16 %v276_v29, %v272_v27  ;;  %v278_v37 = vld [vmem:[#allocation2 + $0x200] sm:$0xff] }
 0x100   :  { %2782 = vmatprep.subr.bf16.mxu1 %v2781_v4  ;;  %v285_v33 = vld [vmem:[#allocation2 + $0x238] sm:$0xff]  ;;  %v2601_v36 = vpack.c.bf16 %v283_v31, %v279_v30  ;;  %v282_v38 = vld [vmem:[#allocation2 + $0x220] sm:$0xff]  ;;  %v280_v39 = vld [vmem:[#allocation2 + $0x210] sm:$0xff] }
 0x101   :  { %v2793_v40 = vpack.c.bf16 %v285_v33, %v281_v32  ;;  %v284_v41 = vld [vmem:[#allocation2 + $0x230] sm:$0xff]  ;;  %v287_v42 = vld [vmem:[#allocation2 + $0x248] sm:$0xff]  ;;  %v289_v44 = vld [vmem:[#allocation2 + $0x258] sm:$0xff]  ;;  %v2603_v49 = vpack.c.bf16 %v282_v38, %v278_v37 }
 0x102   :  { %2592 = vmatpush1.bf16.msra.mxu0 %v2591_v10  ;;  %v291_v43 = vld [vmem:[#allocation2 + $0x268] sm:$0xff]  ;;  %v293_v45 = vld [vmem:[#allocation2 + $0x278] sm:$0xff]  ;;  %v2795_v50 = vpack.c.bf16 %v284_v41, %v280_v39  ;;  %v286_v52 = vld [vmem:[#allocation2 + $0x240] sm:$0xff] }
 0x103   :  { %2784 = vmatpush1.bf16.msra.mxu1 %v2783_v11  ;;  %2594 = vmatprep.subr.bf16.mxu0 %v2593_v12  ;;  %v2605_v51 = vpack.c.bf16 %v291_v43, %v287_v42  ;;  %v290_v53 = vld [vmem:[#allocation2 + $0x260] sm:$0xff]  ;;  %v288_v54 = vld [vmem:[#allocation2 + $0x250] sm:$0xff]  ;;  %v2797_v55 = vpack.c.bf16 %v293_v45, %v289_v44  ;;  %v295_v57 = vld [vmem:[#allocation2 + $0x288] sm:$0xff]  ;;  %v4095_v11 = vsub.s32 %v625_v62, %v4092_v61 }
 0x104   :  { %2786 = vmatprep.subr.bf16.mxu1 %v2785_v16  ;;  %v292_v56 = vld [vmem:[#allocation2 + $0x270] sm:$0xff]  ;;  %v299_v58 = vld [vmem:[#allocation2 + $0x2a8] sm:$0xff]  ;;  %v297_v59 = vld [vmem:[#allocation2 + $0x298] sm:$0xff]  ;;  %v2607_v63 = vpack.c.bf16 %v290_v53, %v286_v52 }
 0x105   :  { %v301_v60 = vld [vmem:[#allocation2 + $0x2b8] sm:$0xff]  ;;  %v2799_v0 = vpack.c.bf16 %v292_v56, %v288_v54  ;;  %v2609_v1 = vpack.c.bf16 %v299_v58, %v295_v57  ;;  %v294_v2 = vld [vmem:[#allocation2 + $0x280] sm:$0xff]  ;;  %v296_v4 = vld [vmem:[#allocation2 + $0x290] sm:$0xff] }
 0x106   :  { %2596 = vmatpush1.bf16.msra.mxu0 %v2595_v22  ;;  %v298_v3 = vld [vmem:[#allocation2 + $0x2a0] sm:$0xff]  ;;  %v2801_v5 = vpack.c.bf16 %v301_v60, %v297_v59  ;;  %v300_v6 = vld [vmem:[#allocation2 + $0x2b0] sm:$0xff]  ;;  %v303_v7 = vld [vmem:[#allocation2 + $0x2c8] sm:$0xff] }
 0x107   :  { %2788 = vmatpush1.bf16.msra.mxu1 %v2787_v23  ;;  %2598 = vmatprep.subr.bf16.mxu0 %v2597_v24  ;;  %v307_v8 = vld [vmem:[#allocation2 + $0x2e8] sm:$0xff]  ;;  %v305_v9 = vld [vmem:[#allocation2 + $0x2d8] sm:$0xff]  ;;  %v2611_v12 = vpack.c.bf16 %v298_v3, %v294_v2  ;;  %v302_v13 = vld [vmem:[#allocation2 + $0x2c0] sm:$0xff]  ;;  %v2803_v14 = vpack.c.bf16 %v300_v6, %v296_v4 }
 0x108   :  { %2790 = vmatprep.subr.bf16.mxu1 %v2789_v28  ;;  %v309_v10 = vld [vmem:[#allocation2 + $0x2f8] sm:$0xff]  ;;  %v2613_v15 = vpack.c.bf16 %v307_v8, %v303_v7  ;;  %v306_v16 = vld [vmem:[#allocation2 + $0x2e0] sm:$0xff]  ;;  %v304_v17 = vld [vmem:[#allocation2 + $0x2d0] sm:$0xff] }
 0x109   :  { %v308_v18 = vld [vmem:[#allocation2 + $0x2f0] sm:$0xff]  ;;  %v2805_v19 = vpack.c.bf16 %v309_v10, %v305_v9  ;;  %v311_v20 = vld [vmem:[#allocation2 + $0x308] sm:$0xff]  ;;  %v4100_v22 = vld [vmem:[%s4239_s0] sm:$0xff]  ;;  %v2615_v26 = vpack.c.bf16 %v306_v16, %v302_v13 }
 0x10a   :  { %2600 = vmatpush1.bf16.msra.mxu0 %v2599_v34  ;;  %v315_v21 = vld [vmem:[#allocation2 + $0x328] sm:$0xff]  ;;  %v313_v23 = vld [vmem:[#allocation2 + $0x318] sm:$0xff]  ;;  %v4104_v25 = vrot.slane %v4100_v22, %v4095_v11  ;;  %v2807_v27 = vpack.c.bf16 %v308_v18, %v304_v17  ;;  %v310_v29 = vld [vmem:[#allocation2 + $0x300] sm:$0xff]  ;;  %v622_v8 = vcombine.high %v4100_v22, %v4100_v22 }
 0x10b   :  { %2792 = vmatpush1.bf16.msra.mxu1 %v2791_v35  ;;  %2602 = vmatprep.subr.bf16.mxu0 %v2601_v36  ;;  %v317_v24 = vld [vmem:[#allocation2 + $0x338] sm:$0xff]  ;;  %v2617_v28 = vpack.c.bf16 %v315_v21, %v311_v20  ;;  %v314_v30 = vld [vmem:[#allocation2 + $0x320] sm:$0xff]  ;;  %v312_v31 = vld [vmem:[#allocation2 + $0x310] sm:$0xff] }
 0x10c   :  { %2794 = vmatprep.subr.bf16.mxu1 %v2793_v40  ;;  %v637_v32 = vcombine.high %v4104_v25, %v4104_v25  ;;  %v2809_v33 = vpack.c.bf16 %v317_v24, %v313_v23  ;;  %v316_v34 = vld [vmem:[#allocation2 + $0x330] sm:$0xff]  ;;  %v319_v35 = vld [vmem:[#allocation2 + $0x348] sm:$0xff]  ;;  %v321_v37 = vld [vmem:[#allocation2 + $0x358] sm:$0xff]  ;;  %v2619_v39 = vpack.c.bf16 %v314_v30, %v310_v29  ;;  %v4111_v22 = vrot.slane %v622_v8, %v4095_v11 }
 0x10d   :  { %v323_v36 = vld [vmem:[#allocation2 + $0x368] sm:$0xff]  ;;  %v325_v38 = vld [vmem:[#allocation2 + $0x378] sm:$0xff]  ;;  %v2811_v40 = vpack.c.bf16 %v316_v34, %v312_v31  ;;  %v318_v42 = vld [vmem:[#allocation2 + $0x340] sm:$0xff] }
 0x10e   :  { %2604 = vmatpush1.bf16.msra.mxu0 %v2603_v49  ;;  %717 = vmatprep.mubr.f32.mxu0 %v637_v32  ;;  %v2621_v41 = vpack.c.bf16 %v323_v36, %v319_v35  ;;  %v322_v43 = vld [vmem:[#allocation2 + $0x360] sm:$0xff]  ;;  %v320_v44 = vld [vmem:[#allocation2 + $0x350] sm:$0xff]  ;;  %v2813_v45 = vpack.c.bf16 %v325_v38, %v321_v37  ;;  %v327_v47 = vld [vmem:[#allocation2 + $0x388] sm:$0xff]  ;;  %v638_v11 = vcombine.high %v4111_v22, %v4111_v22 }
 0x10f   :  { %2796 = vmatpush1.bf16.msra.mxu1 %v2795_v50  ;;  %2606 = vmatprep.subr.bf16.mxu0 %v2605_v51  ;;  %v324_v46 = vld [vmem:[#allocation2 + $0x370] sm:$0xff]  ;;  %v331_v48 = vld [vmem:[#allocation2 + $0x3a8] sm:$0xff]  ;;  %v329_v49 = vld [vmem:[#allocation2 + $0x398] sm:$0xff]  ;;  %v2623_v51 = vpack.c.bf16 %v322_v43, %v318_v42 }
 0x110   :  { %2798 = vmatprep.subr.bf16.mxu1 %v2797_v55  ;;  %930 = vmatprep.mubr.f32.mxu1 %v637_v32  ;;  %v333_v50 = vld [vmem:[#allocation2 + $0x3b8] sm:$0xff]  ;;  %v2815_v52 = vpack.c.bf16 %v324_v46, %v320_v44  ;;  %v2625_v53 = vpack.c.bf16 %v331_v48, %v327_v47  ;;  %v326_v54 = vld [vmem:[#allocation2 + $0x380] sm:$0xff]  ;;  %v328_v56 = vld [vmem:[#allocation2 + $0x390] sm:$0xff] }
 0x111   :  { %v330_v55 = vld [vmem:[#allocation2 + $0x3a0] sm:$0xff]  ;;  %v2817_v57 = vpack.c.bf16 %v333_v50, %v329_v49  ;;  %v332_v58 = vld [vmem:[#allocation2 + $0x3b0] sm:$0xff]  ;;  %v335_v59 = vld [vmem:[#allocation2 + $0x3c8] sm:$0xff] }
 0x112   :  { %2608 = vmatpush1.bf16.msra.mxu0 %v2607_v63  ;;  %v339_v60 = vld [vmem:[#allocation2 + $0x3e8] sm:$0xff]  ;;  %v337_v62 = vld [vmem:[#allocation2 + $0x3d8] sm:$0xff]  ;;  %v334_v3 = vld [vmem:[#allocation2 + $0x3c0] sm:$0xff] }
 0x113   :  { %2800 = vmatpush1.bf16.msra.mxu1 %v2799_v0  ;;  %2610 = vmatprep.subr.bf16.mxu0 %v2609_v1  ;;  %v341_v63 = vld [vmem:[#allocation2 + $0x3f8] sm:$0xff]  ;;  %v2627_v0 = vpack.c.bf16 %v330_v55, %v326_v54  ;;  %v2819_v1 = vpack.c.bf16 %v332_v58, %v328_v56  ;;  %v2629_v2 = vpack.c.bf16 %v339_v60, %v335_v59  ;;  %v338_v4 = vld [vmem:[#allocation2 + $0x3e0] sm:$0xff]  ;;  %v340_v7 = vld [vmem:[#allocation2 + $0x3f0] sm:$0xff] }
 0x114   :  { %2802 = vmatprep.subr.bf16.mxu1 %v2801_v5  ;;  %v336_v5 = vld [vmem:[#allocation2 + $0x3d0] sm:$0xff]  ;;  %v2821_v6 = vpack.c.bf16 %v341_v63, %v337_v62  ;;  %v343_v9 = vld [vmem:[#allocation2 + $0x408] sm:$0xff]  ;;  %v349_v13 = vld [vmem:[#allocation2 + $0x438] sm:$0xff] }
 0x115   :  { %v347_v10 = vld [vmem:[#allocation2 + $0x428] sm:$0xff]  ;;  %v342_v17 = vld [vmem:[#allocation2 + $0x400] sm:$0xff]  ;;  %v348_v21 = vld [vmem:[#allocation2 + $0x430] sm:$0xff] }
 0x116   :  { %2612 = vmatpush1.bf16.msra.mxu0 %v2611_v12  ;;  %v345_v12 = vld [vmem:[#allocation2 + $0x418] sm:$0xff]  ;;  %v2633_v16 = vpack.c.bf16 %v347_v10, %v343_v9  ;;  %v346_v18 = vld [vmem:[#allocation2 + $0x420] sm:$0xff]  ;;  %v351_v23 = vld [vmem:[#allocation2 + $0x448] sm:$0xff] }
 0x117   :  { %2804 = vmatpush1.bf16.msra.mxu1 %v2803_v14  ;;  %2614 = vmatprep.subr.bf16.mxu0 %v2613_v15  ;;  %v2631_v14 = vpack.c.bf16 %v338_v4, %v334_v3  ;;  %v2823_v15 = vpack.c.bf16 %v340_v7, %v336_v5  ;;  %v2825_v20 = vpack.c.bf16 %v349_v13, %v345_v12  ;;  %v355_v24 = vld [vmem:[#allocation2 + $0x468] sm:$0xff]  ;;  %v350_v31 = vld [vmem:[#allocation2 + $0x440] sm:$0xff]  ;;  %v356_v35 = vld [vmem:[#allocation2 + $0x470] sm:$0xff] }
 0x118   :  { %2806 = vmatprep.subr.bf16.mxu1 %v2805_v19  ;;  %v344_v19 = vld [vmem:[#allocation2 + $0x410] sm:$0xff]  ;;  %v2637_v30 = vpack.c.bf16 %v355_v24, %v351_v23  ;;  %v354_v32 = vld [vmem:[#allocation2 + $0x460] sm:$0xff]  ;;  %v359_v36 = vld [vmem:[#allocation2 + $0x488] sm:$0xff] }
 0x119   :  { %v2827_v29 = vpack.c.bf16 %v348_v21, %v344_v19  ;;  %v363_v37 = vld [vmem:[#allocation2 + $0x4a8] sm:$0xff]  ;;  %v361_v38 = vld [vmem:[#allocation2 + $0x498] sm:$0xff]  ;;  %v358_v43 = vld [vmem:[#allocation2 + $0x480] sm:$0xff] }
 0x11a   :  { %2616 = vmatpush1.bf16.msra.mxu0 %v2615_v26  ;;  %v353_v26 = vld [vmem:[#allocation2 + $0x458] sm:$0xff]  ;;  %v2641_v42 = vpack.c.bf16 %v363_v37, %v359_v36  ;;  %v362_v44 = vld [vmem:[#allocation2 + $0x4a0] sm:$0xff]  ;;  %v364_v47 = vld [vmem:[#allocation2 + $0x4b0] sm:$0xff] }
 0x11b   :  { %2808 = vmatpush1.bf16.msra.mxu1 %v2807_v27  ;;  %2618 = vmatprep.subr.bf16.mxu0 %v2617_v28  ;;  %v357_v27 = vld [vmem:[#allocation2 + $0x478] sm:$0xff]  ;;  %v2635_v28 = vpack.c.bf16 %v346_v18, %v342_v17  ;;  %v367_v48 = vld [vmem:[#allocation2 + $0x4c8] sm:$0xff]  ;;  %v366_v54 = vld [vmem:[#allocation2 + $0x4c0] sm:$0xff] }
 0x11c   :  { %2810 = vmatprep.subr.bf16.mxu1 %v2809_v33  ;;  %v352_v33 = vld [vmem:[#allocation2 + $0x450] sm:$0xff]  ;;  %v2829_v34 = vpack.c.bf16 %v357_v27, %v353_v26  ;;  %v371_v49 = vld [vmem:[#allocation2 + $0x4e8] sm:$0xff]  ;;  %v369_v50 = vld [vmem:[#allocation2 + $0x4d8] sm:$0xff] }
 0x11d   :  { %v370_v55 = vld [vmem:[#allocation2 + $0x4e0] sm:$0xff]  ;;  %v368_v56 = vld [vmem:[#allocation2 + $0x4d0] sm:$0xff]  ;;  %v375_v59 = vld [vmem:[#allocation2 + $0x508] sm:$0xff] }
 0x11e   :  { %2620 = vmatpush1.bf16.msra.mxu0 %v2619_v39  ;;  %v365_v39 = vld [vmem:[#allocation2 + $0x4b8] sm:$0xff]  ;;  %v372_v58 = vld [vmem:[#allocation2 + $0x4f0] sm:$0xff]  ;;  %v379_v60 = vld [vmem:[#allocation2 + $0x528] sm:$0xff] }
 0x11f   :  { %2812 = vmatpush1.bf16.msra.mxu1 %v2811_v40  ;;  %2622 = vmatprep.subr.bf16.mxu0 %v2621_v41  ;;  %v2639_v40 = vpack.c.bf16 %v354_v32, %v350_v31  ;;  %v2831_v41 = vpack.c.bf16 %v356_v35, %v352_v33  ;;  %v2833_v46 = vpack.c.bf16 %v365_v39, %v361_v38  ;;  %v377_v62 = vld [vmem:[#allocation2 + $0x518] sm:$0xff]  ;;  %v374_v3 = vld [vmem:[#allocation2 + $0x500] sm:$0xff]  ;;  %v376_v5 = vld [vmem:[#allocation2 + $0x510] sm:$0xff] }
 0x120   :  { %2814 = vmatprep.subr.bf16.mxu1 %v2813_v45  ;;  %v360_v45 = vld [vmem:[#allocation2 + $0x490] sm:$0xff]  ;;  %v381_v63 = vld [vmem:[#allocation2 + $0x538] sm:$0xff]  ;;  %v378_v4 = vld [vmem:[#allocation2 + $0x520] sm:$0xff] }
 0x121   :  { %v380_v7 = vld [vmem:[#allocation2 + $0x530] sm:$0xff]  ;;  %v383_v8 = vld [vmem:[#allocation2 + $0x548] sm:$0xff]  ;;  %v385_v10 = vld [vmem:[#allocation2 + $0x558] sm:$0xff]  ;;  %v2651_v13 = vpack.c.bf16 %v378_v4, %v374_v3 }
 0x122   :  { %2624 = vmatpush1.bf16.msra.mxu0 %v2623_v51  ;;  %v373_v51 = vld [vmem:[#allocation2 + $0x4f8] sm:$0xff]  ;;  %v387_v9 = vld [vmem:[#allocation2 + $0x568] sm:$0xff]  ;;  %v386_v17 = vld [vmem:[#allocation2 + $0x560] sm:$0xff] }
 0x123   :  { %2816 = vmatpush1.bf16.msra.mxu1 %v2815_v52  ;;  %2626 = vmatprep.subr.bf16.mxu0 %v2625_v53  ;;  %v2643_v52 = vpack.c.bf16 %v362_v44, %v358_v43  ;;  %v2645_v53 = vpack.c.bf16 %v371_v49, %v367_v48  ;;  %v389_v12 = vld [vmem:[#allocation2 + $0x578] sm:$0xff]  ;;  %v384_v18 = vld [vmem:[#allocation2 + $0x550] sm:$0xff]  ;;  %v391_v21 = vld [vmem:[#allocation2 + $0x588] sm:$0xff] }
 0x124   :  { %2818 = vmatprep.subr.bf16.mxu1 %v2817_v57  ;;  %v2837_v57 = vpack.c.bf16 %v373_v51, %v369_v50  ;;  %v2845_v19 = vpack.c.bf16 %v389_v12, %v385_v10  ;;  %v395_v23 = vld [vmem:[#allocation2 + $0x5a8] sm:$0xff]  ;;  %v393_v24 = vld [vmem:[#allocation2 + $0x598] sm:$0xff]  ;;  %v394_v31 = vld [vmem:[#allocation2 + $0x5a0] sm:$0xff] }
 0x125   :  { %v397_v26 = vld [vmem:[#allocation2 + $0x5b8] sm:$0xff]  ;;  %v392_v32 = vld [vmem:[#allocation2 + $0x590] sm:$0xff]  ;;  %v399_v35 = vld [vmem:[#allocation2 + $0x5c8] sm:$0xff] }
 0x126   :  { %2628 = vmatpush1.bf16.msra.mxu0 %v2627_v0  ;;  %v2647_v0 = vpack.c.bf16 %v370_v55, %v366_v54  ;;  %v2849_v33 = vpack.c.bf16 %v397_v26, %v393_v24  ;;  %v403_v36 = vld [vmem:[#allocation2 + $0x5e8] sm:$0xff]  ;;  %v401_v37 = vld [vmem:[#allocation2 + $0x5d8] sm:$0xff]  ;;  %v400_v43 = vld [vmem:[#allocation2 + $0x5d0] sm:$0xff] }
 0x127   :  { %2820 = vmatpush1.bf16.msra.mxu1 %v2819_v1  ;;  %2630 = vmatprep.subr.bf16.mxu0 %v2629_v2  ;;  %v2839_v1 = vpack.c.bf16 %v372_v58, %v368_v56  ;;  %v2649_v2 = vpack.c.bf16 %v379_v60, %v375_v59  ;;  %v409_v48 = vld [vmem:[#allocation2 + $0x618] sm:$0xff]  ;;  %v408_v54 = vld [vmem:[#allocation2 + $0x610] sm:$0xff]  ;;  %v419_v58 = vld [vmem:[#allocation2 + $0x668] sm:$0xff] }
 0x128   :  { %2822 = vmatprep.subr.bf16.mxu1 %v2821_v6  ;;  %v2841_v6 = vpack.c.bf16 %v381_v63, %v377_v62  ;;  %v413_v49 = vld [vmem:[#allocation2 + $0x638] sm:$0xff]  ;;  %v412_v56 = vld [vmem:[#allocation2 + $0x630] sm:$0xff] }
 0x129   :  { %v2857_v55 = vpack.c.bf16 %v413_v49, %v409_v48  ;;  %v417_v59 = vld [vmem:[#allocation2 + $0x658] sm:$0xff]  ;;  %v2859_v63 = vpack.c.bf16 %v412_v56, %v408_v54  ;;  %v416_v3 = vld [vmem:[#allocation2 + $0x650] sm:$0xff]  ;;  %v459_v56 = vld [vmem:[#allocation2 + $0x7a8] sm:$0xff] }
 0x12a   :  { %2632 = vmatpush1.bf16.msra.mxu0 %v2631_v14  ;;  %v2843_v14 = vpack.c.bf16 %v380_v7, %v376_v5  ;;  %v421_v60 = vld [vmem:[#allocation2 + $0x678] sm:$0xff]  ;;  %v420_v5 = vld [vmem:[#allocation2 + $0x670] sm:$0xff]  ;;  %v427_v7 = vld [vmem:[#allocation2 + $0x6a8] sm:$0xff] }
 0x12b   :  { %2824 = vmatpush1.bf16.msra.mxu1 %v2823_v15  ;;  %2634 = vmatprep.subr.bf16.mxu0 %v2633_v16  ;;  %v2653_v15 = vpack.c.bf16 %v387_v9, %v383_v8  ;;  %v382_v16 = vld [vmem:[#allocation2 + $0x540] sm:$0xff]  ;;  %v2861_v4 = vpack.c.bf16 %v421_v60, %v417_v59  ;;  %v425_v8 = vld [vmem:[#allocation2 + $0x698] sm:$0xff]  ;;  %v2863_v12 = vpack.c.bf16 %v420_v5, %v416_v3  ;;  %v452_v54 = vld [vmem:[#allocation2 + $0x770] sm:$0xff] }
 0x12c   :  { %2826 = vmatprep.subr.bf16.mxu1 %v2825_v20  ;;  %v388_v20 = vld [vmem:[#allocation2 + $0x570] sm:$0xff]  ;;  %v2655_v27 = vpack.c.bf16 %v386_v17, %v382_v16  ;;  %v429_v9 = vld [vmem:[#allocation2 + $0x6b8] sm:$0xff]  ;;  %v467_v5 = vld [vmem:[#allocation2 + $0x7e8] sm:$0xff] }
 0x12d   :  { %718 = vmatmul.mubr.f32.vlgmr.msra.gmra.mrb[0].mxu0 %v4104_v25  ;;  %v424_v16 = vld [vmem:[#allocation2 + $0x690] sm:$0xff]  ;;  %v2865_v17 = vpack.c.bf16 %v429_v9, %v425_v8 }
 0x12e   :  { %2636 = vmatpush1.bf16.msra.mxu0 %v2635_v28  ;;  %931 = vmatmul.mubr.f32.vlgmr.msra.gmra.mrb[0].mxu1 %v4104_v25  ;;  %v2835_v25 = vpack.c.bf16 %v364_v47, %v360_v45  ;;  %v2847_v28 = vpack.c.bf16 %v388_v20, %v384_v18  ;;  %v404_v45 = vld [vmem:[#allocation2 + $0x5f0] sm:$0xff]  ;;  %v411_v47 = vld [vmem:[#allocation2 + $0x628] sm:$0xff] }
 0x12f   :  { %2828 = vmatpush1.bf16.msra.mxu1 %v2827_v29  ;;  %2638 = vmatprep.subr.bf16.mxu0 %v2637_v30  ;;  %v2657_v29 = vpack.c.bf16 %v395_v23, %v391_v21  ;;  %v390_v30 = vld [vmem:[#allocation2 + $0x580] sm:$0xff]  ;;  %v2855_v51 = vpack.c.bf16 %v404_v45, %v400_v43  ;;  %v428_v18 = vld [vmem:[#allocation2 + $0x6b0] sm:$0xff]  ;;  %v435_v20 = vld [vmem:[#allocation2 + $0x6e8] sm:$0xff] }
 0x130   :  { %2830 = vmatprep.subr.bf16.mxu1 %v2829_v34  ;;  %788 = vmatprep.mubr.f32.mxu0 %v638_v11  ;;  %v396_v34 = vld [vmem:[#allocation2 + $0x5b0] sm:$0xff]  ;;  %v2659_v38 = vpack.c.bf16 %v394_v31, %v390_v30  ;;  %v433_v21 = vld [vmem:[#allocation2 + $0x6d8] sm:$0xff]  ;;  %v2867_v26 = vpack.c.bf16 %v428_v18, %v424_v16  ;;  %v451_v45 = vld [vmem:[#allocation2 + $0x768] sm:$0xff] }
 0x131   :  { %1001 = vmatprep.mubr.f32.mxu1 %v638_v11  ;;  %v405_v11 = vld [vmem:[#allocation2 + $0x5f8] sm:$0xff]  ;;  %v2851_v39 = vpack.c.bf16 %v396_v34, %v392_v32  ;;  %v432_v30 = vld [vmem:[#allocation2 + $0x6d0] sm:$0xff]  ;;  %v443_v34 = vld [vmem:[#allocation2 + $0x728] sm:$0xff] }
 0x132   :  { %2640 = vmatpush1.bf16.msra.mxu0 %v2639_v40  ;;  %v2661_v40 = vpack.c.bf16 %v403_v36, %v399_v35  ;;  %v2853_v44 = vpack.c.bf16 %v405_v11, %v401_v37  ;;  %v437_v23 = vld [vmem:[#allocation2 + $0x6f8] sm:$0xff]  ;;  %v436_v32 = vld [vmem:[#allocation2 + $0x6f0] sm:$0xff]  ;;  %v475_v18 = vld [vmem:[#allocation2 + $0x828] sm:$0xff] }
 0x133   :  { %2832 = vmatpush1.bf16.msra.mxu1 %v2831_v41  ;;  %2642 = vmatprep.subr.bf16.mxu0 %v2641_v42  ;;  %v398_v41 = vld [vmem:[#allocation2 + $0x5c0] sm:$0xff]  ;;  %v2869_v31 = vpack.c.bf16 %v437_v23, %v433_v21  ;;  %v441_v35 = vld [vmem:[#allocation2 + $0x718] sm:$0xff]  ;;  %v2871_v11 = vpack.c.bf16 %v436_v32, %v432_v30  ;;  %v444_v43 = vld [vmem:[#allocation2 + $0x730] sm:$0xff] }
 0x134   :  { %2834 = vmatprep.subr.bf16.mxu1 %v2833_v46  ;;  %v402_v42 = vld [vmem:[#allocation2 + $0x5e0] sm:$0xff]  ;;  %v407_v46 = vld [vmem:[#allocation2 + $0x608] sm:$0xff]  ;;  %v445_v36 = vld [vmem:[#allocation2 + $0x738] sm:$0xff] }
 0x135   :  { %v2663_v50 = vpack.c.bf16 %v402_v42, %v398_v41  ;;  %v440_v41 = vld [vmem:[#allocation2 + $0x710] sm:$0xff]  ;;  %v2873_v42 = vpack.c.bf16 %v445_v36, %v441_v35  ;;  %v483_v32 = vld [vmem:[#allocation2 + $0x868] sm:$0xff] }
 0x136   :  { %2644 = vmatpush1.bf16.msra.mxu0 %v2643_v52  ;;  %v2665_v52 = vpack.c.bf16 %v411_v47, %v407_v46  ;;  %v449_v46 = vld [vmem:[#allocation2 + $0x758] sm:$0xff]  ;;  %v2875_v49 = vpack.c.bf16 %v444_v43, %v440_v41  ;;  %v460_v3 = vld [vmem:[#allocation2 + $0x7b0] sm:$0xff]  ;;  %v4120_v36 = vld.sshfl [vmem:[%s4239_s0 + $0x8] sm:$0x33 pattern:$0x76325410] }
 0x137   :  { %2836 = vmatpush1.bf16.msra.mxu1 %v2835_v25  ;;  %2646 = vmatprep.subr.bf16.mxu0 %v2645_v53  ;;  %v406_v25 = vld [vmem:[#allocation2 + $0x600] sm:$0xff]  ;;  %v453_v47 = vld [vmem:[#allocation2 + $0x778] sm:$0xff]  ;;  %v468_v16 = vld [vmem:[#allocation2 + $0x7f0] sm:$0xff] }
 0x138   :  { %2838 = vmatprep.subr.bf16.mxu1 %v2837_v57  ;;  %v410_v53 = vld [vmem:[#allocation2 + $0x620] sm:$0xff]  ;;  %v415_v57 = vld [vmem:[#allocation2 + $0x648] sm:$0xff]  ;;  %v476_v30 = vld [vmem:[#allocation2 + $0x830] sm:$0xff] }
 0x139   :  { %v2667_v62 = vpack.c.bf16 %v410_v53, %v406_v25  ;;  %v448_v25 = vld [vmem:[#allocation2 + $0x750] sm:$0xff]  ;;  %v2877_v53 = vpack.c.bf16 %v453_v47, %v449_v46  ;;  %v487_v43 = vld [vmem:[#allocation2 + $0x888] sm:$0xff]  ;;  %v489_v46 = vld [vmem:[#allocation2 + $0x898] sm:$0xff] }
 0x13a   :  { %2648 = vmatpush1.bf16.msra.mxu0 %v2647_v0  ;;  %v2669_v0 = vpack.c.bf16 %v419_v58, %v415_v57  ;;  %v457_v57 = vld [vmem:[#allocation2 + $0x798] sm:$0xff]  ;;  %v2879_v60 = vpack.c.bf16 %v452_v54, %v448_v25  ;;  %v488_v25 = vld [vmem:[#allocation2 + $0x890] sm:$0xff] }
 0x13b   :  { %2840 = vmatpush1.bf16.msra.mxu1 %v2839_v1  ;;  %2650 = vmatprep.subr.bf16.mxu0 %v2649_v2  ;;  %v414_v1 = vld [vmem:[#allocation2 + $0x640] sm:$0xff]  ;;  %v461_v58 = vld [vmem:[#allocation2 + $0x7b8] sm:$0xff]  ;;  %v492_v54 = vld [vmem:[#allocation2 + $0x8b0] sm:$0xff] }
 0x13c   :  { %2842 = vmatprep.subr.bf16.mxu1 %v2841_v6  ;;  %v418_v2 = vld [vmem:[#allocation2 + $0x660] sm:$0xff]  ;;  %v423_v6 = vld [vmem:[#allocation2 + $0x688] sm:$0xff]  ;;  %v493_v47 = vld [vmem:[#allocation2 + $0x8b8] sm:$0xff] }
 0x13d   :  { %v2671_v10 = vpack.c.bf16 %v418_v2, %v414_v1  ;;  %v456_v1 = vld [vmem:[#allocation2 + $0x790] sm:$0xff]  ;;  %v2881_v2 = vpack.c.bf16 %v461_v58, %v457_v57  ;;  %v497_v57 = vld [vmem:[#allocation2 + $0x8d8] sm:$0xff] }
 0x13e   :  { %2652 = vmatpush1.bf16.msra.mxu0 %v2651_v13  ;;  %v2673_v13 = vpack.c.bf16 %v427_v7, %v423_v6  ;;  %v465_v6 = vld [vmem:[#allocation2 + $0x7d8] sm:$0xff]  ;;  %v2883_v9 = vpack.c.bf16 %v460_v3, %v456_v1  ;;  %v503_v3 = vld [vmem:[#allocation2 + $0x908] sm:$0xff] }
 0x13f   :  { %2844 = vmatpush1.bf16.msra.mxu1 %v2843_v14  ;;  %2654 = vmatprep.subr.bf16.mxu0 %v2653_v15  ;;  %v422_v14 = vld [vmem:[#allocation2 + $0x680] sm:$0xff]  ;;  %v469_v7 = vld [vmem:[#allocation2 + $0x7f8] sm:$0xff] }
 0x140   :  { %2846 = vmatprep.subr.bf16.mxu1 %v2845_v19  ;;  %v426_v15 = vld [vmem:[#allocation2 + $0x6a0] sm:$0xff]  ;;  %v431_v19 = vld [vmem:[#allocation2 + $0x6c8] sm:$0xff]  ;;  %v501_v58 = vld [vmem:[#allocation2 + $0x8f8] sm:$0xff] }
 0x141   :  { %v2675_v24 = vpack.c.bf16 %v426_v15, %v422_v14  ;;  %v464_v14 = vld [vmem:[#allocation2 + $0x7d0] sm:$0xff]  ;;  %v2885_v15 = vpack.c.bf16 %v469_v7, %v465_v6  ;;  %v2901_v1 = vpack.c.bf16 %v501_v58, %v497_v57  ;;  %v509_v6 = vld [vmem:[#allocation2 + $0x938] sm:$0xff] }
 0x142   :  { %2656 = vmatpush1.bf16.msra.mxu0 %v2655_v27  ;;  %v2677_v27 = vpack.c.bf16 %v435_v20, %v431_v19  ;;  %v473_v19 = vld [vmem:[#allocation2 + $0x818] sm:$0xff]  ;;  %v2887_v23 = vpack.c.bf16 %v468_v16, %v464_v14  ;;  %v511_v16 = vld [vmem:[#allocation2 + $0x948] sm:$0xff] }
 0x143   :  { %2848 = vmatpush1.bf16.msra.mxu1 %v2847_v28  ;;  %2658 = vmatprep.subr.bf16.mxu0 %v2657_v29  ;;  %v430_v28 = vld [vmem:[#allocation2 + $0x6c0] sm:$0xff]  ;;  %v477_v20 = vld [vmem:[#allocation2 + $0x838] sm:$0xff] }
 0x144   :  { %2850 = vmatprep.subr.bf16.mxu1 %v2849_v33  ;;  %v434_v29 = vld [vmem:[#allocation2 + $0x6e0] sm:$0xff]  ;;  %v439_v33 = vld [vmem:[#allocation2 + $0x708] sm:$0xff] }
 0x145   :  { %v2679_v37 = vpack.c.bf16 %v434_v29, %v430_v28  ;;  %v472_v28 = vld [vmem:[#allocation2 + $0x810] sm:$0xff]  ;;  %v2889_v29 = vpack.c.bf16 %v477_v20, %v473_v19  ;;  %v517_v19 = vld [vmem:[#allocation2 + $0x978] sm:$0xff] }
 0x146   :  { %2660 = vmatpush1.bf16.msra.mxu0 %v2659_v38  ;;  %v2681_v38 = vpack.c.bf16 %v443_v34, %v439_v33  ;;  %v481_v33 = vld [vmem:[#allocation2 + $0x858] sm:$0xff] }
 0x147   :  { %2852 = vmatpush1.bf16.msra.mxu1 %v2851_v39  ;;  %2662 = vmatprep.subr.bf16.mxu0 %v2661_v40  ;;  %v438_v39 = vld [vmem:[#allocation2 + $0x700] sm:$0xff]  ;;  %v485_v34 = vld [vmem:[#allocation2 + $0x878] sm:$0xff] }
 0x148   :  { %2854 = vmatprep.subr.bf16.mxu1 %v2853_v44  ;;  %v442_v40 = vld [vmem:[#allocation2 + $0x720] sm:$0xff]  ;;  %v447_v44 = vld [vmem:[#allocation2 + $0x748] sm:$0xff]  ;;  %v2893_v41 = vpack.c.bf16 %v485_v34, %v481_v33  ;;  %v525_v33 = vld [vmem:[#allocation2 + $0x9b8] sm:$0xff] }
 0x149   :  { %v2683_v48 = vpack.c.bf16 %v442_v40, %v438_v39  ;;  %v482_v39 = vld [vmem:[#allocation2 + $0x860] sm:$0xff]  ;;  %v480_v40 = vld [vmem:[#allocation2 + $0x850] sm:$0xff] }
 0x14a   :  { %2664 = vmatpush1.bf16.msra.mxu0 %v2663_v50  ;;  %v2685_v50 = vpack.c.bf16 %v451_v45, %v447_v44  ;;  %v491_v44 = vld [vmem:[#allocation2 + $0x8a8] sm:$0xff]  ;;  %v646_v45 = vcombine.high %v4120_v36, %v4120_v36 }
 0x14b   :  { %2856 = vmatpush1.bf16.msra.mxu1 %v2855_v51  ;;  %2666 = vmatprep.subr.bf16.mxu0 %v2665_v52  ;;  %v446_v51 = vld [vmem:[#allocation2 + $0x740] sm:$0xff] }
 0x14c   :  { %2858 = vmatprep.subr.bf16.mxu1 %v2857_v55  ;;  %v450_v52 = vld [vmem:[#allocation2 + $0x760] sm:$0xff]  ;;  %v455_v55 = vld [vmem:[#allocation2 + $0x788] sm:$0xff] }
 0x14d   :  { %v2687_v59 = vpack.c.bf16 %v450_v52, %v446_v51  ;;  %v486_v51 = vld [vmem:[#allocation2 + $0x880] sm:$0xff] }
 0x14e   :  { %2668 = vmatpush1.bf16.msra.mxu0 %v2667_v62  ;;  %v2689_v62 = vpack.c.bf16 %v459_v56, %v455_v55  ;;  %v490_v52 = vld [vmem:[#allocation2 + $0x8a0] sm:$0xff]  ;;  %v495_v55 = vld [vmem:[#allocation2 + $0x8c8] sm:$0xff] }
 0x14f   :  { %2860 = vmatpush1.bf16.msra.mxu1 %v2859_v63  ;;  %2670 = vmatprep.subr.bf16.mxu0 %v2669_v0  ;;  %v454_v63 = vld [vmem:[#allocation2 + $0x780] sm:$0xff]  ;;  %v499_v56 = vld [vmem:[#allocation2 + $0x8e8] sm:$0xff] }
 0x150   :  { %2862 = vmatprep.subr.bf16.mxu1 %v2861_v4  ;;  %v458_v0 = vld [vmem:[#allocation2 + $0x7a0] sm:$0xff]  ;;  %v463_v4 = vld [vmem:[#allocation2 + $0x7c8] sm:$0xff] }
 0x151   :  { %v2691_v8 = vpack.c.bf16 %v458_v0, %v454_v63  ;;  %v498_v63 = vld [vmem:[#allocation2 + $0x8e0] sm:$0xff]  ;;  %v496_v0 = vld [vmem:[#allocation2 + $0x8d0] sm:$0xff] }
 0x152   :  { %2672 = vmatpush1.bf16.msra.mxu0 %v2671_v10  ;;  %v2693_v10 = vpack.c.bf16 %v467_v5, %v463_v4  ;;  %v507_v4 = vld [vmem:[#allocation2 + $0x928] sm:$0xff]  ;;  %v505_v5 = vld [vmem:[#allocation2 + $0x918] sm:$0xff] }
 0x153   :  { %2864 = vmatpush1.bf16.msra.mxu1 %v2863_v12  ;;  %2674 = vmatprep.subr.bf16.mxu0 %v2673_v13  ;;  %v462_v12 = vld [vmem:[#allocation2 + $0x7c0] sm:$0xff]  ;;  %v2905_v14 = vpack.c.bf16 %v509_v6, %v505_v5 }
 0x154   :  { %2866 = vmatprep.subr.bf16.mxu1 %v2865_v17  ;;  %v466_v13 = vld [vmem:[#allocation2 + $0x7e0] sm:$0xff]  ;;  %v471_v17 = vld [vmem:[#allocation2 + $0x808] sm:$0xff] }
 0x155   :  { %v2695_v21 = vpack.c.bf16 %v466_v13, %v462_v12  ;;  %v506_v12 = vld [vmem:[#allocation2 + $0x920] sm:$0xff]  ;;  %v504_v13 = vld [vmem:[#allocation2 + $0x910] sm:$0xff] }
 0x156   :  { %2676 = vmatpush1.bf16.msra.mxu0 %v2675_v24  ;;  %v2697_v24 = vpack.c.bf16 %v475_v18, %v471_v17  ;;  %v515_v17 = vld [vmem:[#allocation2 + $0x968] sm:$0xff]  ;;  %v513_v18 = vld [vmem:[#allocation2 + $0x958] sm:$0xff] }
 0x157   :  { %2868 = vmatpush1.bf16.msra.mxu1 %v2867_v26  ;;  %2678 = vmatprep.subr.bf16.mxu0 %v2677_v27  ;;  %v470_v26 = vld [vmem:[#allocation2 + $0x800] sm:$0xff] }
 0x158   :  { %2870 = vmatprep.subr.bf16.mxu1 %v2869_v31  ;;  %v474_v27 = vld [vmem:[#allocation2 + $0x820] sm:$0xff]  ;;  %v479_v31 = vld [vmem:[#allocation2 + $0x848] sm:$0xff] }
 0x159   :  { %v2699_v35 = vpack.c.bf16 %v474_v27, %v470_v26  ;;  %v514_v26 = vld [vmem:[#allocation2 + $0x960] sm:$0xff]  ;;  %v512_v27 = vld [vmem:[#allocation2 + $0x950] sm:$0xff] }
 0x15a   :  { %2680 = vmatpush1.bf16.msra.mxu0 %v2679_v37  ;;  %v2891_v37 = vpack.c.bf16 %v476_v30, %v472_v28  ;;  %v2909_v28 = vpack.c.bf16 %v517_v19, %v513_v18  ;;  %v519_v30 = vld [vmem:[#allocation2 + $0x988] sm:$0xff] }
 0x15b   :  { %2872 = vmatpush1.bf16.msra.mxu1 %v2871_v11  ;;  %2682 = vmatprep.subr.bf16.mxu0 %v2681_v38  ;;  %v2701_v11 = vpack.c.bf16 %v483_v32, %v479_v31  ;;  %v478_v38 = vld [vmem:[#allocation2 + $0x840] sm:$0xff]  ;;  %v523_v31 = vld [vmem:[#allocation2 + $0x9a8] sm:$0xff]  ;;  %v521_v32 = vld [vmem:[#allocation2 + $0x998] sm:$0xff] }
 0x15c   :  { %2874 = vmatprep.subr.bf16.mxu1 %v2873_v42  ;;  %v484_v42 = vld [vmem:[#allocation2 + $0x870] sm:$0xff] }
 0x15e   :  { %2684 = vmatpush1.bf16.msra.mxu0 %v2683_v48  ;;  %v2703_v48 = vpack.c.bf16 %v482_v39, %v478_v38  ;;  %v522_v38 = vld [vmem:[#allocation2 + $0x9a0] sm:$0xff]  ;;  %v520_v39 = vld [vmem:[#allocation2 + $0x990] sm:$0xff] }
 0x15f   :  { %2876 = vmatpush1.bf16.msra.mxu1 %v2875_v49  ;;  %2686 = vmatprep.subr.bf16.mxu0 %v2685_v50  ;;  %v2895_v49 = vpack.c.bf16 %v484_v42, %v480_v40  ;;  %v2705_v50 = vpack.c.bf16 %v491_v44, %v487_v43  ;;  %v2913_v40 = vpack.c.bf16 %v525_v33, %v521_v32  ;;  %v527_v42 = vld [vmem:[#allocation2 + $0x9c8] sm:$0xff]  ;;  %v529_v44 = vld [vmem:[#allocation2 + $0x9d8] sm:$0xff] }
 0x160   :  { %2878 = vmatprep.subr.bf16.mxu1 %v2877_v53  ;;  %v2897_v53 = vpack.c.bf16 %v493_v47, %v489_v46  ;;  %v531_v43 = vld [vmem:[#allocation2 + $0x9e8] sm:$0xff] }
 0x162   :  { %2688 = vmatpush1.bf16.msra.mxu0 %v2687_v59  ;;  %v2707_v59 = vpack.c.bf16 %v490_v52, %v486_v51  ;;  %v528_v51 = vld [vmem:[#allocation2 + $0x9d0] sm:$0xff] }
 0x163   :  { %2880 = vmatpush1.bf16.msra.mxu1 %v2879_v60  ;;  %2690 = vmatprep.subr.bf16.mxu0 %v2689_v62  ;;  %v2709_v60 = vpack.c.bf16 %v499_v56, %v495_v55  ;;  %v494_v62 = vld [vmem:[#allocation2 + $0x8c0] sm:$0xff]  ;;  %v537_v55 = vld [vmem:[#allocation2 + $0xa18] sm:$0xff] }
 0x164   :  { %2882 = vmatprep.subr.bf16.mxu1 %v2881_v2  ;;  %v500_v2 = vld [vmem:[#allocation2 + $0x8f0] sm:$0xff]  ;;  %v2711_v7 = vpack.c.bf16 %v498_v63, %v494_v62  ;;  %v541_v56 = vld [vmem:[#allocation2 + $0xa38] sm:$0xff] }
 0x165   :  { %v536_v62 = vld [vmem:[#allocation2 + $0xa10] sm:$0xff]  ;;  %v2921_v63 = vpack.c.bf16 %v541_v56, %v537_v55 }
 0x166   :  { %2692 = vmatpush1.bf16.msra.mxu0 %v2691_v8  ;;  %v2903_v8 = vpack.c.bf16 %v500_v2, %v496_v0  ;;  %v540_v0 = vld [vmem:[#allocation2 + $0xa30] sm:$0xff]  ;;  %v547_v2 = vld [vmem:[#allocation2 + $0xa68] sm:$0xff] }
 0x167   :  { %2884 = vmatpush1.bf16.msra.mxu1 %v2883_v9  ;;  %2694 = vmatprep.subr.bf16.mxu0 %v2693_v10  ;;  %v2713_v9 = vpack.c.bf16 %v507_v4, %v503_v3  ;;  %v502_v10 = vld [vmem:[#allocation2 + $0x900] sm:$0xff]  ;;  %v545_v3 = vld [vmem:[#allocation2 + $0xa58] sm:$0xff]  ;;  %v2923_v6 = vpack.c.bf16 %v540_v0, %v536_v62  ;;  %v580_v62 = vld [vmem:[#allocation2 + $0xb70] sm:$0xff] }
 0x168   :  { %2886 = vmatprep.subr.bf16.mxu1 %v2885_v15  ;;  %v508_v15 = vld [vmem:[#allocation2 + $0x930] sm:$0xff]  ;;  %v2715_v20 = vpack.c.bf16 %v506_v12, %v502_v10  ;;  %v549_v4 = vld [vmem:[#allocation2 + $0xa78] sm:$0xff]  ;;  %v587_v0 = vld [vmem:[#allocation2 + $0xba8] sm:$0xff] }
 0x169   :  { %v544_v10 = vld [vmem:[#allocation2 + $0xa50] sm:$0xff]  ;;  %v2925_v12 = vpack.c.bf16 %v549_v4, %v545_v3 }
 0x16a   :  { %2696 = vmatpush1.bf16.msra.mxu0 %v2695_v21  ;;  %v2907_v21 = vpack.c.bf16 %v508_v15, %v504_v13  ;;  %v548_v13 = vld [vmem:[#allocation2 + $0xa70] sm:$0xff]  ;;  %v555_v15 = vld [vmem:[#allocation2 + $0xaa8] sm:$0xff] }
 0x16b   :  { %2888 = vmatpush1.bf16.msra.mxu1 %v2887_v23  ;;  %2698 = vmatprep.subr.bf16.mxu0 %v2697_v24  ;;  %v2717_v23 = vpack.c.bf16 %v515_v17, %v511_v16  ;;  %v510_v24 = vld [vmem:[#allocation2 + $0x940] sm:$0xff]  ;;  %v553_v16 = vld [vmem:[#allocation2 + $0xa98] sm:$0xff]  ;;  %v2927_v19 = vpack.c.bf16 %v548_v13, %v544_v10  ;;  %v588_v10 = vld [vmem:[#allocation2 + $0xbb0] sm:$0xff] }
 0x16c   :  { %2890 = vmatprep.subr.bf16.mxu1 %v2889_v29  ;;  %v516_v29 = vld [vmem:[#allocation2 + $0x970] sm:$0xff]  ;;  %v2719_v34 = vpack.c.bf16 %v514_v26, %v510_v24  ;;  %v557_v17 = vld [vmem:[#allocation2 + $0xab8] sm:$0xff]  ;;  %v595_v13 = vld [vmem:[#allocation2 + $0xbe8] sm:$0xff] }
 0x16d   :  { %789 = vmatmul.mubr.f32.vlgmr.msra.gmra.mrb[0].mxu0 %v4111_v22  ;;  %v552_v24 = vld [vmem:[#allocation2 + $0xa90] sm:$0xff]  ;;  %v2929_v26 = vpack.c.bf16 %v557_v17, %v553_v16 }
 0x16e   :  { %2700 = vmatpush1.bf16.msra.mxu0 %v2699_v35  ;;  %1002 = vmatmul.mubr.f32.vlgmr.msra.gmra.mrb[0].mxu1 %v4111_v22  ;;  %v2899_v22 = vpack.c.bf16 %v492_v54, %v488_v25  ;;  %v2911_v35 = vpack.c.bf16 %v516_v29, %v512_v27  ;;  %v532_v25 = vld [vmem:[#allocation2 + $0x9f0] sm:$0xff]  ;;  %v539_v54 = vld [vmem:[#allocation2 + $0xa28] sm:$0xff] }
 0x16f   :  { %2892 = vmatpush1.bf16.msra.mxu1 %v2891_v37  ;;  %2702 = vmatprep.subr.bf16.mxu0 %v2701_v11  ;;  %v2721_v37 = vpack.c.bf16 %v523_v31, %v519_v30  ;;  %v518_v11 = vld [vmem:[#allocation2 + $0x980] sm:$0xff]  ;;  %v2919_v58 = vpack.c.bf16 %v532_v25, %v528_v51  ;;  %v556_v27 = vld [vmem:[#allocation2 + $0xab0] sm:$0xff]  ;;  %v563_v29 = vld [vmem:[#allocation2 + $0xae8] sm:$0xff] }
 0x170   :  { %2894 = vmatprep.subr.bf16.mxu1 %v2893_v41  ;;  %859 = vmatprep.mubr.f32.mxu0 %v646_v45  ;;  %v524_v41 = vld [vmem:[#allocation2 + $0x9b0] sm:$0xff]  ;;  %v2723_v46 = vpack.c.bf16 %v522_v38, %v518_v11  ;;  %v561_v30 = vld [vmem:[#allocation2 + $0xad8] sm:$0xff]  ;;  %v2931_v33 = vpack.c.bf16 %v556_v27, %v552_v24  ;;  %v579_v25 = vld [vmem:[#allocation2 + $0xb68] sm:$0xff] }
 0x171   :  { %1072 = vmatprep.mubr.f32.mxu1 %v646_v45  ;;  %v533_v45 = vld [vmem:[#allocation2 + $0x9f8] sm:$0xff]  ;;  %v2915_v47 = vpack.c.bf16 %v524_v41, %v520_v39  ;;  %v560_v11 = vld [vmem:[#allocation2 + $0xad0] sm:$0xff]  ;;  %v571_v41 = vld [vmem:[#allocation2 + $0xb28] sm:$0xff] }
 0x172   :  { %2704 = vmatpush1.bf16.msra.mxu0 %v2703_v48  ;;  %v2725_v48 = vpack.c.bf16 %v531_v43, %v527_v42  ;;  %v2917_v52 = vpack.c.bf16 %v533_v45, %v529_v44  ;;  %v565_v31 = vld [vmem:[#allocation2 + $0xaf8] sm:$0xff]  ;;  %v564_v39 = vld [vmem:[#allocation2 + $0xaf0] sm:$0xff] }
 0x173   :  { %2896 = vmatpush1.bf16.msra.mxu1 %v2895_v49  ;;  %2706 = vmatprep.subr.bf16.mxu0 %v2705_v50  ;;  %v526_v49 = vld [vmem:[#allocation2 + $0x9c0] sm:$0xff]  ;;  %v2933_v38 = vpack.c.bf16 %v565_v31, %v561_v30  ;;  %v569_v42 = vld [vmem:[#allocation2 + $0xb18] sm:$0xff]  ;;  %v2935_v45 = vpack.c.bf16 %v564_v39, %v560_v11  ;;  %v572_v51 = vld [vmem:[#allocation2 + $0xb30] sm:$0xff] }
 0x174   :  { %2898 = vmatprep.subr.bf16.mxu1 %v2897_v53  ;;  %v530_v50 = vld [vmem:[#allocation2 + $0x9e0] sm:$0xff]  ;;  %v535_v53 = vld [vmem:[#allocation2 + $0xa08] sm:$0xff]  ;;  %v573_v43 = vld [vmem:[#allocation2 + $0xb38] sm:$0xff] }
 0x175   :  { %v2727_v57 = vpack.c.bf16 %v530_v50, %v526_v49  ;;  %v568_v49 = vld [vmem:[#allocation2 + $0xb10] sm:$0xff]  ;;  %v2937_v50 = vpack.c.bf16 %v573_v43, %v569_v42 }
 0x176   :  { %2708 = vmatpush1.bf16.msra.mxu0 %v2707_v59  ;;  %v2729_v59 = vpack.c.bf16 %v539_v54, %v535_v53  ;;  %v577_v53 = vld [vmem:[#allocation2 + $0xb58] sm:$0xff]  ;;  %v2939_v56 = vpack.c.bf16 %v572_v51, %v568_v49  ;;  %v596_v24 = vld [vmem:[#allocation2 + $0xbf0] sm:$0xff] }
 0x177   :  { %2900 = vmatpush1.bf16.msra.mxu1 %v2899_v22  ;;  %2710 = vmatprep.subr.bf16.mxu0 %v2709_v60  ;;  %v534_v22 = vld [vmem:[#allocation2 + $0xa00] sm:$0xff]  ;;  %v581_v54 = vld [vmem:[#allocation2 + $0xb78] sm:$0xff]  ;;  %v1096_v27 = vld [vmem:[#allocation6 + $0x28] sm:$0xff] }
 0x178   :  { %2902 = vmatprep.subr.bf16.mxu1 %v2901_v1  ;;  %v538_v60 = vld [vmem:[#allocation2 + $0xa20] sm:$0xff]  ;;  %v543_v1 = vld [vmem:[#allocation2 + $0xa48] sm:$0xff]  ;;  %v1097_v11 = vld [vmem:[#allocation6 + $0x30] sm:$0xff] }
 0x179   :  { %v2731_v5 = vpack.c.bf16 %v538_v60, %v534_v22  ;;  %v576_v22 = vld [vmem:[#allocation2 + $0xb50] sm:$0xff]  ;;  %v2941_v60 = vpack.c.bf16 %v581_v54, %v577_v53 }
 0x17a   :  { %2712 = vmatpush1.bf16.msra.mxu0 %v2711_v7  ;;  %v2733_v7 = vpack.c.bf16 %v547_v2, %v543_v1  ;;  %v585_v1 = vld [vmem:[#allocation2 + $0xb98] sm:$0xff]  ;;  %v2943_v4 = vpack.c.bf16 %v580_v62, %v576_v22  ;;  %v1104_v39 = vld [vmem:[#allocation6 + $0x68] sm:$0xff] }
 0x17b   :  { %2904 = vmatpush1.bf16.msra.mxu1 %v2903_v8  ;;  %2714 = vmatprep.subr.bf16.mxu0 %v2713_v9  ;;  %v542_v8 = vld [vmem:[#allocation2 + $0xa40] sm:$0xff]  ;;  %v589_v2 = vld [vmem:[#allocation2 + $0xbb8] sm:$0xff]  ;;  %v1112_v51 = vld [vmem:[#allocation6 + $0xa8] sm:$0xff] }
 0x17c   :  { %2906 = vmatprep.subr.bf16.mxu1 %v2905_v14  ;;  %v546_v9 = vld [vmem:[#allocation2 + $0xa60] sm:$0xff]  ;;  %v551_v14 = vld [vmem:[#allocation2 + $0xa88] sm:$0xff]  ;;  %v1105_v49 = vld [vmem:[#allocation6 + $0x70] sm:$0xff] }
 0x17d   :  { %v2735_v18 = vpack.c.bf16 %v546_v9, %v542_v8  ;;  %v584_v8 = vld [vmem:[#allocation2 + $0xb90] sm:$0xff]  ;;  %v2945_v9 = vpack.c.bf16 %v589_v2, %v585_v1 }
 0x17e   :  { %2716 = vmatpush1.bf16.msra.mxu0 %v2715_v20  ;;  %v2737_v20 = vpack.c.bf16 %v555_v15, %v551_v14  ;;  %v593_v14 = vld [vmem:[#allocation2 + $0xbd8] sm:$0xff]  ;;  %v2947_v17 = vpack.c.bf16 %v588_v10, %v584_v8  ;;  %v1120_v62 = vld [vmem:[#allocation6 + $0xe8] sm:$0xff] }
 0x17f   :  { %2908 = vmatpush1.bf16.msra.mxu1 %v2907_v21  ;;  %2718 = vmatprep.subr.bf16.mxu0 %v2717_v23  ;;  %v550_v21 = vld [vmem:[#allocation2 + $0xa80] sm:$0xff]  ;;  %v597_v15 = vld [vmem:[#allocation2 + $0xbf8] sm:$0xff]  ;;  %v1124_v8 = vld [vmem:[#allocation6 + $0x108] sm:$0xff] }
 0x180   :  { %2910 = vmatprep.subr.bf16.mxu1 %v2909_v28  ;;  %v554_v23 = vld [vmem:[#allocation2 + $0xaa0] sm:$0xff]  ;;  %v559_v28 = vld [vmem:[#allocation2 + $0xac8] sm:$0xff]  ;;  %v1113_v22 = vld [vmem:[#allocation6 + $0xb0] sm:$0xff] }
 0x181   :  { %v2739_v32 = vpack.c.bf16 %v554_v23, %v550_v21  ;;  %v592_v21 = vld [vmem:[#allocation2 + $0xbd0] sm:$0xff]  ;;  %v2949_v23 = vpack.c.bf16 %v597_v15, %v593_v14  ;;  %v1126_v10 = vld [vmem:[#allocation6 + $0x118] sm:$0xff] }
 0x182   :  { %2720 = vmatpush1.bf16.msra.mxu0 %v2719_v34  ;;  %v2741_v34 = vpack.c.bf16 %v563_v29, %v559_v28  ;;  %v1094_v28 = vld [vmem:[#allocation6 + $0x18] sm:$0xff]  ;;  %v2951_v31 = vpack.c.bf16 %v596_v24, %v592_v21  ;;  %v1132_v21 = vld [vmem:[#allocation6 + $0x148] sm:$0xff] }
 0x183   :  { %2912 = vmatpush1.bf16.msra.mxu1 %v2911_v35  ;;  %2722 = vmatprep.subr.bf16.mxu0 %v2721_v37  ;;  %v558_v35 = vld [vmem:[#allocation2 + $0xac0] sm:$0xff] }
 0x184   :  { %2914 = vmatprep.subr.bf16.mxu1 %v2913_v40  ;;  %v562_v37 = vld [vmem:[#allocation2 + $0xae0] sm:$0xff]  ;;  %v567_v40 = vld [vmem:[#allocation2 + $0xb08] sm:$0xff] }
 0x185   :  { %v2743_v44 = vpack.c.bf16 %v562_v37, %v558_v35  ;;  %v1098_v29 = vld [vmem:[#allocation6 + $0x38] sm:$0xff]  ;;  %v1093_v35 = vld [vmem:[#allocation6 + $0x10] sm:$0xff] }
 0x186   :  { %2724 = vmatpush1.bf16.msra.mxu0 %v2723_v46  ;;  %v2745_v46 = vpack.c.bf16 %v571_v41, %v567_v40  ;;  %v3081_v37 = vpack.c.bf16 %v1098_v29, %v1094_v28  ;;  %v1102_v40 = vld [vmem:[#allocation6 + $0x58] sm:$0xff]  ;;  %v3083_v43 = vpack.c.bf16 %v1097_v11, %v1093_v35  ;;  %v1140_v35 = vld [vmem:[#allocation6 + $0x188] sm:$0xff] }
 0x187   :  { %2916 = vmatpush1.bf16.msra.mxu1 %v2915_v47  ;;  %2726 = vmatprep.subr.bf16.mxu0 %v2725_v48  ;;  %v566_v47 = vld [vmem:[#allocation2 + $0xb00] sm:$0xff] }
 0x188   :  { %2918 = vmatprep.subr.bf16.mxu1 %v2917_v52  ;;  %v570_v48 = vld [vmem:[#allocation2 + $0xb20] sm:$0xff]  ;;  %v575_v52 = vld [vmem:[#allocation2 + $0xb48] sm:$0xff] }
 0x189   :  { %v2747_v55 = vpack.c.bf16 %v570_v48, %v566_v47  ;;  %v1106_v41 = vld [vmem:[#allocation6 + $0x78] sm:$0xff]  ;;  %v1101_v47 = vld [vmem:[#allocation6 + $0x50] sm:$0xff] }
 0x18a   :  { %2728 = vmatpush1.bf16.msra.mxu0 %v2727_v57  ;;  %v2749_v57 = vpack.c.bf16 %v579_v25, %v575_v52  ;;  %v3085_v48 = vpack.c.bf16 %v1106_v41, %v1102_v40  ;;  %v1110_v52 = vld [vmem:[#allocation6 + $0x98] sm:$0xff]  ;;  %v3087_v54 = vpack.c.bf16 %v1105_v49, %v1101_v47  ;;  %v1148_v47 = vld [vmem:[#allocation6 + $0x1c8] sm:$0xff] }
 0x18b   :  { %2920 = vmatpush1.bf16.msra.mxu1 %v2919_v58  ;;  %2730 = vmatprep.subr.bf16.mxu0 %v2729_v59  ;;  %v574_v58 = vld [vmem:[#allocation2 + $0xb40] sm:$0xff] }
 0x18c   :  { %2922 = vmatprep.subr.bf16.mxu1 %v2921_v63  ;;  %v578_v59 = vld [vmem:[#allocation2 + $0xb60] sm:$0xff]  ;;  %v583_v63 = vld [vmem:[#allocation2 + $0xb88] sm:$0xff] }
 0x18d   :  { %v2751_v3 = vpack.c.bf16 %v578_v59, %v574_v58  ;;  %v1114_v25 = vld [vmem:[#allocation6 + $0xb8] sm:$0xff]  ;;  %v1109_v58 = vld [vmem:[#allocation6 + $0x90] sm:$0xff] }
 0x18e   :  { %2732 = vmatpush1.bf16.msra.mxu0 %v2731_v5  ;;  %v2753_v5 = vpack.c.bf16 %v587_v0, %v583_v63  ;;  %v3089_v59 = vpack.c.bf16 %v1114_v25, %v1110_v52  ;;  %v1118_v63 = vld [vmem:[#allocation6 + $0xd8] sm:$0xff] }
 0x18f   :  { %2924 = vmatpush1.bf16.msra.mxu1 %v2923_v6  ;;  %2734 = vmatprep.subr.bf16.mxu0 %v2733_v7  ;;  %v582_v6 = vld [vmem:[#allocation2 + $0xb80] sm:$0xff] }
 0x190   :  { %2926 = vmatprep.subr.bf16.mxu1 %v2925_v12  ;;  %v586_v7 = vld [vmem:[#allocation2 + $0xba0] sm:$0xff]  ;;  %v591_v12 = vld [vmem:[#allocation2 + $0xbc8] sm:$0xff] }
 0x191   :  { %v2755_v16 = vpack.c.bf16 %v586_v7, %v582_v6  ;;  %v1122_v0 = vld [vmem:[#allocation6 + $0xf8] sm:$0xff]  ;;  %v1121_v7 = vld [vmem:[#allocation6 + $0xf0] sm:$0xff] }
 0x192   :  { %2736 = vmatpush1.bf16.msra.mxu0 %v2735_v18  ;;  %v2757_v18 = vpack.c.bf16 %v595_v13, %v591_v12  ;;  %v3093_v6 = vpack.c.bf16 %v1122_v0, %v1118_v63  ;;  %v1130_v12 = vld [vmem:[#allocation6 + $0x138] sm:$0xff] }
 0x193   :  { %2928 = vmatpush1.bf16.msra.mxu1 %v2927_v19  ;;  %2738 = vmatprep.subr.bf16.mxu0 %v2737_v20  ;;  %v590_v19 = vld [vmem:[#allocation2 + $0xbc0] sm:$0xff] }
 0x194   :  { %2930 = vmatprep.subr.bf16.mxu1 %v2929_v26  ;;  %v594_v20 = vld [vmem:[#allocation2 + $0xbe0] sm:$0xff]  ;;  %v1092_v26 = vld [vmem:[#allocation6 + $0x8] sm:$0xff] }
 0x195   :  { %v2759_v30 = vpack.c.bf16 %v594_v20, %v590_v19  ;;  %v3097_v19 = vpack.c.bf16 %v1130_v12, %v1126_v10  ;;  %v1129_v20 = vld [vmem:[#allocation6 + $0x130] sm:$0xff]  ;;  %v1134_v24 = vld [vmem:[#allocation6 + $0x158] sm:$0xff] }
 0x196   :  { %2740 = vmatpush1.bf16.msra.mxu0 %v2739_v32  ;;  %v2953_v32 = vpack.c.bf16 %v1096_v27, %v1092_v26  ;;  %v1138_v26 = vld [vmem:[#allocation6 + $0x178] sm:$0xff] }
 0x197   :  { %2932 = vmatpush1.bf16.msra.mxu1 %v2931_v33  ;;  %2742 = vmatprep.subr.bf16.mxu0 %v2741_v34  ;;  %v1091_v33 = vld [vmem:[#allocation6] sm:$0xff]  ;;  %v1142_v11 = vld [vmem:[#allocation6 + $0x198] sm:$0xff] }
 0x198   :  { %2934 = vmatprep.subr.bf16.mxu1 %v2933_v38  ;;  %v1095_v34 = vld [vmem:[#allocation6 + $0x20] sm:$0xff]  ;;  %v1100_v38 = vld [vmem:[#allocation6 + $0x48] sm:$0xff]  ;;  %v1150_v49 = vld [vmem:[#allocation6 + $0x1d8] sm:$0xff] }
 0x199   :  { %v2955_v42 = vpack.c.bf16 %v1095_v34, %v1091_v33  ;;  %v3101_v33 = vpack.c.bf16 %v1138_v26, %v1134_v24  ;;  %v1137_v34 = vld [vmem:[#allocation6 + $0x170] sm:$0xff] }
 0x19a   :  { %2744 = vmatpush1.bf16.msra.mxu0 %v2743_v44  ;;  %v2957_v44 = vpack.c.bf16 %v1104_v39, %v1100_v38  ;;  %v1146_v38 = vld [vmem:[#allocation6 + $0x1b8] sm:$0xff] }
 0x19b   :  { %2936 = vmatpush1.bf16.msra.mxu1 %v2935_v45  ;;  %2746 = vmatprep.subr.bf16.mxu0 %v2745_v46  ;;  %v1099_v45 = vld [vmem:[#allocation6 + $0x40] sm:$0xff] }
 0x19c   :  { %2938 = vmatprep.subr.bf16.mxu1 %v2937_v50  ;;  %v1103_v46 = vld [vmem:[#allocation6 + $0x60] sm:$0xff]  ;;  %v1108_v50 = vld [vmem:[#allocation6 + $0x88] sm:$0xff] }
 0x19d   :  { %v2959_v53 = vpack.c.bf16 %v1103_v46, %v1099_v45  ;;  %v3105_v45 = vpack.c.bf16 %v1146_v38, %v1142_v11  ;;  %v1145_v46 = vld [vmem:[#allocation6 + $0x1b0] sm:$0xff] }
 0x19e   :  { %2748 = vmatpush1.bf16.msra.mxu0 %v2747_v55  ;;  %v2961_v55 = vpack.c.bf16 %v1112_v51, %v1108_v50  ;;  %v1154_v50 = vld [vmem:[#allocation6 + $0x1f8] sm:$0xff] }
 0x19f   :  { %2940 = vmatpush1.bf16.msra.mxu1 %v2939_v56  ;;  %2750 = vmatprep.subr.bf16.mxu0 %v2749_v57  ;;  %v1107_v56 = vld [vmem:[#allocation6 + $0x80] sm:$0xff] }
 0x1a0   :  { %2942 = vmatprep.subr.bf16.mxu1 %v2941_v60  ;;  %v1111_v57 = vld [vmem:[#allocation6 + $0xa0] sm:$0xff]  ;;  %v1116_v60 = vld [vmem:[#allocation6 + $0xc8] sm:$0xff] }
 0x1a1   :  { %v2963_v1 = vpack.c.bf16 %v1111_v57, %v1107_v56  ;;  %v2965_v2 = vpack.c.bf16 %v1120_v62, %v1116_v60  ;;  %v3109_v56 = vpack.c.bf16 %v1154_v50, %v1150_v49  ;;  %v1153_v57 = vld [vmem:[#allocation6 + $0x1f0] sm:$0xff]  ;;  %v1162_v60 = vld [vmem:[#allocation6 + $0x238] sm:$0xff] }
 0x1a2   :  { %2752 = vmatpush1.bf16.msra.mxu0 %v2751_v3  ;;  %v1115_v3 = vld [vmem:[#allocation6 + $0xc0] sm:$0xff] }
 0x1a3   :  { %2944 = vmatpush1.bf16.msra.mxu1 %v2943_v4  ;;  %2754 = vmatprep.subr.bf16.mxu0 %v2753_v5  ;;  %v1119_v4 = vld [vmem:[#allocation6 + $0xe0] sm:$0xff]  ;;  %v1117_v5 = vld [vmem:[#allocation6 + $0xd0] sm:$0xff] }
 0x1a4   :  { %2946 = vmatprep.subr.bf16.mxu1 %v2945_v9  ;;  %v1128_v9 = vld [vmem:[#allocation6 + $0x128] sm:$0xff]  ;;  %v2967_v13 = vpack.c.bf16 %v1119_v4, %v1115_v3  ;;  %v3095_v14 = vpack.c.bf16 %v1121_v7, %v1117_v5  ;;  %v1161_v4 = vld [vmem:[#allocation6 + $0x230] sm:$0xff]  ;;  %v1166_v7 = vld [vmem:[#allocation6 + $0x258] sm:$0xff] }
 0x1a5   :  { %v2969_v15 = vpack.c.bf16 %v1128_v9, %v1124_v8  ;;  %v1164_v5 = vld [vmem:[#allocation6 + $0x248] sm:$0xff]  ;;  %v1170_v8 = vld [vmem:[#allocation6 + $0x278] sm:$0xff] }
 0x1a6   :  { %2756 = vmatpush1.bf16.msra.mxu0 %v2755_v16  ;;  %v1123_v16 = vld [vmem:[#allocation6 + $0x100] sm:$0xff] }
 0x1a7   :  { %2948 = vmatpush1.bf16.msra.mxu1 %v2947_v17  ;;  %2758 = vmatprep.subr.bf16.mxu0 %v2757_v18  ;;  %v1127_v17 = vld [vmem:[#allocation6 + $0x120] sm:$0xff]  ;;  %v1125_v18 = vld [vmem:[#allocation6 + $0x110] sm:$0xff] }
 0x1a8   :  { %2950 = vmatprep.subr.bf16.mxu1 %v2949_v23  ;;  %v1136_v23 = vld [vmem:[#allocation6 + $0x168] sm:$0xff]  ;;  %v2971_v27 = vpack.c.bf16 %v1127_v17, %v1123_v16  ;;  %v3099_v28 = vpack.c.bf16 %v1129_v20, %v1125_v18  ;;  %v3117_v16 = vpack.c.bf16 %v1170_v8, %v1166_v7  ;;  %v1169_v17 = vld [vmem:[#allocation6 + $0x270] sm:$0xff]  ;;  %v1174_v20 = vld [vmem:[#allocation6 + $0x298] sm:$0xff] }
 0x1a9   :  { %v2973_v29 = vpack.c.bf16 %v1136_v23, %v1132_v21  ;;  %v1172_v18 = vld [vmem:[#allocation6 + $0x288] sm:$0xff]  ;;  %v1178_v21 = vld [vmem:[#allocation6 + $0x2b8] sm:$0xff] }
 0x1aa   :  { %2760 = vmatpush1.bf16.msra.mxu0 %v2759_v30  ;;  %v1131_v30 = vld [vmem:[#allocation6 + $0x140] sm:$0xff] }
 0x1ab   :  { %2952 = vmatpush1.bf16.msra.mxu1 %v2951_v31  ;;  %2954 = vmatprep.subr.bf16.mxu0 %v2953_v32  ;;  %v1135_v31 = vld [vmem:[#allocation6 + $0x160] sm:$0xff]  ;;  %v1133_v32 = vld [vmem:[#allocation6 + $0x150] sm:$0xff] }
 0x1ac   :  { %3082 = vmatprep.subr.bf16.mxu1 %v3081_v37  ;;  %v1144_v37 = vld [vmem:[#allocation6 + $0x1a8] sm:$0xff]  ;;  %v2975_v39 = vpack.c.bf16 %v1135_v31, %v1131_v30  ;;  %v3103_v40 = vpack.c.bf16 %v1137_v34, %v1133_v32  ;;  %v3121_v30 = vpack.c.bf16 %v1178_v21, %v1174_v20  ;;  %v1177_v31 = vld [vmem:[#allocation6 + $0x2b0] sm:$0xff]  ;;  %v1182_v34 = vld [vmem:[#allocation6 + $0x2d8] sm:$0xff] }
 0x1ad   :  { %860 = vmatmul.mubr.f32.vlgmr.msra.gmra.mrb[0].mxu0 %v4120_v36  ;;  %v2977_v41 = vpack.c.bf16 %v1144_v37, %v1140_v35  ;;  %v1180_v32 = vld [vmem:[#allocation6 + $0x2c8] sm:$0xff]  ;;  %v1186_v35 = vld [vmem:[#allocation6 + $0x2f8] sm:$0xff] }
 0x1ae   :  { %1073 = vmatmul.mubr.f32.vlgmr.msra.gmra.mrb[0].mxu1 %v4120_v36  ;;  %2956 = vmatpush1.bf16.msra.mxu0 %v2955_v42  ;;  %v3091_v36 = vpack.c.bf16 %v1113_v22, %v1109_v58  ;;  %v1139_v42 = vld [vmem:[#allocation6 + $0x180] sm:$0xff]  ;;  %v1156_v58 = vld [vmem:[#allocation6 + $0x208] sm:$0xff]  ;;  %v1158_v22 = vld [vmem:[#allocation6 + $0x218] sm:$0xff] }
 0x1af   :  { %3084 = vmatpush1.bf16.msra.mxu1 %v3083_v43  ;;  %2958 = vmatprep.subr.bf16.mxu0 %v2957_v44  ;;  %v1143_v43 = vld [vmem:[#allocation6 + $0x1a0] sm:$0xff]  ;;  %v1141_v44 = vld [vmem:[#allocation6 + $0x190] sm:$0xff]  ;;  %v3113_v3 = vpack.c.bf16 %v1162_v60, %v1158_v22  ;;  %v1218_v21 = vld [vmem:[#allocation6 + $0x3f8] sm:$0xff] }
 0x1b0   :  { %3086 = vmatprep.subr.bf16.mxu1 %v3085_v48  ;;  %v1152_v48 = vld [vmem:[#allocation6 + $0x1e8] sm:$0xff]  ;;  %v2979_v51 = vpack.c.bf16 %v1143_v43, %v1139_v42  ;;  %v3107_v52 = vpack.c.bf16 %v1145_v46, %v1141_v44  ;;  %v3125_v42 = vpack.c.bf16 %v1186_v35, %v1182_v34  ;;  %v1185_v43 = vld [vmem:[#allocation6 + $0x2f0] sm:$0xff]  ;;  %v1190_v46 = vld [vmem:[#allocation6 + $0x318] sm:$0xff] }
 0x1b1   :  { %v2981_v25 = vpack.c.bf16 %v1152_v48, %v1148_v47  ;;  %v1188_v44 = vld [vmem:[#allocation6 + $0x308] sm:$0xff]  ;;  %v1194_v47 = vld [vmem:[#allocation6 + $0x338] sm:$0xff] }
 0x1b2   :  { %2960 = vmatpush1.bf16.msra.mxu0 %v2959_v53  ;;  %v1147_v53 = vld [vmem:[#allocation6 + $0x1c0] sm:$0xff]  ;;  %v1226_v35 = vld [vmem:[#allocation6 + $0x438] sm:$0xff] }
 0x1b3   :  { %3088 = vmatpush1.bf16.msra.mxu1 %v3087_v54  ;;  %2962 = vmatprep.subr.bf16.mxu0 %v2961_v55  ;;  %v1151_v54 = vld [vmem:[#allocation6 + $0x1e0] sm:$0xff]  ;;  %v1149_v55 = vld [vmem:[#allocation6 + $0x1d0] sm:$0xff] }
 0x1b4   :  { %3090 = vmatprep.subr.bf16.mxu1 %v3089_v59  ;;  %v1160_v59 = vld [vmem:[#allocation6 + $0x228] sm:$0xff]  ;;  %v2983_v62 = vpack.c.bf16 %v1151_v54, %v1147_v53  ;;  %v3111_v63 = vpack.c.bf16 %v1153_v57, %v1149_v55  ;;  %v3129_v53 = vpack.c.bf16 %v1194_v47, %v1190_v46  ;;  %v1193_v54 = vld [vmem:[#allocation6 + $0x330] sm:$0xff]  ;;  %v1198_v57 = vld [vmem:[#allocation6 + $0x358] sm:$0xff] }
 0x1b5   :  { %v2985_v0 = vpack.c.bf16 %v1160_v59, %v1156_v58  ;;  %v1196_v55 = vld [vmem:[#allocation6 + $0x348] sm:$0xff]  ;;  %v1202_v58 = vld [vmem:[#allocation6 + $0x378] sm:$0xff] }
 0x1b6   :  { %2964 = vmatpush1.bf16.msra.mxu0 %v2963_v1  ;;  %v1155_v1 = vld [vmem:[#allocation6 + $0x200] sm:$0xff] }
 0x1b7   :  { %3092 = vmatpush1.bf16.msra.mxu1 %v3091_v36  ;;  %2966 = vmatprep.subr.bf16.mxu0 %v2965_v2  ;;  %v1159_v36 = vld [vmem:[#allocation6 + $0x220] sm:$0xff]  ;;  %v1157_v2 = vld [vmem:[#allocation6 + $0x210] sm:$0xff] }
 0x1b8   :  { %3094 = vmatprep.subr.bf16.mxu1 %v3093_v6  ;;  %v1168_v6 = vld [vmem:[#allocation6 + $0x268] sm:$0xff]  ;;  %v2987_v9 = vpack.c.bf16 %v1159_v36, %v1155_v1  ;;  %v3115_v10 = vpack.c.bf16 %v1161_v4, %v1157_v2  ;;  %v3133_v1 = vpack.c.bf16 %v1202_v58, %v1198_v57  ;;  %v1201_v36 = vld [vmem:[#allocation6 + $0x370] sm:$0xff]  ;;  %v1206_v4 = vld [vmem:[#allocation6 + $0x398] sm:$0xff] }
 0x1b9   :  { %v2989_v12 = vpack.c.bf16 %v1168_v6, %v1164_v5  ;;  %v1204_v2 = vld [vmem:[#allocation6 + $0x388] sm:$0xff]  ;;  %v1210_v5 = vld [vmem:[#allocation6 + $0x3b8] sm:$0xff] }
 0x1ba   :  { %2968 = vmatpush1.bf16.msra.mxu0 %v2967_v13  ;;  %v1163_v13 = vld [vmem:[#allocation6 + $0x240] sm:$0xff]  ;;  %v1230_v58 = vld [vmem:[#allocation6 + $0x458] sm:$0xff] }
 0x1bb   :  { %3096 = vmatpush1.bf16.msra.mxu1 %v3095_v14  ;;  %2970 = vmatprep.subr.bf16.mxu0 %v2969_v15  ;;  %v1167_v14 = vld [vmem:[#allocation6 + $0x260] sm:$0xff]  ;;  %v1165_v15 = vld [vmem:[#allocation6 + $0x250] sm:$0xff] }
 0x1bc   :  { %3098 = vmatprep.subr.bf16.mxu1 %v3097_v19  ;;  %v1176_v19 = vld [vmem:[#allocation6 + $0x2a8] sm:$0xff]  ;;  %v2991_v23 = vpack.c.bf16 %v1167_v14, %v1163_v13  ;;  %v3119_v24 = vpack.c.bf16 %v1169_v17, %v1165_v15  ;;  %v1205_v13 = vld [vmem:[#allocation6 + $0x390] sm:$0xff] }
 0x1bd   :  { %v2993_v26 = vpack.c.bf16 %v1176_v19, %v1172_v18  ;;  %v1209_v15 = vld [vmem:[#allocation6 + $0x3b0] sm:$0xff]  ;;  %v1212_v17 = vld [vmem:[#allocation6 + $0x3c8] sm:$0xff]  ;;  %v1214_v19 = vld [vmem:[#allocation6 + $0x3d8] sm:$0xff] }
 0x1be   :  { %2972 = vmatpush1.bf16.msra.mxu0 %v2971_v27  ;;  %v1171_v27 = vld [vmem:[#allocation6 + $0x280] sm:$0xff]  ;;  %v1216_v18 = vld [vmem:[#allocation6 + $0x3e8] sm:$0xff] }
 0x1bf   :  { %3100 = vmatpush1.bf16.msra.mxu1 %v3099_v28  ;;  %2974 = vmatprep.subr.bf16.mxu0 %v2973_v29  ;;  %v1175_v28 = vld [vmem:[#allocation6 + $0x2a0] sm:$0xff]  ;;  %v1173_v29 = vld [vmem:[#allocation6 + $0x290] sm:$0xff]  ;;  %v3013_v20 = vpack.c.bf16 %v1216_v18, %v1212_v17 }
 0x1c0   :  { %3102 = vmatprep.subr.bf16.mxu1 %v3101_v33  ;;  %v1184_v33 = vld [vmem:[#allocation6 + $0x2e8] sm:$0xff]  ;;  %v2995_v37 = vpack.c.bf16 %v1175_v28, %v1171_v27  ;;  %v3123_v11 = vpack.c.bf16 %v1177_v31, %v1173_v29  ;;  %v1213_v28 = vld [vmem:[#allocation6 + $0x3d0] sm:$0xff] }
 0x1c1   :  { %v2997_v38 = vpack.c.bf16 %v1184_v33, %v1180_v32  ;;  %v1217_v29 = vld [vmem:[#allocation6 + $0x3f0] sm:$0xff]  ;;  %v1220_v31 = vld [vmem:[#allocation6 + $0x408] sm:$0xff]  ;;  %v1222_v33 = vld [vmem:[#allocation6 + $0x418] sm:$0xff] }
 0x1c2   :  { %2976 = vmatpush1.bf16.msra.mxu0 %v2975_v39  ;;  %v1179_v39 = vld [vmem:[#allocation6 + $0x2c0] sm:$0xff]  ;;  %v1224_v32 = vld [vmem:[#allocation6 + $0x428] sm:$0xff]  ;;  %v1237_v18 = vld [vmem:[#allocation6 + $0x490] sm:$0xff] }
 0x1c3   :  { %3104 = vmatpush1.bf16.msra.mxu1 %v3103_v40  ;;  %2978 = vmatprep.subr.bf16.mxu0 %v2977_v41  ;;  %v1183_v40 = vld [vmem:[#allocation6 + $0x2e0] sm:$0xff]  ;;  %v1181_v41 = vld [vmem:[#allocation6 + $0x2d0] sm:$0xff]  ;;  %v3017_v34 = vpack.c.bf16 %v1224_v32, %v1220_v31 }
 0x1c4   :  { %3106 = vmatprep.subr.bf16.mxu1 %v3105_v45  ;;  %v1192_v45 = vld [vmem:[#allocation6 + $0x328] sm:$0xff]  ;;  %v2999_v48 = vpack.c.bf16 %v1183_v40, %v1179_v39  ;;  %v3127_v49 = vpack.c.bf16 %v1185_v43, %v1181_v41  ;;  %v4134_v39 = vsub.s32 1, %v4092_v61  ;;  %v614_v40 = vsub.s32 3, %v4092_v61  ;;  %v1245_v32 = vld [vmem:[#allocation6 + $0x4d0] sm:$0xff] }
 0x1c5   :  { %v3001_v50 = vpack.c.bf16 %v1192_v45, %v1188_v44 }
 0x1c6   :  { %2980 = vmatpush1.bf16.msra.mxu0 %v2979_v51  ;;  %v1187_v51 = vld [vmem:[#allocation6 + $0x300] sm:$0xff] }
 0x1c7   :  { %3108 = vmatpush1.bf16.msra.mxu1 %v3107_v52  ;;  %2982 = vmatprep.subr.bf16.mxu0 %v2981_v25  ;;  %v1191_v52 = vld [vmem:[#allocation6 + $0x320] sm:$0xff]  ;;  %v1189_v25 = vld [vmem:[#allocation6 + $0x310] sm:$0xff] }
 0x1c8   :  { %3110 = vmatprep.subr.bf16.mxu1 %v3109_v56  ;;  %v1200_v56 = vld [vmem:[#allocation6 + $0x368] sm:$0xff]  ;;  %v3003_v59 = vpack.c.bf16 %v1191_v52, %v1187_v51  ;;  %v3131_v22 = vpack.c.bf16 %v1193_v54, %v1189_v25  ;;  %v1223_v51 = vld [vmem:[#allocation6 + $0x420] sm:$0xff]  ;;  %v1221_v52 = vld [vmem:[#allocation6 + $0x410] sm:$0xff] }
 0x1c9   :  { %v3005_v60 = vpack.c.bf16 %v1200_v56, %v1196_v55  ;;  %v1225_v25 = vld [vmem:[#allocation6 + $0x430] sm:$0xff]  ;;  %v1228_v55 = vld [vmem:[#allocation6 + $0x448] sm:$0xff] }
 0x1ca   :  { %2984 = vmatpush1.bf16.msra.mxu0 %v2983_v62  ;;  %v1195_v62 = vld [vmem:[#allocation6 + $0x340] sm:$0xff]  ;;  %v1232_v56 = vld [vmem:[#allocation6 + $0x468] sm:$0xff] }
 0x1cb   :  { %3112 = vmatpush1.bf16.msra.mxu1 %v3111_v63  ;;  %2986 = vmatprep.subr.bf16.mxu0 %v2985_v0  ;;  %v1199_v63 = vld [vmem:[#allocation6 + $0x360] sm:$0xff]  ;;  %v1197_v0 = vld [vmem:[#allocation6 + $0x350] sm:$0xff] }
 0x1cc   :  { %3114 = vmatprep.subr.bf16.mxu1 %v3113_v3  ;;  %v1208_v3 = vld [vmem:[#allocation6 + $0x3a8] sm:$0xff]  ;;  %v3007_v6 = vpack.c.bf16 %v1199_v63, %v1195_v62  ;;  %v3135_v7 = vpack.c.bf16 %v1201_v36, %v1197_v0  ;;  %v3147_v62 = vpack.c.bf16 %v1225_v25, %v1221_v52  ;;  %v1227_v63 = vld [vmem:[#allocation6 + $0x440] sm:$0xff]  ;;  %v1229_v36 = vld [vmem:[#allocation6 + $0x450] sm:$0xff] }
 0x1cd   :  { %v3009_v8 = vpack.c.bf16 %v1208_v3, %v1204_v2  ;;  %v1231_v0 = vld [vmem:[#allocation6 + $0x460] sm:$0xff]  ;;  %v1233_v2 = vld [vmem:[#allocation6 + $0x470] sm:$0xff]  ;;  %v1236_v3 = vld [vmem:[#allocation6 + $0x488] sm:$0xff] }
 0x1ce   :  { %2988 = vmatpush1.bf16.msra.mxu0 %v2987_v9  ;;  %v3137_v9 = vpack.c.bf16 %v1210_v5, %v1206_v4  ;;  %v3021_v5 = vpack.c.bf16 %v1232_v56, %v1228_v55  ;;  %v1264_v52 = vld [vmem:[#allocation6 + $0x568] sm:$0xff]  ;;  %v1262_v25 = vld [vmem:[#allocation6 + $0x558] sm:$0xff]  ;;  %v1259_v56 = vld [vmem:[#allocation6 + $0x540] sm:$0xff] }
 0x1cf   :  { %3116 = vmatpush1.bf16.msra.mxu1 %v3115_v10  ;;  %2990 = vmatprep.subr.bf16.mxu0 %v2989_v12  ;;  %v1203_v10 = vld [vmem:[#allocation6 + $0x380] sm:$0xff] }
 0x1d0   :  { %3118 = vmatprep.subr.bf16.mxu1 %v3117_v16  ;;  %v1207_v12 = vld [vmem:[#allocation6 + $0x3a0] sm:$0xff]  ;;  %v3139_v16 = vpack.c.bf16 %v1209_v15, %v1205_v13  ;;  %v3151_v13 = vpack.c.bf16 %v1233_v2, %v1229_v36 }
 0x1d1   :  { %v3011_v14 = vpack.c.bf16 %v1207_v12, %v1203_v10  ;;  %v3023_v12 = vpack.c.bf16 %v1231_v0, %v1227_v63  ;;  %v1239_v15 = vld [vmem:[#allocation6 + $0x4a0] sm:$0xff]  ;;  %v1272_v63 = vld [vmem:[#allocation6 + $0x5a8] sm:$0xff]  ;;  %v1270_v0 = vld [vmem:[#allocation6 + $0x598] sm:$0xff] }
 0x1d2   :  { %2992 = vmatpush1.bf16.msra.mxu0 %v2991_v23  ;;  %v1211_v23 = vld [vmem:[#allocation6 + $0x3c0] sm:$0xff] }
 0x1d3   :  { %3120 = vmatpush1.bf16.msra.mxu1 %v3119_v24  ;;  %2994 = vmatprep.subr.bf16.mxu0 %v2993_v26  ;;  %v1215_v24 = vld [vmem:[#allocation6 + $0x3e0] sm:$0xff]  ;;  %v3141_v26 = vpack.c.bf16 %v1218_v21, %v1214_v19  ;;  %v1241_v19 = vld [vmem:[#allocation6 + $0x4b0] sm:$0xff]  ;;  %v1248_v21 = vld [vmem:[#allocation6 + $0x4e8] sm:$0xff] }
 0x1d4   :  { %3122 = vmatprep.subr.bf16.mxu1 %v3121_v30  ;;  %v3015_v27 = vpack.c.bf16 %v1215_v24, %v1211_v23  ;;  %v3143_v30 = vpack.c.bf16 %v1217_v29, %v1213_v28  ;;  %v1246_v23 = vld [vmem:[#allocation6 + $0x4d8] sm:$0xff]  ;;  %v1243_v28 = vld [vmem:[#allocation6 + $0x4c0] sm:$0xff] }
 0x1d5   :  { %v1250_v24 = vld [vmem:[#allocation6 + $0x4f8] sm:$0xff]  ;;  %v1247_v29 = vld [vmem:[#allocation6 + $0x4e0] sm:$0xff] }
 0x1d6   :  { %2996 = vmatpush1.bf16.msra.mxu0 %v2995_v37  ;;  %v3145_v37 = vpack.c.bf16 %v1226_v35, %v1222_v33  ;;  %v3157_v31 = vpack.c.bf16 %v1250_v24, %v1246_v23  ;;  %v1249_v33 = vld [vmem:[#allocation6 + $0x4f0] sm:$0xff]  ;;  %v1256_v35 = vld [vmem:[#allocation6 + $0x528] sm:$0xff] }
 0x1d7   :  { %3124 = vmatpush1.bf16.msra.mxu1 %v3123_v11  ;;  %2998 = vmatprep.subr.bf16.mxu0 %v2997_v38  ;;  %v4129_v11 = vsub.s32 0, %v4092_v61  ;;  %v4131_v38 = vld [vmem:[#allocation4] sm:$0xf]  ;;  %v1284_v23 = vld [vmem:[#allocation6 + $0x608] sm:$0xff] }
 0x1d8   :  { %3126 = vmatprep.subr.bf16.mxu1 %v3125_v42  ;;  %v607_v42 = vrot.slane %v4131_v38, %v4134_v39  ;;  %v615_v43 = vrot.slane %v4131_v38, %v614_v40  ;;  %v1288_v24 = vld [vmem:[#allocation6 + $0x628] sm:$0xff] }
 0x1d9   :  { %v603_v41 = vrot.slane %v4131_v38, %v4129_v11 }
 0x1da   :  { %3000 = vmatpush1.bf16.msra.mxu0 %v2999_v48  ;;  %v1219_v48 = vld [vmem:[#allocation6 + $0x400] sm:$0xff] }
 0x1db   :  { %3128 = vmatpush1.bf16.msra.mxu1 %v3127_v49  ;;  %3002 = vmatprep.subr.bf16.mxu0 %v3001_v50 }
 0x1dc   :  { %3130 = vmatprep.subr.bf16.mxu1 %v3129_v53 }
 0x1de   :  { %3004 = vmatpush1.bf16.msra.mxu0 %v3003_v59  ;;  %v1234_v59 = vld [vmem:[#allocation6 + $0x478] sm:$0xff] }
 0x1df   :  { %3132 = vmatpush1.bf16.msra.mxu1 %v3131_v22  ;;  %3006 = vmatprep.subr.bf16.mxu0 %v3005_v60  ;;  %v3019_v60 = vpack.c.bf16 %v1223_v51, %v1219_v48  ;;  %v1260_v51 = vld [vmem:[#allocation6 + $0x548] sm:$0xff] }
 0x1e0   :  { %3134 = vmatprep.subr.bf16.mxu1 %v3133_v1 }
 0x1e2   :  { %3008 = vmatpush1.bf16.msra.mxu0 %v3007_v6  ;;  %v3149_v6 = vpack.c.bf16 %v1234_v59, %v1230_v58  ;;  %v3037_v58 = vpack.c.bf16 %v1264_v52, %v1260_v51  ;;  %v1293_v51 = vld [vmem:[#allocation6 + $0x650] sm:$0xff] }
 0x1e3   :  { %3136 = vmatpush1.bf16.msra.mxu1 %v3135_v7  ;;  %3010 = vmatprep.subr.bf16.mxu0 %v3009_v8  ;;  %v1240_v7 = vld [vmem:[#allocation6 + $0x4a8] sm:$0xff]  ;;  %v1238_v8 = vld [vmem:[#allocation6 + $0x498] sm:$0xff]  ;;  %v1297_v52 = vld [vmem:[#allocation6 + $0x670] sm:$0xff] }
 0x1e4   :  { %3138 = vmatprep.subr.bf16.mxu1 %v3137_v9  ;;  %v1242_v9 = vld [vmem:[#allocation6 + $0x4b8] sm:$0xff] }
 0x1e5   :  { %v3153_v17 = vpack.c.bf16 %v1242_v9, %v1238_v8  ;;  %v1273_v8 = vld [vmem:[#allocation6 + $0x5b0] sm:$0xff]  ;;  %v1276_v9 = vld [vmem:[#allocation6 + $0x5c8] sm:$0xff] }
 0x1e6   :  { %3012 = vmatpush1.bf16.msra.mxu0 %v3011_v14  ;;  %v1235_v14 = vld [vmem:[#allocation6 + $0x480] sm:$0xff] }
 0x1e7   :  { %3140 = vmatpush1.bf16.msra.mxu1 %v3139_v16  ;;  %3014 = vmatprep.subr.bf16.mxu0 %v3013_v20  ;;  %v3025_v16 = vpack.c.bf16 %v1240_v7, %v1236_v3  ;;  %v1244_v20 = vld [vmem:[#allocation6 + $0x4c8] sm:$0xff]  ;;  %v1267_v3 = vld [vmem:[#allocation6 + $0x580] sm:$0xff]  ;;  %v1269_v7 = vld [vmem:[#allocation6 + $0x590] sm:$0xff] }
 0x1e8   :  { %3142 = vmatprep.subr.bf16.mxu1 %v3141_v26  ;;  %v3027_v26 = vpack.c.bf16 %v1239_v15, %v1235_v14  ;;  %v3171_v15 = vpack.c.bf16 %v1273_v8, %v1269_v7 }
 0x1ea   :  { %3016 = vmatpush1.bf16.msra.mxu0 %v3015_v27  ;;  %v3155_v27 = vpack.c.bf16 %v1241_v19, %v1237_v18 }
 0x1eb   :  { %3144 = vmatpush1.bf16.msra.mxu1 %v3143_v30  ;;  %3018 = vmatprep.subr.bf16.mxu0 %v3017_v34  ;;  %v3029_v30 = vpack.c.bf16 %v1248_v21, %v1244_v20  ;;  %v1252_v34 = vld [vmem:[#allocation6 + $0x508] sm:$0xff]  ;;  %v1277_v20 = vld [vmem:[#allocation6 + $0x5d0] sm:$0xff] }
 0x1ec   :  { %3146 = vmatprep.subr.bf16.mxu1 %v3145_v37  ;;  %v1254_v37 = vld [vmem:[#allocation6 + $0x518] sm:$0xff]  ;;  %v1281_v21 = vld [vmem:[#allocation6 + $0x5f0] sm:$0xff] }
 0x280   :  { %v861_v44 = vpop.f32.mrb[0].mxu0 }
 0x281   :  { %v3481_v45 = vadd.f32 %v861_v44, %v603_v41  ;;  %v4144_v46 = vpop.f32.mrb[0].mxu1  ;;  %v863_v47 = vpop.f32.mrb[1].mxu0  ;;  %v1258_v41 = vld [vmem:[#allocation6 + $0x538] sm:$0xff]  ;;  %v1251_v44 = vld [vmem:[#allocation6 + $0x500] sm:$0xff] }
 0x282   :  { %v3482_v49 = vadd.f32 %v863_v47, %v607_v42  ;;  %v1076_v50 = vpop.f32.mrb[1].mxu1  ;;  %v3031_v42 = vpack.c.bf16 %v1247_v29, %v1243_v28  ;;  %v3033_v47 = vpack.c.bf16 %v1256_v35, %v1252_v34  ;;  %v3161_v48 = vpack.c.bf16 %v1258_v41, %v1254_v37  ;;  %v1285_v34 = vld [vmem:[#allocation6 + $0x610] sm:$0xff]  ;;  %v1292_v37 = vld [vmem:[#allocation6 + $0x648] sm:$0xff] }
 0x283   :  { %v1083_v53 = vmul.f32 0.01, %v3481_v45  ;;  %v3484_v54 = vadd.f32 %v1076_v50, %v615_v43  ;;  %vm1079_vm0 = vcmp.ge.f32.partialorder %v3481_v45, 0.0  ;;  %v3159_v43 = vpack.c.bf16 %v1249_v33, %v1245_v32  ;;  %v1257_v50 = vld [vmem:[#allocation6 + $0x530] sm:$0xff]  ;;  %v1296_v41 = vld [vmem:[#allocation6 + $0x668] sm:$0xff] }
 0x284   :  { %v1084_v57 = vmul.f32 0.01, %v3482_v49  ;;  %vm1080_vm1 = vcmp.ge.f32.partialorder %v3482_v49, 0.0  ;;  %v3175_v29 = vpack.c.bf16 %v1281_v21, %v1277_v20  ;;  %v3049_v32 = vpack.c.bf16 %v1288_v24, %v1284_v23  ;;  %v1289_v35 = vld [vmem:[#allocation6 + $0x630] sm:$0xff] }
 0x285   :  { %v1086_v22 = vmul.f32 0.01, %v3484_v54  ;;  %vm1082_vm2 = vcmp.ge.f32.partialorder %v3484_v54, 0.0  ;;  %v1087_v4 = vsel %vm1079_vm0, %v3481_v45, %v1083_v53  ;;  %v1255_v45 = vld [vmem:[#allocation6 + $0x520] sm:$0xff]  ;;  %v1266_v53 = vld [vmem:[#allocation6 + $0x578] sm:$0xff]  ;;  %v1317_v23 = vld [vmem:[#allocation6 + $0x710] sm:$0xff] }
 0x286   :  { %v1088_v1 = vsel %vm1080_vm1, %v3482_v49, %v1084_v57  ;;  %v1253_v49 = vld [vmem:[#allocation6 + $0x510] sm:$0xff]  ;;  %v1263_v57 = vld [vmem:[#allocation6 + $0x560] sm:$0xff]  ;;  %v3165_v59 = vpack.c.bf16 %v1266_v53, %v1262_v25  ;;  %v1300_v25 = vld [vmem:[#allocation6 + $0x688] sm:$0xff] }
 0x287   :  { %1433 = vmatprep.mubr.f32.mxu0 %v1088_v1  ;;  %1575 = vmatprep.mubr.f32.mxu1 %v1088_v1  ;;  %v1090_v10 = vsel %vm1082_vm2, %v3484_v54, %v1086_v22  ;;  %v3035_v54 = vpack.c.bf16 %v1255_v45, %v1251_v44  ;;  %v3163_v55 = vpack.c.bf16 %v1257_v50, %v1253_v49  ;;  %v1261_v22 = vld [vmem:[#allocation6 + $0x550] sm:$0xff]  ;;  %v1274_v1 = vld [vmem:[#allocation6 + $0x5b8] sm:$0xff]  ;;  %v1304_v53 = vld [vmem:[#allocation6 + $0x6a8] sm:$0xff] }
 0x288   :  { %1434 = vmatmul.mubr.f32.vlgmr.msra.gmra.mrb[2].mxu0 %v1087_v4  ;;  %1576 = vmatmul.mubr.f32.vlgmr.msra.gmra.mrb[2].mxu1 %v1087_v4  ;;  %v3039_v36 = vpack.c.bf16 %v1263_v57, %v1259_v56  ;;  %v1271_v4 = vld [vmem:[#allocation6 + $0x5a0] sm:$0xff]  ;;  %v3179_v45 = vpack.c.bf16 %v1289_v35, %v1285_v34  ;;  %v3053_v49 = vpack.c.bf16 %v1296_v41, %v1292_v37  ;;  %v1321_v24 = vld [vmem:[#allocation6 + $0x730] sm:$0xff] }
 0x289   :  { %3020 = vmatpush1.bf16.msra.mxu0 %v3019_v60  ;;  %3148 = vmatpush1.bf16.msra.mxu1 %v3147_v62  ;;  %v1265_v60 = vld [vmem:[#allocation6 + $0x570] sm:$0xff]  ;;  %v1268_v62 = vld [vmem:[#allocation6 + $0x588] sm:$0xff]  ;;  %v3043_v14 = vpack.c.bf16 %v1271_v4, %v1267_v3  ;;  %v3183_v57 = vpack.c.bf16 %v1297_v52, %v1293_v51  ;;  %v1335_v51 = vld [vmem:[#allocation6 + $0x7a0] sm:$0xff] }
 0x28a   :  { %1504 = vmatprep.mubr.f32.mxu0 %v1090_v10  ;;  %1646 = vmatprep.mubr.f32.mxu1 %v1090_v10  ;;  %v3167_v2 = vpack.c.bf16 %v1265_v60, %v1261_v22  ;;  %v1280_v10 = vld [vmem:[#allocation6 + $0x5e8] sm:$0xff]  ;;  %v3057_v22 = vpack.c.bf16 %v1304_v53, %v1300_v25  ;;  %v1325_v37 = vld [vmem:[#allocation6 + $0x750] sm:$0xff] }
 0x28b   :  { %3022 = vmatprep.subr.bf16.mxu0 %v3021_v5  ;;  %3150 = vmatprep.subr.bf16.mxu1 %v3149_v6  ;;  %v3041_v5 = vpack.c.bf16 %v1272_v63, %v1268_v62  ;;  %v3169_v6 = vpack.c.bf16 %v1274_v1, %v1270_v0  ;;  %v3045_v18 = vpack.c.bf16 %v1280_v10, %v1276_v9  ;;  %v1301_v62 = vld [vmem:[#allocation6 + $0x690] sm:$0xff]  ;;  %v1308_v0 = vld [vmem:[#allocation6 + $0x6c8] sm:$0xff] }
 0x28c   :  { %v1305_v63 = vld [vmem:[#allocation6 + $0x6b0] sm:$0xff]  ;;  %v1312_v1 = vld [vmem:[#allocation6 + $0x6e8] sm:$0xff] }
 0x28d   :  { %3024 = vmatpush1.bf16.msra.mxu0 %v3023_v12  ;;  %3152 = vmatpush1.bf16.msra.mxu1 %v3151_v13  ;;  %v1278_v12 = vld [vmem:[#allocation6 + $0x5d8] sm:$0xff]  ;;  %v3187_v4 = vpack.c.bf16 %v1305_v63, %v1301_v62  ;;  %v3061_v7 = vpack.c.bf16 %v1312_v1, %v1308_v0  ;;  %v1309_v9 = vld [vmem:[#allocation6 + $0x6d0] sm:$0xff]  ;;  %v1339_v62 = vld [vmem:[#allocation6 + $0x7c0] sm:$0xff] }
 0x28e   :  { %3026 = vmatprep.subr.bf16.mxu0 %v3025_v16  ;;  %3154 = vmatprep.subr.bf16.mxu1 %v3153_v17  ;;  %v1282_v13 = vld [vmem:[#allocation6 + $0x5f8] sm:$0xff]  ;;  %v1275_v16 = vld [vmem:[#allocation6 + $0x5c0] sm:$0xff]  ;;  %v1313_v10 = vld [vmem:[#allocation6 + $0x6f0] sm:$0xff] }
 0x28f   :  { %v1279_v17 = vld [vmem:[#allocation6 + $0x5e0] sm:$0xff]  ;;  %v3173_v19 = vpack.c.bf16 %v1282_v13, %v1278_v12  ;;  %v1316_v12 = vld [vmem:[#allocation6 + $0x708] sm:$0xff]  ;;  %v1329_v41 = vld [vmem:[#allocation6 + $0x770] sm:$0xff] }
 0x290   :  { %v3047_v28 = vpack.c.bf16 %v1279_v17, %v1275_v16  ;;  %v1320_v13 = vld [vmem:[#allocation6 + $0x728] sm:$0xff]  ;;  %v3191_v17 = vpack.c.bf16 %v1313_v10, %v1309_v9  ;;  %v1333_v53 = vld [vmem:[#allocation6 + $0x790] sm:$0xff]  ;;  %v1343_v1 = vld [vmem:[#allocation6 + $0x7e0] sm:$0xff] }
 0x291   :  { %3028 = vmatpush1.bf16.msra.mxu0 %v3027_v26  ;;  %3156 = vmatpush1.bf16.msra.mxu1 %v3155_v27  ;;  %v1286_v26 = vld [vmem:[#allocation6 + $0x618] sm:$0xff]  ;;  %v3065_v20 = vpack.c.bf16 %v1320_v13, %v1316_v12  ;;  %v1670_v12 = vld [vmem:[#allocation9 + $0x28] sm:$0xff] }
 0x292   :  { %3030 = vmatprep.subr.bf16.mxu0 %v3029_v30  ;;  %3158 = vmatprep.subr.bf16.mxu1 %v3157_v31  ;;  %v1290_v27 = vld [vmem:[#allocation6 + $0x638] sm:$0xff]  ;;  %v1283_v30 = vld [vmem:[#allocation6 + $0x600] sm:$0xff] }
 0x293   :  { %v1287_v31 = vld [vmem:[#allocation6 + $0x620] sm:$0xff]  ;;  %v3177_v33 = vpack.c.bf16 %v1290_v27, %v1286_v26  ;;  %v1324_v26 = vld [vmem:[#allocation6 + $0x748] sm:$0xff]  ;;  %v1667_v9 = vld [vmem:[#allocation9 + $0x10] sm:$0xff] }
 0x294   :  { %v3051_v44 = vpack.c.bf16 %v1287_v31, %v1283_v30  ;;  %v1328_v27 = vld [vmem:[#allocation6 + $0x768] sm:$0xff]  ;;  %v3195_v31 = vpack.c.bf16 %v1321_v24, %v1317_v23  ;;  %v1672_v13 = vld [vmem:[#allocation9 + $0x38] sm:$0xff]  ;;  %v1675_v24 = vld [vmem:[#allocation9 + $0x50] sm:$0xff] }
 0x295   :  { %3032 = vmatpush1.bf16.msra.mxu0 %v3031_v42  ;;  %3160 = vmatpush1.bf16.msra.mxu1 %v3159_v43  ;;  %v1294_v42 = vld [vmem:[#allocation6 + $0x658] sm:$0xff]  ;;  %v3069_v34 = vpack.c.bf16 %v1328_v27, %v1324_v26  ;;  %v1673_v23 = vld [vmem:[#allocation9 + $0x40] sm:$0xff]  ;;  %v1678_v26 = vld [vmem:[#allocation9 + $0x68] sm:$0xff] }
 0x296   :  { %3034 = vmatprep.subr.bf16.mxu0 %v3033_v47  ;;  %3162 = vmatprep.subr.bf16.mxu1 %v3161_v48  ;;  %v1298_v43 = vld [vmem:[#allocation6 + $0x678] sm:$0xff]  ;;  %v1291_v47 = vld [vmem:[#allocation6 + $0x640] sm:$0xff] }
 0x297   :  { %v1295_v48 = vld [vmem:[#allocation6 + $0x660] sm:$0xff]  ;;  %v3181_v50 = vpack.c.bf16 %v1298_v43, %v1294_v42  ;;  %v1332_v42 = vld [vmem:[#allocation6 + $0x788] sm:$0xff]  ;;  %v610_v43 = vsub.s32 2, %v4092_v61 }
 0x298   :  { %v3055_v56 = vpack.c.bf16 %v1295_v48, %v1291_v47  ;;  %v1338_v47 = vld [vmem:[#allocation6 + $0x7b8] sm:$0xff]  ;;  %v2010_v61 = vld [vmem:[#allocation12 + $0x1c8] sm:$0xff] }
 0x299   :  { %3036 = vmatpush1.bf16.msra.mxu0 %v3035_v54  ;;  %3164 = vmatpush1.bf16.msra.mxu1 %v3163_v55  ;;  %v1302_v54 = vld [vmem:[#allocation6 + $0x698] sm:$0xff] }
 0x29a   :  { %3038 = vmatprep.subr.bf16.mxu0 %v3037_v58  ;;  %3166 = vmatprep.subr.bf16.mxu1 %v3165_v59  ;;  %v1306_v55 = vld [vmem:[#allocation6 + $0x6b8] sm:$0xff]  ;;  %v1299_v58 = vld [vmem:[#allocation6 + $0x680] sm:$0xff] }
 0x29b   :  { %v1303_v59 = vld [vmem:[#allocation6 + $0x6a0] sm:$0xff]  ;;  %v3185_v60 = vpack.c.bf16 %v1306_v55, %v1302_v54  ;;  %v1337_v54 = vld [vmem:[#allocation6 + $0x7b0] sm:$0xff]  ;;  %v1340_v55 = vld [vmem:[#allocation6 + $0x7c8] sm:$0xff] }
 0x29c   :  { %v3059_v3 = vpack.c.bf16 %v1303_v59, %v1299_v58  ;;  %v1342_v58 = vld [vmem:[#allocation6 + $0x7d8] sm:$0xff] }
 0x29d   :  { %3040 = vmatpush1.bf16.msra.mxu0 %v3039_v36  ;;  %3168 = vmatpush1.bf16.msra.mxu1 %v3167_v2  ;;  %v1310_v36 = vld [vmem:[#allocation6 + $0x6d8] sm:$0xff] }
 0x29e   :  { %3042 = vmatprep.subr.bf16.mxu0 %v3041_v5  ;;  %3170 = vmatprep.subr.bf16.mxu1 %v3169_v6  ;;  %v1314_v2 = vld [vmem:[#allocation6 + $0x6f8] sm:$0xff]  ;;  %v1307_v5 = vld [vmem:[#allocation6 + $0x6c0] sm:$0xff] }
 0x29f   :  { %v1311_v6 = vld [vmem:[#allocation6 + $0x6e0] sm:$0xff]  ;;  %v3189_v8 = vpack.c.bf16 %v1314_v2, %v1310_v36  ;;  %v1346_v59 = vld [vmem:[#allocation6 + $0x7f8] sm:$0xff]  ;;  %v1341_v36 = vld [vmem:[#allocation6 + $0x7d0] sm:$0xff] }
 0x2a0   :  { %v3063_v16 = vpack.c.bf16 %v1311_v6, %v1307_v5  ;;  %v3205_v0 = vpack.c.bf16 %v1346_v59, %v1342_v58  ;;  %v1345_v2 = vld [vmem:[#allocation6 + $0x7f0] sm:$0xff]  ;;  %v1668_v5 = vld [vmem:[#allocation9 + $0x18] sm:$0xff]  ;;  %v1693_v59 = vld [vmem:[#allocation9 + $0xe0] sm:$0xff] }
 0x2a1   :  { %3044 = vmatpush1.bf16.msra.mxu0 %v3043_v14  ;;  %3172 = vmatpush1.bf16.msra.mxu1 %v3171_v15  ;;  %v1318_v14 = vld [vmem:[#allocation6 + $0x718] sm:$0xff]  ;;  %v3207_v6 = vpack.c.bf16 %v1345_v2, %v1341_v36  ;;  %v1702_v2 = vld [vmem:[#allocation9 + $0x128] sm:$0xff] }
 0x2a2   :  { %3046 = vmatprep.subr.bf16.mxu0 %v3045_v18  ;;  %3174 = vmatprep.subr.bf16.mxu1 %v3173_v19  ;;  %v1322_v15 = vld [vmem:[#allocation6 + $0x738] sm:$0xff]  ;;  %v1315_v18 = vld [vmem:[#allocation6 + $0x700] sm:$0xff] }
 0x2a3   :  { %v1319_v19 = vld [vmem:[#allocation6 + $0x720] sm:$0xff]  ;;  %v3193_v21 = vpack.c.bf16 %v1322_v15, %v1318_v14  ;;  %v1699_v36 = vld [vmem:[#allocation9 + $0x110] sm:$0xff] }
 0x2a4   :  { %v3067_v30 = vpack.c.bf16 %v1319_v19, %v1315_v18  ;;  %v1669_v15 = vld [vmem:[#allocation9 + $0x20] sm:$0xff]  ;;  %v1674_v18 = vld [vmem:[#allocation9 + $0x48] sm:$0xff]  ;;  %v1676_v19 = vld [vmem:[#allocation9 + $0x58] sm:$0xff] }
 0x2a5   :  { %3048 = vmatpush1.bf16.msra.mxu0 %v3047_v28  ;;  %3176 = vmatpush1.bf16.msra.mxu1 %v3175_v29  ;;  %v1326_v28 = vld [vmem:[#allocation6 + $0x758] sm:$0xff] }
 0x2a6   :  { %3050 = vmatprep.subr.bf16.mxu0 %v3049_v32  ;;  %3178 = vmatprep.subr.bf16.mxu1 %v3177_v33  ;;  %v1330_v29 = vld [vmem:[#allocation6 + $0x778] sm:$0xff]  ;;  %v1323_v32 = vld [vmem:[#allocation6 + $0x740] sm:$0xff] }
 0x2a7   :  { %v1327_v33 = vld [vmem:[#allocation6 + $0x760] sm:$0xff]  ;;  %v3197_v35 = vpack.c.bf16 %v1330_v29, %v1326_v28  ;;  %v3219_v28 = vpack.c.bf16 %v1675_v24, %v1673_v23 }
 0x2a8   :  { %v3071_v48 = vpack.c.bf16 %v1327_v33, %v1323_v32  ;;  %v1680_v27 = vld [vmem:[#allocation9 + $0x78] sm:$0xff]  ;;  %v1682_v32 = vld [vmem:[#allocation9 + $0x88] sm:$0xff]  ;;  %v1713_v24 = vld [vmem:[#allocation9 + $0x180] sm:$0xff] }
 0x2a9   :  { %3052 = vmatpush1.bf16.msra.mxu0 %v3051_v44  ;;  %3180 = vmatpush1.bf16.msra.mxu1 %v3179_v45  ;;  %v1336_v44 = vld [vmem:[#allocation6 + $0x7a8] sm:$0xff]  ;;  %v1334_v45 = vld [vmem:[#allocation6 + $0x798] sm:$0xff]  ;;  %v3221_v29 = vpack.c.bf16 %v1680_v27, %v1678_v26 }
 0x2aa   :  { %3054 = vmatprep.subr.bf16.mxu0 %v3053_v49  ;;  %3182 = vmatprep.subr.bf16.mxu1 %v3181_v50  ;;  %v3199_v49 = vpack.c.bf16 %v1329_v41, %v1325_v37  ;;  %v1331_v50 = vld [vmem:[#allocation6 + $0x780] sm:$0xff]  ;;  %v3073_v52 = vpack.c.bf16 %v1336_v44, %v1332_v42  ;;  %v3201_v25 = vpack.c.bf16 %v1338_v47, %v1334_v45  ;;  %v1683_v41 = vld [vmem:[#allocation9 + $0x90] sm:$0xff]  ;;  %v1686_v42 = vld [vmem:[#allocation9 + $0xa8] sm:$0xff] }
 0x2ab   :  { %v1684_v33 = vld [vmem:[#allocation9 + $0x98] sm:$0xff]  ;;  %v1681_v37 = vld [vmem:[#allocation9 + $0x80] sm:$0xff]  ;;  %v1715_v26 = vld [vmem:[#allocation9 + $0x190] sm:$0xff] }
 0x2ac   :  { %v1688_v44 = vld [vmem:[#allocation9 + $0xb8] sm:$0xff]  ;;  %v3227_v45 = vpack.c.bf16 %v1683_v41, %v1681_v37  ;;  %v1718_v27 = vld [vmem:[#allocation9 + $0x1a8] sm:$0xff]  ;;  %v1721_v41 = vld [vmem:[#allocation9 + $0x1c0] sm:$0xff] }
 0x2ad   :  { %3056 = vmatpush1.bf16.msra.mxu0 %v3055_v56  ;;  %3184 = vmatpush1.bf16.msra.mxu1 %v3183_v57  ;;  %v611_v56 = vrot.slane %v4131_v38, %v610_v43  ;;  %v1344_v57 = vld [vmem:[#allocation6 + $0x7e8] sm:$0xff]  ;;  %v3079_v38 = vpack.c.bf16 %v1343_v1, %v1339_v62  ;;  %v3229_v47 = vpack.c.bf16 %v1688_v44, %v1686_v42  ;;  %v1700_v62 = vld [vmem:[#allocation9 + $0x118] sm:$0xff]  ;;  %v1723_v42 = vld [vmem:[#allocation9 + $0x1d0] sm:$0xff] }
 0x2ae   :  { %3058 = vmatprep.subr.bf16.mxu0 %v3057_v22  ;;  %3186 = vmatprep.subr.bf16.mxu1 %v3185_v60  ;;  %v3075_v22 = vpack.c.bf16 %v1335_v51, %v1331_v50  ;;  %v3203_v60 = vpack.c.bf16 %v1337_v54, %v1333_v53  ;;  %v3077_v63 = vpack.c.bf16 %v1344_v57, %v1340_v55  ;;  %v1690_v50 = vld [vmem:[#allocation9 + $0xc8] sm:$0xff]  ;;  %v1692_v51 = vld [vmem:[#allocation9 + $0xd8] sm:$0xff]  ;;  %v1689_v53 = vld [vmem:[#allocation9 + $0xc0] sm:$0xff] }
 0x2af   :  { %v1691_v54 = vld [vmem:[#allocation9 + $0xd0] sm:$0xff]  ;;  %v1694_v55 = vld [vmem:[#allocation9 + $0xe8] sm:$0xff]  ;;  %v1697_v1 = vld [vmem:[#allocation9 + $0x100] sm:$0xff]  ;;  %v3267_v44 = vpack.c.bf16 %v1723_v42, %v1721_v41 }
 0x2b0   :  { %v3235_v57 = vpack.c.bf16 %v1691_v54, %v1689_v53  ;;  %v1954_v54 = vld [vmem:[#allocation12 + $0x8] sm:$0xff]  ;;  %v1988_v42 = vld [vmem:[#allocation12 + $0x118] sm:$0xff] }
 0x2b1   :  { %3060 = vmatpush1.bf16.msra.mxu0 %v3059_v3  ;;  %3188 = vmatpush1.bf16.msra.mxu1 %v3187_v4  ;;  %v3483_v3 = vadd.f32 %v4144_v46, %v611_v56  ;;  %v1666_v4 = vld [vmem:[#allocation9 + $0x8] sm:$0xff]  ;;  %v3213_v46 = vpack.c.bf16 %v1672_v13, %v1670_v12  ;;  %v1696_v56 = vld [vmem:[#allocation9 + $0xf8] sm:$0xff]  ;;  %v1705_v12 = vld [vmem:[#allocation9 + $0x140] sm:$0xff] }
 0x2b2   :  { %3062 = vmatprep.subr.bf16.mxu0 %v3061_v7  ;;  %3190 = vmatprep.subr.bf16.mxu1 %v3189_v8  ;;  %v3209_v7 = vpack.c.bf16 %v1668_v5, %v1666_v4  ;;  %v1665_v8 = vld [vmem:[#allocation9] sm:$0xff]  ;;  %v3237_v58 = vpack.c.bf16 %v1696_v56, %v1694_v55  ;;  %v3243_v4 = vpack.c.bf16 %v1699_v36, %v1697_v1  ;;  %v1707_v13 = vld [vmem:[#allocation9 + $0x150] sm:$0xff] }
 0x2b3   :  { %v1085_v10 = vmul.f32 0.01, %v3483_v3  ;;  %vm1081_vm3 = vcmp.ge.f32.partialorder %v3483_v3, 0.0  ;;  %v3211_v14 = vpack.c.bf16 %v1667_v9, %v1665_v8  ;;  %v1708_v8 = vld [vmem:[#allocation9 + $0x158] sm:$0xff]  ;;  %v1953_v56 = vld [vmem:[#allocation12] sm:$0xff]  ;;  %v1962_v1 = vld [vmem:[#allocation12 + $0x48] sm:$0xff] }
 0x2b4   :  { %v1956_v55 = vld [vmem:[#allocation12 + $0x18] sm:$0xff]  ;;  %v1986_v41 = vld [vmem:[#allocation12 + $0x108] sm:$0xff] }
 0x2b5   :  { %3064 = vmatpush1.bf16.msra.mxu0 %v3063_v16  ;;  %3192 = vmatpush1.bf16.msra.mxu1 %v3191_v17  ;;  %v1671_v16 = vld [vmem:[#allocation9 + $0x30] sm:$0xff]  ;;  %v1089_v17 = vsel %vm1081_vm3, %v3483_v3, %v1085_v10  ;;  %v1704_v3 = vld [vmem:[#allocation9 + $0x138] sm:$0xff] }
 0x2b6   :  { %3066 = vmatprep.subr.bf16.mxu0 %v3065_v20  ;;  %3194 = vmatprep.subr.bf16.mxu1 %v3193_v21  ;;  %v3215_v20 = vpack.c.bf16 %v1671_v16, %v1669_v15  ;;  %v3217_v21 = vpack.c.bf16 %v1676_v19, %v1674_v18  ;;  %v3245_v5 = vpack.c.bf16 %v1704_v3, %v1702_v2  ;;  %v1711_v18 = vld [vmem:[#allocation9 + $0x170] sm:$0xff]  ;;  %v1714_v19 = vld [vmem:[#allocation9 + $0x188] sm:$0xff]  ;;  %v1964_v36 = vld [vmem:[#allocation12 + $0x58] sm:$0xff] }
 0x2b7   :  { %v3251_v15 = vpack.c.bf16 %v1707_v13, %v1705_v12  ;;  %v3345_v3 = vpack.c.bf16 %v1964_v36, %v1962_v1  ;;  %v1970_v12 = vld [vmem:[#allocation12 + $0x88] sm:$0xff]  ;;  %v1972_v13 = vld [vmem:[#allocation12 + $0x98] sm:$0xff]  ;;  %v1999_v1 = vld [vmem:[#allocation12 + $0x170] sm:$0xff] }
 0x2b8   :  { %v2002_v36 = vld [vmem:[#allocation12 + $0x188] sm:$0xff] }
 0x2b9   :  { %3068 = vmatpush1.bf16.msra.mxu0 %v3067_v30  ;;  %3196 = vmatpush1.bf16.msra.mxu1 %v3195_v31  ;;  %v1677_v30 = vld [vmem:[#allocation9 + $0x60] sm:$0xff]  ;;  %v1679_v31 = vld [vmem:[#allocation9 + $0x70] sm:$0xff] }
 0x2ba   :  { %3070 = vmatprep.subr.bf16.mxu0 %v3069_v34  ;;  %3198 = vmatprep.subr.bf16.mxu1 %v3197_v35  ;;  %v3223_v34 = vpack.c.bf16 %v1679_v31, %v1677_v30  ;;  %v3225_v35 = vpack.c.bf16 %v1684_v33, %v1682_v32  ;;  %v1717_v31 = vld [vmem:[#allocation9 + $0x1a0] sm:$0xff]  ;;  %v1719_v32 = vld [vmem:[#allocation9 + $0x1b0] sm:$0xff]  ;;  %v1722_v33 = vld [vmem:[#allocation9 + $0x1c8] sm:$0xff] }
 0x2bd   :  { %3072 = vmatpush1.bf16.msra.mxu0 %v3071_v48  ;;  %3200 = vmatpush1.bf16.msra.mxu1 %v3199_v49  ;;  %v1685_v48 = vld [vmem:[#allocation9 + $0xa0] sm:$0xff]  ;;  %v1687_v49 = vld [vmem:[#allocation9 + $0xb0] sm:$0xff] }
 0x2be   :  { %3074 = vmatprep.subr.bf16.mxu0 %v3073_v52  ;;  %3202 = vmatprep.subr.bf16.mxu1 %v3201_v25  ;;  %v3231_v52 = vpack.c.bf16 %v1687_v49, %v1685_v48  ;;  %v3233_v25 = vpack.c.bf16 %v1692_v51, %v1690_v50  ;;  %v1725_v49 = vld [vmem:[#allocation9 + $0x1e0] sm:$0xff]  ;;  %v1727_v50 = vld [vmem:[#allocation9 + $0x1f0] sm:$0xff] }
 0x2bf   :  { %v3271_v51 = vpack.c.bf16 %v1727_v50, %v1725_v49  ;;  %v1990_v49 = vld [vmem:[#allocation12 + $0x128] sm:$0xff]  ;;  %v1992_v50 = vld [vmem:[#allocation12 + $0x138] sm:$0xff] }
 0x2c1   :  { %3076 = vmatpush1.bf16.msra.mxu0 %v3075_v22  ;;  %3204 = vmatpush1.bf16.msra.mxu1 %v3203_v60  ;;  %v1695_v22 = vld [vmem:[#allocation9 + $0xf0] sm:$0xff]  ;;  %v1698_v60 = vld [vmem:[#allocation9 + $0x108] sm:$0xff] }
 0x2c2   :  { %3078 = vmatprep.subr.bf16.mxu0 %v3077_v63  ;;  %3206 = vmatprep.subr.bf16.mxu1 %v3205_v0  ;;  %v3239_v63 = vpack.c.bf16 %v1695_v22, %v1693_v59  ;;  %v3241_v0 = vpack.c.bf16 %v1700_v62, %v1698_v60  ;;  %v1958_v59 = vld [vmem:[#allocation12 + $0x28] sm:$0xff]  ;;  %v1960_v22 = vld [vmem:[#allocation12 + $0x38] sm:$0xff] }
 0x2c3   :  { %v3341_v62 = vpack.c.bf16 %v1960_v22, %v1958_v59  ;;  %v1995_v59 = vld [vmem:[#allocation12 + $0x150] sm:$0xff]  ;;  %v1998_v22 = vld [vmem:[#allocation12 + $0x168] sm:$0xff] }
 0x2c5   :  { %3080 = vmatpush1.bf16.msra.mxu0 %v3079_v38  ;;  %3208 = vmatpush1.bf16.msra.mxu1 %v3207_v6  ;;  %v1701_v38 = vld [vmem:[#allocation9 + $0x120] sm:$0xff]  ;;  %v1703_v6 = vld [vmem:[#allocation9 + $0x130] sm:$0xff] }
 0x2c6   :  { %3210 = vmatprep.subr.bf16.mxu0 %v3209_v7  ;;  %v1706_v7 = vld [vmem:[#allocation9 + $0x148] sm:$0xff]  ;;  %v3247_v9 = vpack.c.bf16 %v1703_v6, %v1701_v38  ;;  %v1968_v6 = vld [vmem:[#allocation12 + $0x78] sm:$0xff] }
 0x2c7   :  { %v3249_v10 = vpack.c.bf16 %v1708_v8, %v1706_v7  ;;  %v1966_v38 = vld [vmem:[#allocation12 + $0x68] sm:$0xff] }
 0x2c8   :  { %1505 = vmatmul.mubr.f32.vlgmr.msra.gmra.mrb[2].mxu0 %v1089_v17  ;;  %1647 = vmatmul.mubr.f32.vlgmr.msra.gmra.mrb[2].mxu1 %v1089_v17  ;;  %v1709_v17 = vld [vmem:[#allocation9 + $0x160] sm:$0xff]  ;;  %v3349_v8 = vpack.c.bf16 %v1968_v6, %v1966_v38  ;;  %v2003_v38 = vld [vmem:[#allocation12 + $0x190] sm:$0xff]  ;;  %v2006_v6 = vld [vmem:[#allocation12 + $0x1a8] sm:$0xff] }
 0x2c9   :  { %3212 = vmatpush1.bf16.msra.mxu0 %v3211_v14  ;;  %v1710_v14 = vld [vmem:[#allocation9 + $0x168] sm:$0xff] }
 0x2ca   :  { %3214 = vmatprep.subr.bf16.mxu0 %v3213_v46  ;;  %v1712_v46 = vld [vmem:[#allocation9 + $0x178] sm:$0xff] }
 0x2cb   :  { %v3253_v16 = vpack.c.bf16 %v1712_v46, %v1710_v14  ;;  %v3353_v46 = vpack.c.bf16 %v1972_v13, %v1970_v12  ;;  %v2007_v12 = vld [vmem:[#allocation12 + $0x1b0] sm:$0xff]  ;;  %v4153_v13 = vld [vmem:[#allocation7] sm:$0xf] }
 0x2cd   :  { %3216 = vmatpush1.bf16.msra.mxu0 %v3215_v20  ;;  %v1716_v20 = vld [vmem:[#allocation9 + $0x198] sm:$0xff] }
 0x2ce   :  { %3218 = vmatprep.subr.bf16.mxu0 %v3217_v21  ;;  %v3255_v21 = vpack.c.bf16 %v1711_v18, %v1709_v17  ;;  %v3257_v23 = vpack.c.bf16 %v1716_v20, %v1714_v19  ;;  %v1974_v17 = vld [vmem:[#allocation12 + $0xa8] sm:$0xff]  ;;  %v1976_v18 = vld [vmem:[#allocation12 + $0xb8] sm:$0xff] }
 0x2cf   :  { %v3357_v20 = vpack.c.bf16 %v1976_v18, %v1974_v17 }
 0x2d1   :  { %3220 = vmatpush1.bf16.msra.mxu0 %v3219_v28  ;;  %v1720_v28 = vld [vmem:[#allocation9 + $0x1b8] sm:$0xff] }
 0x2d2   :  { %3222 = vmatprep.subr.bf16.mxu0 %v3221_v29  ;;  %v3259_v29 = vpack.c.bf16 %v1715_v26, %v1713_v24  ;;  %v3261_v30 = vpack.c.bf16 %v1720_v28, %v1718_v27  ;;  %v1978_v24 = vld [vmem:[#allocation12 + $0xc8] sm:$0xff]  ;;  %v1980_v26 = vld [vmem:[#allocation12 + $0xd8] sm:$0xff] }
 0x2d3   :  { %v3361_v28 = vpack.c.bf16 %v1980_v26, %v1978_v24  ;;  %v1729_v26 = vld [vmem:[#allocation9 + $0x200] sm:$0xff] }
 0x2d5   :  { %3224 = vmatpush1.bf16.msra.mxu0 %v3223_v34  ;;  %v1724_v34 = vld [vmem:[#allocation9 + $0x1d8] sm:$0xff] }
 0x2d6   :  { %3226 = vmatprep.subr.bf16.mxu0 %v3225_v35  ;;  %v3263_v35 = vpack.c.bf16 %v1719_v32, %v1717_v31  ;;  %v3265_v37 = vpack.c.bf16 %v1724_v34, %v1722_v33  ;;  %v1982_v31 = vld [vmem:[#allocation12 + $0xe8] sm:$0xff]  ;;  %v1984_v32 = vld [vmem:[#allocation12 + $0xf8] sm:$0xff] }
 0x2d7   :  { %v3365_v34 = vpack.c.bf16 %v1984_v32, %v1982_v31 }
 0x2d9   :  { %3228 = vmatpush1.bf16.msra.mxu0 %v3227_v45  ;;  %v1726_v45 = vld [vmem:[#allocation9 + $0x1e8] sm:$0xff] }
 0x2da   :  { %3230 = vmatprep.subr.bf16.mxu0 %v3229_v47  ;;  %v1728_v47 = vld [vmem:[#allocation9 + $0x1f8] sm:$0xff] }
 0x2db   :  { %v3269_v48 = vpack.c.bf16 %v1728_v47, %v1726_v45  ;;  %v3369_v45 = vpack.c.bf16 %v1988_v42, %v1986_v41  ;;  %v1985_v47 = vld [vmem:[#allocation12 + $0x100] sm:$0xff] }
 0x2dc   :  { %v1738_v42 = vld [vmem:[#allocation9 + $0x248] sm:$0xff] }
 0x2dd   :  { %3232 = vmatpush1.bf16.msra.mxu0 %v3231_v52  ;;  %v1730_v52 = vld [vmem:[#allocation9 + $0x208] sm:$0xff] }
 0x2de   :  { %3234 = vmatprep.subr.bf16.mxu0 %v3233_v25  ;;  %v1732_v25 = vld [vmem:[#allocation9 + $0x218] sm:$0xff] }
 0x2df   :  { %v3273_v53 = vpack.c.bf16 %v1732_v25, %v1730_v52  ;;  %v3373_v52 = vpack.c.bf16 %v1992_v50, %v1990_v49  ;;  %v1989_v25 = vld [vmem:[#allocation12 + $0x120] sm:$0xff]  ;;  %v1739_v50 = vld [vmem:[#allocation9 + $0x250] sm:$0xff] }
 0x2e0   :  { %v1737_v49 = vld [vmem:[#allocation9 + $0x240] sm:$0xff] }
 0x2e1   :  { %3236 = vmatpush1.bf16.msra.mxu0 %v3235_v57  ;;  %v3337_v57 = vpack.c.bf16 %v1956_v55, %v1954_v54  ;;  %v1994_v54 = vld [vmem:[#allocation12 + $0x148] sm:$0xff]  ;;  %v1996_v55 = vld [vmem:[#allocation12 + $0x158] sm:$0xff] }
 0x2e2   :  { %3238 = vmatprep.subr.bf16.mxu0 %v3237_v58  ;;  %v1955_v58 = vld [vmem:[#allocation12 + $0x10] sm:$0xff] }
 0x2e3   :  { %v3339_v60 = vpack.c.bf16 %v1955_v58, %v1953_v56  ;;  %3338 = vmatprep.subr.bf16.mxu1 %v3337_v57  ;;  %v3377_v57 = vpack.c.bf16 %v1996_v55, %v1994_v54  ;;  %v1993_v58 = vld [vmem:[#allocation12 + $0x140] sm:$0xff]  ;;  %v1743_v55 = vld [vmem:[#allocation9 + $0x270] sm:$0xff] }
 0x2e4   :  { %v1741_v54 = vld [vmem:[#allocation9 + $0x260] sm:$0xff] }
 0x2e5   :  { %3240 = vmatpush1.bf16.msra.mxu0 %v3239_v63  ;;  %v1957_v63 = vld [vmem:[#allocation12 + $0x20] sm:$0xff]  ;;  %3340 = vmatpush1.bf16.msra.mxu1 %v3339_v60  ;;  %v2000_v60 = vld [vmem:[#allocation12 + $0x178] sm:$0xff] }
 0x2e6   :  { %3242 = vmatprep.subr.bf16.mxu0 %v3241_v0  ;;  %v1959_v0 = vld [vmem:[#allocation12 + $0x30] sm:$0xff]  ;;  %3342 = vmatprep.subr.bf16.mxu1 %v3341_v62  ;;  %v3379_v62 = vpack.c.bf16 %v1995_v59, %v1993_v58  ;;  %v3287_v58 = vpack.c.bf16 %v1743_v55, %v1741_v54 }
 0x2e7   :  { %v3343_v2 = vpack.c.bf16 %v1959_v0, %v1957_v63  ;;  %v3381_v63 = vpack.c.bf16 %v2000_v60, %v1998_v22  ;;  %v1997_v0 = vld [vmem:[#allocation12 + $0x160] sm:$0xff]  ;;  %v1747_v60 = vld [vmem:[#allocation9 + $0x290] sm:$0xff] }
 0x2e8   :  { %v1745_v22 = vld [vmem:[#allocation9 + $0x280] sm:$0xff] }
 0x2e9   :  { %3244 = vmatpush1.bf16.msra.mxu0 %v3243_v4  ;;  %v1961_v4 = vld [vmem:[#allocation12 + $0x40] sm:$0xff]  ;;  %3344 = vmatpush1.bf16.msra.mxu1 %v3343_v2  ;;  %v2004_v2 = vld [vmem:[#allocation12 + $0x198] sm:$0xff] }
 0x2ea   :  { %3246 = vmatprep.subr.bf16.mxu0 %v3245_v5  ;;  %v1963_v5 = vld [vmem:[#allocation12 + $0x50] sm:$0xff]  ;;  %3346 = vmatprep.subr.bf16.mxu1 %v3345_v3  ;;  %v3383_v3 = vpack.c.bf16 %v1999_v1, %v1997_v0  ;;  %v3291_v0 = vpack.c.bf16 %v1747_v60, %v1745_v22 }
 0x2eb   :  { %v3347_v7 = vpack.c.bf16 %v1963_v5, %v1961_v4  ;;  %v3385_v4 = vpack.c.bf16 %v2004_v2, %v2002_v36  ;;  %v2001_v5 = vld [vmem:[#allocation12 + $0x180] sm:$0xff]  ;;  %v1751_v2 = vld [vmem:[#allocation9 + $0x2b0] sm:$0xff] }
 0x2ec   :  { %v1749_v36 = vld [vmem:[#allocation9 + $0x2a0] sm:$0xff] }
 0x2ed   :  { %3248 = vmatpush1.bf16.msra.mxu0 %v3247_v9  ;;  %v1965_v9 = vld [vmem:[#allocation12 + $0x60] sm:$0xff]  ;;  %3348 = vmatpush1.bf16.msra.mxu1 %v3347_v7  ;;  %v2008_v7 = vld [vmem:[#allocation12 + $0x1b8] sm:$0xff] }
 0x2ee   :  { %3250 = vmatprep.subr.bf16.mxu0 %v3249_v10  ;;  %v1967_v10 = vld [vmem:[#allocation12 + $0x70] sm:$0xff]  ;;  %3350 = vmatprep.subr.bf16.mxu1 %v3349_v8  ;;  %v3387_v8 = vpack.c.bf16 %v2003_v38, %v2001_v5  ;;  %v3295_v5 = vpack.c.bf16 %v1751_v2, %v1749_v36 }
 0x2ef   :  { %v3351_v14 = vpack.c.bf16 %v1967_v10, %v1965_v9  ;;  %v3389_v9 = vpack.c.bf16 %v2008_v7, %v2006_v6  ;;  %v2005_v10 = vld [vmem:[#allocation12 + $0x1a0] sm:$0xff]  ;;  %v1755_v7 = vld [vmem:[#allocation9 + $0x2d0] sm:$0xff]  ;;  %v1792_v36 = vld [vmem:[#allocation9 + $0x3f8] sm:$0xff] }
 0x2f0   :  { %v1753_v6 = vld [vmem:[#allocation9 + $0x2c0] sm:$0xff] }
 0x2f1   :  { %3252 = vmatpush1.bf16.msra.mxu0 %v3251_v15  ;;  %v1969_v15 = vld [vmem:[#allocation12 + $0x80] sm:$0xff]  ;;  %3352 = vmatpush1.bf16.msra.mxu1 %v3351_v14  ;;  %v3391_v14 = vpack.c.bf16 %v2007_v12, %v2005_v10  ;;  %v3299_v10 = vpack.c.bf16 %v1755_v7, %v1753_v6 }
 0x2f2   :  { %3254 = vmatprep.subr.bf16.mxu0 %v3253_v16  ;;  %v1971_v16 = vld [vmem:[#allocation12 + $0x90] sm:$0xff]  ;;  %3354 = vmatprep.subr.bf16.mxu1 %v3353_v46  ;;  %v1352_v46 = vrot.slane %v4153_v13, %v4129_v11 }
 0x2f3   :  { %v3355_v19 = vpack.c.bf16 %v1971_v16, %v1969_v15  ;;  %v1356_v15 = vrot.slane %v4153_v13, %v4134_v39  ;;  %v1364_v16 = vrot.slane %v4153_v13, %v614_v40 }
 0x2f5   :  { %3256 = vmatpush1.bf16.msra.mxu0 %v3255_v21  ;;  %v1973_v21 = vld [vmem:[#allocation12 + $0xa0] sm:$0xff]  ;;  %3356 = vmatpush1.bf16.msra.mxu1 %v3355_v19 }
 0x2f6   :  { %3258 = vmatprep.subr.bf16.mxu0 %v3257_v23  ;;  %v1975_v23 = vld [vmem:[#allocation12 + $0xb0] sm:$0xff]  ;;  %3358 = vmatprep.subr.bf16.mxu1 %v3357_v20 }
 0x2f7   :  { %v3359_v27 = vpack.c.bf16 %v1975_v23, %v1973_v21 }
 0x2f9   :  { %3260 = vmatpush1.bf16.msra.mxu0 %v3259_v29  ;;  %v1977_v29 = vld [vmem:[#allocation12 + $0xc0] sm:$0xff]  ;;  %3360 = vmatpush1.bf16.msra.mxu1 %v3359_v27  ;;  %v1731_v27 = vld [vmem:[#allocation9 + $0x210] sm:$0xff] }
 0x2fa   :  { %3262 = vmatprep.subr.bf16.mxu0 %v3261_v30  ;;  %v1979_v30 = vld [vmem:[#allocation12 + $0xd0] sm:$0xff]  ;;  %3362 = vmatprep.subr.bf16.mxu1 %v3361_v28 }
 0x2fb   :  { %v3363_v33 = vpack.c.bf16 %v1979_v30, %v1977_v29  ;;  %v1734_v29 = vld [vmem:[#allocation9 + $0x228] sm:$0xff]  ;;  %v1736_v30 = vld [vmem:[#allocation9 + $0x238] sm:$0xff] }
 0x2fd   :  { %3264 = vmatpush1.bf16.msra.mxu0 %v3263_v35  ;;  %v1981_v35 = vld [vmem:[#allocation12 + $0xe0] sm:$0xff]  ;;  %3364 = vmatpush1.bf16.msra.mxu1 %v3363_v33  ;;  %v3275_v33 = vpack.c.bf16 %v1731_v27, %v1729_v26 }
 0x2fe   :  { %3266 = vmatprep.subr.bf16.mxu0 %v3265_v37  ;;  %v1983_v37 = vld [vmem:[#allocation12 + $0xf0] sm:$0xff]  ;;  %3366 = vmatprep.subr.bf16.mxu1 %v3365_v34  ;;  %v3277_v34 = vpack.c.bf16 %v1736_v30, %v1734_v29  ;;  %v1770_v30 = vld [vmem:[#allocation9 + $0x348] sm:$0xff] }
 0x2ff   :  { %v1767_v29 = vld [vmem:[#allocation9 + $0x330] sm:$0xff] }
 0x301   :  { %3268 = vmatpush1.bf16.msra.mxu0 %v3267_v44  ;;  %v3367_v44 = vpack.c.bf16 %v1983_v37, %v1981_v35  ;;  %v1733_v35 = vld [vmem:[#allocation9 + $0x220] sm:$0xff]  ;;  %v1735_v37 = vld [vmem:[#allocation9 + $0x230] sm:$0xff] }
 0x302   :  { %3270 = vmatprep.subr.bf16.mxu0 %v3269_v48  ;;  %v1987_v48 = vld [vmem:[#allocation12 + $0x110] sm:$0xff] }
 0x303   :  { %3368 = vmatpush1.bf16.msra.mxu1 %v3367_v44  ;;  %v1740_v44 = vld [vmem:[#allocation9 + $0x258] sm:$0xff] }
 0x304   :  { %3370 = vmatprep.subr.bf16.mxu1 %v3369_v45 }
 0x305   :  { %3272 = vmatpush1.bf16.msra.mxu0 %v3271_v51  ;;  %v3371_v51 = vpack.c.bf16 %v1987_v48, %v1985_v47  ;;  %v3279_v47 = vpack.c.bf16 %v1735_v37, %v1733_v35  ;;  %v3281_v48 = vpack.c.bf16 %v1740_v44, %v1738_v42  ;;  %v1774_v35 = vld [vmem:[#allocation9 + $0x368] sm:$0xff]  ;;  %v1776_v37 = vld [vmem:[#allocation9 + $0x378] sm:$0xff]  ;;  %v1773_v44 = vld [vmem:[#allocation9 + $0x360] sm:$0xff] }
 0x306   :  { %3274 = vmatprep.subr.bf16.mxu0 %v3273_v53  ;;  %v1991_v53 = vld [vmem:[#allocation12 + $0x130] sm:$0xff]  ;;  %v3317_v42 = vpack.c.bf16 %v1776_v37, %v1774_v35 }
 0x307   :  { %3372 = vmatpush1.bf16.msra.mxu1 %v3371_v51  ;;  %v3375_v56 = vpack.c.bf16 %v1991_v53, %v1989_v25  ;;  %v1742_v51 = vld [vmem:[#allocation9 + $0x268] sm:$0xff]  ;;  %v3283_v25 = vpack.c.bf16 %v1739_v50, %v1737_v49 }
 0x308   :  { %3374 = vmatprep.subr.bf16.mxu1 %v3373_v52  ;;  %v1744_v52 = vld [vmem:[#allocation9 + $0x278] sm:$0xff] }
 0x309   :  { %v3285_v53 = vpack.c.bf16 %v1744_v52, %v1742_v51  ;;  %v1777_v51 = vld [vmem:[#allocation9 + $0x380] sm:$0xff]  ;;  %v1779_v52 = vld [vmem:[#allocation9 + $0x390] sm:$0xff] }
 0x30a   :  { %v3323_v54 = vpack.c.bf16 %v1779_v52, %v1777_v51  ;;  %v2110_v52 = vld [vmem:[#allocation15 + $0x20] sm:$0xff] }
 0x30b   :  { %3376 = vmatpush1.bf16.msra.mxu1 %v3375_v56  ;;  %v1746_v56 = vld [vmem:[#allocation9 + $0x288] sm:$0xff] }
 0x30c   :  { %3378 = vmatprep.subr.bf16.mxu1 %v3377_v57  ;;  %v1748_v57 = vld [vmem:[#allocation9 + $0x298] sm:$0xff] }
 0x30d   :  { %v3289_v59 = vpack.c.bf16 %v1748_v57, %v1746_v56  ;;  %v1781_v56 = vld [vmem:[#allocation9 + $0x3a0] sm:$0xff]  ;;  %v1783_v57 = vld [vmem:[#allocation9 + $0x3b0] sm:$0xff] }
 0x30e   :  { %v3327_v22 = vpack.c.bf16 %v1783_v57, %v1781_v56  ;;  %v2112_v57 = vld [vmem:[#allocation15 + $0x30] sm:$0xff] }
 0x30f   :  { %3380 = vmatpush1.bf16.msra.mxu1 %v3379_v62  ;;  %v1750_v62 = vld [vmem:[#allocation9 + $0x2a8] sm:$0xff] }
 0x310   :  { %3382 = vmatprep.subr.bf16.mxu1 %v3381_v63  ;;  %v1752_v63 = vld [vmem:[#allocation9 + $0x2b8] sm:$0xff] }
 0x311   :  { %v3293_v1 = vpack.c.bf16 %v1752_v63, %v1750_v62  ;;  %v1785_v62 = vld [vmem:[#allocation9 + $0x3c0] sm:$0xff]  ;;  %v1787_v63 = vld [vmem:[#allocation9 + $0x3d0] sm:$0xff] }
 0x312   :  { %v3331_v2 = vpack.c.bf16 %v1787_v63, %v1785_v62  ;;  %v2114_v63 = vld [vmem:[#allocation15 + $0x40] sm:$0xff] }
 0x313   :  { %3384 = vmatpush1.bf16.msra.mxu1 %v3383_v3  ;;  %v1754_v3 = vld [vmem:[#allocation9 + $0x2c8] sm:$0xff] }
 0x314   :  { %3386 = vmatprep.subr.bf16.mxu1 %v3385_v4  ;;  %v1756_v4 = vld [vmem:[#allocation9 + $0x2d8] sm:$0xff] }
 0x315   :  { %v3297_v38 = vpack.c.bf16 %v1756_v4, %v1754_v3  ;;  %v1789_v4 = vld [vmem:[#allocation9 + $0x3e0] sm:$0xff] }
 0x317   :  { %3388 = vmatpush1.bf16.msra.mxu1 %v3387_v8  ;;  %v1758_v8 = vld [vmem:[#allocation9 + $0x2e8] sm:$0xff] }
 0x318   :  { %3390 = vmatprep.subr.bf16.mxu1 %v3389_v9  ;;  %v1760_v9 = vld [vmem:[#allocation9 + $0x2f8] sm:$0xff] }
 0x319   :  { %v3301_v12 = vpack.c.bf16 %v1760_v9, %v1758_v8  ;;  %v2009_v9 = vld [vmem:[#allocation12 + $0x1c0] sm:$0xff] }
 0x31b   :  { %3392 = vmatpush1.bf16.msra.mxu1 %v3391_v14  ;;  %v1757_v14 = vld [vmem:[#allocation9 + $0x2e0] sm:$0xff] }
 0x39b   :  { %v1506_v17 = vpop.f32.mrb[2].mxu0  ;;  %v4162_v18 = vpop.f32.mrb[2].mxu1 }
 0x39c   :  { %v3485_v19 = vadd.f32 %v1506_v17, %v1352_v46  ;;  %v1508_v20 = vpop.f32.mrb[3].mxu0  ;;  %v1650_v21 = vpop.f32.mrb[3].mxu1  ;;  %v1759_v46 = vld [vmem:[#allocation9 + $0x2f0] sm:$0xff] }
 0x39d   :  { %v3486_v23 = vadd.f32 %v1508_v20, %v1356_v15  ;;  %v3488_v24 = vadd.f32 %v1650_v21, %v1364_v16  ;;  %v1762_v15 = vld [vmem:[#allocation9 + $0x308] sm:$0xff]  ;;  %v1764_v16 = vld [vmem:[#allocation9 + $0x318] sm:$0xff]  ;;  %v3303_v17 = vpack.c.bf16 %v1759_v46, %v1757_v14  ;;  %v1761_v20 = vld [vmem:[#allocation9 + $0x300] sm:$0xff] }
 0x39e   :  { %v1657_v28 = vmul.f32 0.01, %v3485_v19  ;;  %vm1653_vm4 = vcmp.ge.f32.partialorder %v3485_v19, 0.0  ;;  %v1763_v21 = vld [vmem:[#allocation9 + $0x310] sm:$0xff]  ;;  %v2016_v46 = vld [vmem:[#allocation12 + $0x1f8] sm:$0xff] }
 0x39f   :  { %v1658_v31 = vmul.f32 0.01, %v3486_v23  ;;  %v1660_v32 = vmul.f32 0.01, %v3488_v24  ;;  %vm1654_vm5 = vcmp.ge.f32.partialorder %v3486_v23, 0.0  ;;  %vm1656_vm6 = vcmp.ge.f32.partialorder %v3488_v24, 0.0 }
 0x3a0   :  { %v1661_v41 = vsel %vm1653_vm4, %v3485_v19, %v1657_v28  ;;  %v3305_v19 = vpack.c.bf16 %v1764_v16, %v1762_v15  ;;  %v3307_v26 = vpack.c.bf16 %v1763_v21, %v1761_v20  ;;  %v1765_v28 = vld [vmem:[#allocation9 + $0x320] sm:$0xff]  ;;  %v2014_v14 = vld [vmem:[#allocation12 + $0x1e8] sm:$0xff]  ;;  %v2015_v16 = vld [vmem:[#allocation12 + $0x1f0] sm:$0xff] }
 0x3a1   :  { %v1662_v40 = vsel %vm1654_vm5, %v3486_v23, %v1658_v31  ;;  %v1664_v45 = vsel %vm1656_vm6, %v3488_v24, %v1660_v32  ;;  %v1766_v23 = vld [vmem:[#allocation9 + $0x328] sm:$0xff]  ;;  %v1768_v24 = vld [vmem:[#allocation9 + $0x338] sm:$0xff]  ;;  %v3311_v32 = vpack.c.bf16 %v1767_v29, %v1765_v28  ;;  %v3397_v15 = vpack.c.bf16 %v2016_v46, %v2014_v14 }
 0x3a2   :  { %1869 = vmatprep.mubr.f32.mxu0 %v1662_v40  ;;  %v3309_v27 = vpack.c.bf16 %v1768_v24, %v1766_v23  ;;  %v1772_v31 = vld [vmem:[#allocation9 + $0x358] sm:$0xff]  ;;  %v1769_v40 = vld [vmem:[#allocation9 + $0x340] sm:$0xff]  ;;  %v2123_v20 = vld [vmem:[#allocation15 + $0x88] sm:$0xff] }
 0x3a3   :  { %1870 = vmatmul.mubr.f32.vlgmr.msra.gmra.mrb[4].mxu0 %v1661_v41  ;;  %v1793_v23 = vld [vmem:[#allocation10] sm:$0x3]  ;;  %v2120_v14 = vld [vmem:[#allocation15 + $0x70] sm:$0xff] }
 0x3a4   :  { %3276 = vmatpush1.bf16.msra.mxu0 %v3275_v33  ;;  %1940 = vmatprep.mubr.f32.mxu0 %v1664_v45  ;;  %v3313_v33 = vpack.c.bf16 %v1772_v31, %v1770_v30  ;;  %v1775_v45 = vld [vmem:[#allocation9 + $0x370] sm:$0xff]  ;;  %v1798_v24 = vrot.slane %v1793_v23, %v4129_v11  ;;  %v2106_v31 = vld [vmem:[#allocation15] sm:$0xff]  ;;  %v2121_v46 = vld [vmem:[#allocation15 + $0x78] sm:$0xff] }
 0x3a5   :  { %3278 = vmatprep.subr.bf16.mxu0 %v3277_v34  ;;  %v1771_v34 = vld [vmem:[#allocation9 + $0x350] sm:$0xff]  ;;  %v3319_v49 = vpack.c.bf16 %v1775_v45, %v1773_v44  ;;  %v2109_v45 = vld [vmem:[#allocation15 + $0x18] sm:$0xff] }
 0x3a6   :  { %v3315_v41 = vpack.c.bf16 %v1771_v34, %v1769_v40  ;;  %v2124_v40 = vld [vmem:[#allocation15 + $0x90] sm:$0xff]  ;;  %v2125_v34 = vld [vmem:[#allocation15 + $0x98] sm:$0xff] }
 0x3a7   :  { %v2108_v44 = vld [vmem:[#allocation15 + $0x10] sm:$0xff] }
 0x3a8   :  { %3280 = vmatpush1.bf16.msra.mxu0 %v3279_v47  ;;  %v1778_v47 = vld [vmem:[#allocation9 + $0x388] sm:$0xff] }
 0x3a9   :  { %3282 = vmatprep.subr.bf16.mxu0 %v3281_v48  ;;  %v1780_v48 = vld [vmem:[#allocation9 + $0x398] sm:$0xff] }
 0x3aa   :  { %v3321_v50 = vpack.c.bf16 %v1780_v48, %v1778_v47  ;;  %v2126_v48 = vld [vmem:[#allocation15 + $0xa0] sm:$0xff] }
 0x3ac   :  { %3284 = vmatpush1.bf16.msra.mxu0 %v3283_v25  ;;  %v1782_v25 = vld [vmem:[#allocation9 + $0x3a8] sm:$0xff] }
 0x3ad   :  { %3286 = vmatprep.subr.bf16.mxu0 %v3285_v53  ;;  %v1784_v53 = vld [vmem:[#allocation9 + $0x3b8] sm:$0xff] }
 0x3ae   :  { %v3325_v55 = vpack.c.bf16 %v1784_v53, %v1782_v25  ;;  %v2111_v25 = vld [vmem:[#allocation15 + $0x28] sm:$0xff]  ;;  %v2128_v53 = vld [vmem:[#allocation15 + $0xb0] sm:$0xff] }
 0x3b0   :  { %3288 = vmatpush1.bf16.msra.mxu0 %v3287_v58  ;;  %v1786_v58 = vld [vmem:[#allocation9 + $0x3c8] sm:$0xff] }
 0x3b1   :  { %3290 = vmatprep.subr.bf16.mxu0 %v3289_v59  ;;  %v1788_v59 = vld [vmem:[#allocation9 + $0x3d8] sm:$0xff] }
 0x3b2   :  { %v3329_v60 = vpack.c.bf16 %v1788_v59, %v1786_v58  ;;  %v2113_v58 = vld [vmem:[#allocation15 + $0x38] sm:$0xff]  ;;  %v2130_v59 = vld [vmem:[#allocation15 + $0xc0] sm:$0xff] }
 0x3b4   :  { %3292 = vmatpush1.bf16.msra.mxu0 %v3291_v0  ;;  %v1360_v0 = vrot.slane %v4153_v13, %v610_v43  ;;  %v2012_v43 = vld [vmem:[#allocation12 + $0x1d8] sm:$0xff] }
 0x3b5   :  { %3294 = vmatprep.subr.bf16.mxu0 %v3293_v1  ;;  %v1790_v1 = vld [vmem:[#allocation9 + $0x3e8] sm:$0xff]  ;;  %v3393_v13 = vpack.c.bf16 %v2012_v43, %v2010_v61 }
 0x3b6   :  { %v3333_v3 = vpack.c.bf16 %v1792_v36, %v1790_v1  ;;  %v2132_v1 = vld [vmem:[#allocation15 + $0xd0] sm:$0xff]  ;;  %v2133_v36 = vld [vmem:[#allocation15 + $0xd8] sm:$0xff]  ;;  %v2118_v61 = vld [vmem:[#allocation15 + $0x60] sm:$0xff] }
 0x3b7   :  { %3394 = vmatprep.subr.bf16.mxu1 %v3393_v13  ;;  %v2119_v43 = vld [vmem:[#allocation15 + $0x68] sm:$0xff] }
 0x3b8   :  { %3296 = vmatpush1.bf16.msra.mxu0 %v3295_v5  ;;  %v1791_v5 = vld [vmem:[#allocation9 + $0x3f0] sm:$0xff]  ;;  %v3427_v13 = vpack.c.bf16 %v2119_v43, %v2118_v61  ;;  %v2326_v61 = vld [vmem:[%s4252_s13 + $0x60] sm:$0xff]  ;;  %v2327_v43 = vld [vmem:[%s4252_s13 + $0x68] sm:$0xff] }
 0x3b9   :  { %3298 = vmatprep.subr.bf16.mxu0 %v3297_v38  ;;  %v3487_v38 = vadd.f32 %v4162_v18, %v1360_v0  ;;  %v3335_v6 = vpack.c.bf16 %v1791_v5, %v1789_v4  ;;  %v2013_v18 = vld [vmem:[#allocation12 + $0x1e0] sm:$0xff]  ;;  %v2115_v0 = vld [vmem:[#allocation15 + $0x48] sm:$0xff]  ;;  %v2116_v4 = vld [vmem:[#allocation15 + $0x50] sm:$0xff] }
 0x3ba   :  { %v2117_v5 = vld [vmem:[#allocation15 + $0x58] sm:$0xff] }
 0x3bb   :  { %v1659_v7 = vmul.f32 0.01, %v3487_v38  ;;  %vm1655_vm7 = vcmp.ge.f32.partialorder %v3487_v38, 0.0 }
 0x3bc   :  { %3300 = vmatpush1.bf16.msra.mxu0 %v3299_v10  ;;  %v2011_v10 = vld [vmem:[#allocation12 + $0x1d0] sm:$0xff] }
 0x3bd   :  { %3302 = vmatprep.subr.bf16.mxu0 %v3301_v12  ;;  %v1663_v8 = vsel %vm1655_vm7, %v3487_v38, %v1659_v7  ;;  %v3395_v12 = vpack.c.bf16 %v2011_v10, %v2009_v9  ;;  %v3423_v38 = vpack.c.bf16 %v2117_v5, %v2116_v4  ;;  %v2135_v7 = vld [vmem:[#allocation15 + $0xe8] sm:$0xff]  ;;  %v2136_v9 = vld [vmem:[#allocation15 + $0xf0] sm:$0xff]  ;;  %v2137_v10 = vld [vmem:[#allocation15 + $0xf8] sm:$0xff] }
 0x3be   :  { %v2322_v4 = vld [vmem:[%s4252_s13 + $0x40] sm:$0xff]  ;;  %v2323_v5 = vld [vmem:[%s4252_s13 + $0x48] sm:$0xff] }
 0x3bf   :  { %3396 = vmatpush1.bf16.msra.mxu1 %v3395_v12  ;;  %v3429_v12 = vpack.c.bf16 %v2137_v10, %v2136_v9  ;;  %v2427_v10 = vld [vmem:[#allocation16] ss:$0 sm:$0xff] }
 0x3c0   :  { %3304 = vmatpush1.bf16.msra.mxu0 %v3303_v17  ;;  %v3399_v17 = vpack.c.bf16 %v2015_v16, %v2013_v18  ;;  %3398 = vmatprep.subr.bf16.mxu1 %v3397_v15  ;;  %v3431_v15 = vpack.c.bf16 %v2121_v46, %v2120_v14  ;;  %v3853_v18 = vmov 0.0|0.0   ;;  %v2017_v16 = vld [vmem:[#allocation13] sm:$0x3] }
 0x3c1   :  { %3306 = vmatprep.subr.bf16.mxu0 %v3305_v19  ;;  %v2122_v19 = vld [vmem:[#allocation15 + $0x80] sm:$0xff] }
 0x3c2   :  { %v3401_v21 = vpack.c.bf16 %v2123_v20, %v2122_v19  ;;  %v2026_v19 = vrot.slane %v2017_v16, %v4134_v39 }
 0x3c3   :  { %3400 = vmatpush1.bf16.msra.mxu1 %v3399_v17  ;;  %v2022_v17 = vrot.slane %v2017_v16, %v4129_v11 }
 0x3c4   :  { %3308 = vmatpush1.bf16.msra.mxu0 %v3307_v26  ;;  %3402 = vmatprep.subr.bf16.mxu1 %v3401_v21  ;;  %v1802_v26 = vrot.slane %v1793_v23, %v4134_v39  ;;  %v2222_v39 = vld [vmem:[#allocation18 + $0x20] sm:$0xff] }
 0x3c5   :  { %3310 = vmatprep.subr.bf16.mxu0 %v3309_v27 }
 0x3c8   :  { %3312 = vmatpush1.bf16.msra.mxu0 %v3311_v32  ;;  %v2107_v32 = vld [vmem:[#allocation15 + $0x8] sm:$0xff] }
 0x3c9   :  { %3314 = vmatprep.subr.bf16.mxu0 %v3313_v33  ;;  %v3403_v37 = vpack.c.bf16 %v2107_v32, %v2106_v31  ;;  %v2220_v32 = vld [vmem:[#allocation18 + $0x10] sm:$0xff] }
 0x3cc   :  { %3316 = vmatpush1.bf16.msra.mxu0 %v3315_v41 }
 0x3cd   :  { %3318 = vmatprep.subr.bf16.mxu0 %v3317_v42  ;;  %v3405_v42 = vpack.c.bf16 %v2125_v34, %v2124_v40  ;;  %v2223_v34 = vld [vmem:[#allocation18 + $0x28] sm:$0xff] }
 0x3d0   :  { %3320 = vmatpush1.bf16.msra.mxu0 %v3319_v49  ;;  %v2127_v49 = vld [vmem:[#allocation15 + $0xa8] sm:$0xff] }
 0x3d1   :  { %3322 = vmatprep.subr.bf16.mxu0 %v3321_v50  ;;  %v3407_v50 = vpack.c.bf16 %v2109_v45, %v2108_v44  ;;  %v3409_v51 = vpack.c.bf16 %v2127_v49, %v2126_v48  ;;  %v2226_v44 = vld [vmem:[#allocation18 + $0x40] sm:$0xff]  ;;  %v2227_v45 = vld [vmem:[#allocation18 + $0x48] sm:$0xff]  ;;  %v2228_v48 = vld [vmem:[#allocation18 + $0x50] sm:$0xff] }
 0x3d2   :  { %v2229_v49 = vld [vmem:[#allocation18 + $0x58] sm:$0xff] }
 0x3d4   :  { %3324 = vmatpush1.bf16.msra.mxu0 %v3323_v54  ;;  %v2129_v54 = vld [vmem:[#allocation15 + $0xb8] sm:$0xff] }
 0x3d5   :  { %3326 = vmatprep.subr.bf16.mxu0 %v3325_v55  ;;  %v3411_v55 = vpack.c.bf16 %v2111_v25, %v2110_v52  ;;  %v3413_v56 = vpack.c.bf16 %v2129_v54, %v2128_v53  ;;  %v2231_v52 = vld [vmem:[#allocation18 + $0x68] sm:$0xff]  ;;  %v2232_v53 = vld [vmem:[#allocation18 + $0x70] sm:$0xff]  ;;  %v2233_v54 = vld [vmem:[#allocation18 + $0x78] sm:$0xff] }
 0x3d8   :  { %3328 = vmatpush1.bf16.msra.mxu0 %v3327_v22  ;;  %v2131_v22 = vld [vmem:[#allocation15 + $0xc8] sm:$0xff] }
 0x3d9   :  { %3330 = vmatprep.subr.bf16.mxu0 %v3329_v60  ;;  %v3415_v60 = vpack.c.bf16 %v2113_v58, %v2112_v57  ;;  %v3417_v62 = vpack.c.bf16 %v2131_v22, %v2130_v59  ;;  %v2314_v57 = vld [vmem:[%s4252_s13] sm:$0xff]  ;;  %v2315_v58 = vld [vmem:[%s4252_s13 + $0x8] sm:$0xff]  ;;  %v2316_v59 = vld [vmem:[%s4252_s13 + $0x10] sm:$0xff] }
 0x3da   :  { %v3458_v22 = vpack.c.bf16 %v2315_v58, %v2314_v57 }
 0x3dc   :  { %3332 = vmatpush1.bf16.msra.mxu0 %v3331_v2  ;;  %v3419_v2 = vpack.c.bf16 %v2115_v0, %v2114_v63  ;;  %v2318_v63 = vld [vmem:[%s4252_s13 + $0x20] sm:$0xff]  ;;  %v2319_v0 = vld [vmem:[%s4252_s13 + $0x28] sm:$0xff] }
 0x3dd   :  { %3334 = vmatprep.subr.bf16.mxu0 %v3333_v3  ;;  %v3421_v3 = vpack.c.bf16 %v2133_v36, %v2132_v1  ;;  %v3464_v1 = vpack.c.bf16 %v2319_v0, %v2318_v63  ;;  %v2320_v36 = vld [vmem:[%s4252_s13 + $0x30] sm:$0xff] }
 0x3e0   :  { %3336 = vmatpush1.bf16.msra.mxu0 %v3335_v6  ;;  %v2134_v6 = vld [vmem:[#allocation15 + $0xe0] sm:$0xff] }
 0x3e1   :  { %3457 = vmatprep.subr.bf16.mxu0 %v3853_v18 }
 0x3e3   :  { %1941 = vmatmul.mubr.f32.vlgmr.msra.gmra.mrb[4].mxu0 %v1663_v8  ;;  %v3425_v8 = vpack.c.bf16 %v2135_v7, %v2134_v6  ;;  %v2324_v6 = vld [vmem:[%s4252_s13 + $0x50] sm:$0xff]  ;;  %v2325_v7 = vld [vmem:[%s4252_s13 + $0x58] sm:$0xff] }
 0x3e4   :  { %3459 = vmatpush3.bf16.msra.mxu0 %v3458_v22 }
 0x3e5   :  { %3460 = vmatprep.subr.bf16.mxu0 %v3853_v18 }
 0x4b6   :  { %v1942_v27 = vpop.f32.mrb[4].mxu0 }
 0x4b7   :  { %v3489_v28 = vadd.f32 %v1942_v27, %v1798_v24  ;;  %v1944_v29 = vpop.f32.mrb[5].mxu0  ;;  %v2219_v27 = vld [vmem:[#allocation18 + $0x8] sm:$0xff] }
 0x4b8   :  { %v3490_v30 = vadd.f32 %v1944_v29, %v1802_v26  ;;  %v2218_v26 = vld [vmem:[#allocation18] sm:$0xff] }
 0x4b9   :  { %v1949_v33 = vmul.f32 0.01, %v3489_v28  ;;  %vm1947_vm8 = vcmp.ge.f32.partialorder %v3489_v28, 0.0 }
 0x4ba   :  { %v1950_v35 = vmul.f32 0.01, %v3490_v30  ;;  %vm1948_vm9 = vcmp.ge.f32.partialorder %v3490_v30, 0.0 }
 0x4bb   :  { %v1951_v47 = vsel %vm1947_vm8, %v3489_v28, %v1949_v33  ;;  %v2221_v33 = vld [vmem:[#allocation18 + $0x18] sm:$0xff] }
 0x4bc   :  { %v1952_v41 = vsel %vm1948_vm9, %v3490_v30, %v1950_v35  ;;  %v3434_v30 = vpack.c.bf16 %v2219_v27, %v2218_v26  ;;  %v3437_v11 = vpack.c.bf16 %v2221_v33, %v2220_v32  ;;  %v3440_v35 = vpack.c.bf16 %v2223_v34, %v2222_v39 }
 0x4bd   :  { %2093 = vmatprep.mubr.f32.mxu1 %v1952_v41  ;;  %v2225_v41 = vld [vmem:[#allocation18 + $0x38] sm:$0xff] }
 0x4be   :  { %2094 = vmatmul.mubr.f32.vlgmr.msra.gmra.mrb[4].mxu1 %v1951_v47  ;;  %v3446_v47 = vpack.c.bf16 %v2227_v45, %v2226_v44 }
 0x4bf   :  { %3404 = vmatpush3.bf16.msra.mxu1 %v3403_v37  ;;  %v2224_v37 = vld [vmem:[#allocation18 + $0x30] sm:$0xff] }
 0x4c0   :  { %3406 = vmatprep.subr.bf16.mxu1 %v3405_v42  ;;  %v3443_v42 = vpack.c.bf16 %v2225_v41, %v2224_v37 }
 0x4c3   :  { %3408 = vmatpush3.bf16.msra.mxu1 %v3407_v50  ;;  %v3449_v50 = vpack.c.bf16 %v2229_v49, %v2228_v48 }
 0x4c4   :  { %3410 = vmatprep.subr.bf16.mxu1 %v3409_v51  ;;  %v2230_v51 = vld [vmem:[#allocation18 + $0x60] sm:$0xff] }
 0x4c5   :  { %v3452_v25 = vpack.c.bf16 %v2231_v52, %v2230_v51 }
 0x4c7   :  { %3412 = vmatpush3.bf16.msra.mxu1 %v3411_v55  ;;  %v3455_v55 = vpack.c.bf16 %v2233_v54, %v2232_v53 }
 0x4c8   :  { %3414 = vmatprep.subr.bf16.mxu1 %v3413_v56  ;;  %v3855_v56 = vmov 0.0  }
 0x4c9   :  { %2566 = vmatprep.mubr.msk.f32.mxu0 %vm3854_vm12, %v3855_v56 }
 0x4cb   :  { %3416 = vmatpush3.bf16.msra.mxu1 %v3415_v60  ;;  %v2317_v60 = vld [vmem:[%s4252_s13 + $0x18] sm:$0xff] }
 0x4cc   :  { %3418 = vmatprep.subr.bf16.mxu1 %v3417_v62  ;;  %v3461_v62 = vpack.c.bf16 %v2317_v60, %v2316_v59 }
 0x4ce   :  { %3462 = vmatpush3.bf16.msra.mxu0 %v3461_v62 }
 0x4cf   :  { %3420 = vmatpush3.bf16.msra.mxu1 %v3419_v2  ;;  %3463 = vmatprep.subr.bf16.mxu0 %v3853_v18  ;;  %v2321_v2 = vld [vmem:[%s4252_s13 + $0x38] sm:$0xff] }
 0x4d0   :  { %3422 = vmatprep.subr.bf16.mxu1 %v3421_v3  ;;  %v3467_v3 = vpack.c.bf16 %v2321_v2, %v2320_v36 }
 0x4d2   :  { %3465 = vmatpush3.bf16.msra.mxu0 %v3464_v1 }
 0x4d3   :  { %3424 = vmatpush3.bf16.msra.mxu1 %v3423_v38  ;;  %3466 = vmatprep.subr.bf16.mxu0 %v3853_v18  ;;  %v3470_v38 = vpack.c.bf16 %v2323_v5, %v2322_v4 }
 0x4d4   :  { %3426 = vmatprep.subr.bf16.mxu1 %v3425_v8  ;;  %v3473_v8 = vpack.c.bf16 %v2325_v7, %v2324_v6 }
 0x4d6   :  { %3468 = vmatpush3.bf16.msra.mxu0 %v3467_v3 }
 0x4d7   :  { %3428 = vmatpush3.bf16.msra.mxu1 %v3427_v13  ;;  %3469 = vmatprep.subr.bf16.mxu0 %v3853_v18  ;;  %v3476_v13 = vpack.c.bf16 %v2327_v43, %v2326_v61 }
 0x4d8   :  { %3430 = vmatprep.subr.bf16.mxu1 %v3429_v12 }
 0x4da   :  { %3471 = vmatpush3.bf16.msra.mxu0 %v3470_v38 }
 0x4db   :  { %3432 = vmatpush3.bf16.msra.mxu1 %v3431_v15  ;;  %3472 = vmatprep.subr.bf16.mxu0 %v3853_v18 }
 0x4dc   :  { %3433 = vmatprep.subr.bf16.mxu1 %v3853_v18 }
 0x4de   :  { %3474 = vmatpush3.bf16.msra.mxu0 %v3473_v8 }
 0x4df   :  { %3475 = vmatprep.subr.bf16.mxu0 %v3853_v18 }
 0x4e2   :  { %3477 = vmatpush3.bf16.msra.mxu0 %v3476_v13 }
 0x4e3   :  { %3478 = vmatprep.subr.bf16.mxu0 %v3853_v18 }
 0x591   :  { %v2095_v20 = vpop.f32.mrb[4].mxu1 }
 0x592   :  { %v2096_v21 = vadd.f32 %v2095_v20, %v2022_v17  ;;  %v2097_v23 = vpop.f32.mrb[5].mxu1  ;;  %v2328_v17 = vld [vmem:[%s4252_s13 + $0x70] sm:$0xff] }
 0x593   :  { %v2098_v24 = vadd.f32 %v2097_v23, %v2026_v19  ;;  %v2329_v19 = vld [vmem:[%s4252_s13 + $0x78] sm:$0xff] }
 0x594   :  { %v2102_v28 = vmul.f32 0.01, %v2096_v21  ;;  %vm2100_vm10 = vcmp.ge.f32.partialorder %v2096_v21, 0.0  ;;  %v3479_v20 = vpack.c.bf16 %v2329_v19, %v2328_v17 }
 0x595   :  { %v2103_v29 = vmul.f32 0.01, %v2098_v24  ;;  %vm2101_vm11 = vcmp.ge.f32.partialorder %v2098_v24, 0.0 }
 0x596   :  { %v2104_v40 = vsel %vm2100_vm10, %v2096_v21, %v2102_v28  ;;  %3480 = vmatpush3.bf16.msra.mxu0 %v3479_v20  ;;  %v2429_v28 = vld [vmem:[#allocation21] ss:$0 sm:$0xff] }
 0x597   :  { %v2105_v31 = vsel %vm2101_vm11, %v2098_v24, %v2103_v29 }
 0x598   :  { %2209 = vmatprep.mubr.f32.mxu1 %v2105_v31 }
 0x599   :  { %2210 = vmatmul.mubr.f32.vlgmr.msra.gmra.mrb[6].mxu1 %v2104_v40 }
 0x59a   :  { %3435 = vmatpush3.bf16.msra.mxu1 %v3434_v30  ;;  %2531 = vmatprep.mubr.msk.f32.mxu1 %vm3854_vm12, %v3855_v56 }
 0x59b   :  { %3436 = vmatprep.subr.bf16.mxu1 %v3853_v18 }
 0x59e   :  { %3438 = vmatpush3.bf16.msra.mxu1 %v3437_v11 }
 0x59f   :  { %3439 = vmatprep.subr.bf16.mxu1 %v3853_v18 }
 0x5a2   :  { %3441 = vmatpush3.bf16.msra.mxu1 %v3440_v35 }
 0x5a3   :  { %3442 = vmatprep.subr.bf16.mxu1 %v3853_v18 }
 0x5a6   :  { %3444 = vmatpush3.bf16.msra.mxu1 %v3443_v42 }
 0x5a7   :  { %3445 = vmatprep.subr.bf16.mxu1 %v3853_v18 }
 0x5aa   :  { %3447 = vmatpush3.bf16.msra.mxu1 %v3446_v47 }
 0x5ab   :  { %3448 = vmatprep.subr.bf16.mxu1 %v3853_v18 }
 0x5ae   :  { %3450 = vmatpush3.bf16.msra.mxu1 %v3449_v50 }
 0x5af   :  { %3451 = vmatprep.subr.bf16.mxu1 %v3853_v18 }
 0x5b2   :  { %3453 = vmatpush3.bf16.msra.mxu1 %v3452_v25 }
 0x5b3   :  { %3454 = vmatprep.subr.bf16.mxu1 %v3853_v18  ;;  %v2428_v18 = vld [vmem:[#allocation19] ss:$0 sm:$0xff] }
 0x5b6   :  { %3456 = vmatpush3.bf16.msra.mxu1 %v3455_v55 }
 0x66c   :  { %v2462_v9 = vpop.f32.mrb[6].mxu1 }
 0x66d   :  { %v2463_v12 = vpop.f32.mrb[7].mxu1 }
 0x66e   :  { %v2464_v14 = vadd.f32 %v2463_v12, %v2462_v9 }
 0x670   :  { %v2212_v46 = vadd.f32 %v2464_v14, %v2427_v10 }
 0x672   :  { %v2216_v15 = vmul.f32 0.01, %v2212_v46  ;;  %vm2215_vm13 = vcmp.ge.f32.partialorder %v2212_v46, 0.0 }
 0x674   :  { %v2217_v16 = vsel %vm2215_vm13, %v2212_v46, %v2216_v15 }
 0x675   :  { %2532 = vmatmul.mubr.f32.vlgmr.msra.gmra.mrb[8].mxu1 %v2217_v16 }
 0x748   :  { %v2307_v21 = vpop.f32.mrb[8].mxu1 }
 0x749   :  { %v2308_v23 = vadd.f32 %v2428_v18, %v2307_v21  ;;  %v2533_v24 = vpop.f32.mrb[9].mxu1 }
 0x74b   :  { %vm2311_vm14 = vcmp.ge.f32.partialorder %v2308_v23, 0.0  ;;  %v2312_v26 = vmul.f32 0.01, %v2308_v23 }
 0x74d   :  { %v2313_v27 = vsel %vm2311_vm14, %v2308_v23, %v2312_v26 }
 0x74e   :  { %2567 = vmatmul.mubr.f32.vlgmr.msra.gmra.mrb[6].mxu0 %v2313_v27 }
 0x821   :  { %v2403_v29 = vpop.f32.mrb[6].mxu0 }
 0x822   :  { %v2404_v30 = vadd.f32 %v2429_v28, %v2403_v29  ;;  %v2568_v31 = vpop.f32.mrb[7].mxu0 }
 0x824   :  { %v2407_v32 = vsub.f32 0.0, %v2404_v30 }
 0x826   :  { %v2408_v33 = vmul.f32 1.442695, %v2407_v32 }
 0x828   :  { %3529 = vpow2.f32 %v2408_v33 }
 0x832   :  { %v3530_v40 = vpop.eup %3529 }
 0x833   :  { %v2410_v11 = vadd.f32 1.0, %v3530_v40 }
 0x835   :  { %3531 = vrcp.f32 %v2410_v11 }
 0x83f   :  { %v3532_v39 = vpop.eup %3531 }
 0x840   :  { %2414 = vst.msk [vmem:[%s4254_s15] sm:$0x3] %vm2413_vm15, %v3532_v39 }
 0x841   :  { %2419 = vsyncpa [#allocation3], 1 }
 0x842   :  { %2420 = vsyncpa [#allocation5], 1 }
 0x843   :  { %2421 = vsyncpa [#allocation8], 1 }
 0x844   :  { %2422 = vsyncpa [#allocation11], 1 }
 0x845   :  { %2423 = vsyncpa [#allocation14], 1 }
 0x846   :  { %2424 = vsyncpa [#allocation17], 1 }
 0x847   :  { %2425 = vsyncpa [#allocation20], 1 }

</bundles_post_ra>
